<compile_context>
chip_gen: v5e
topology: v5e:2x2
jax: 0.10.0
libtpu: 0.0.40
codegen_flags: <defaults>
</compile_context>

<pallas_src>
import functools

import jax
import jax.numpy as jnp
from jax.experimental import pallas as pl
from jax.experimental.pallas import tpu as pltpu

MODEL_CONFIG = dict(input_size=8, hidden_size=32, num_layers=2, dropout=0.0, output_size=4)


def imu_traj_kernel(x_ref, mask_ref,
                    wih0_ref, whh0_ref, bi0_ref, bhn0_ref,
                    wih1_ref, whh1_ref, bi1_ref, bhn1_ref,
                    watt_ref, batt_ref, wfc_ref, bfc_ref,
                    out_ref, *, T, B):
    """Fused 2-layer GRU + temporal attention + FC for one batch block.

    x_ref:    (T*B, Din)  time-major rows (row t*B + b = input of sequence b at time t)
    mask_ref: (T*B, 1)    1.0 where t < lengths[b], else 0.0
    weights:  gate-fused, gate order [r, z, n]:
              wih: (Din_or_H, 3H), whh: (H, 3H), bi: (1, 3H) = [b_ir+b_hr, b_iz+b_hz, b_in],
              bhn: (1, H)  (kept separate: stays inside r*(gh_n + b_hn), as in PyTorch's GRU)
    out_ref:  (T*B, O)
    """
    H = whh0_ref.shape[0]

    # Weights / biases loaded & broadcast once (hoisted: JAX does not CSE broadcasts).
    whh0 = whh0_ref[...]
    wih1 = wih1_ref[...]
    whh1 = whh1_ref[...]
    bi1 = bi1_ref[...]
    bhn0 = jnp.broadcast_to(bhn0_ref[...], (B, H))
    bhn1 = jnp.broadcast_to(bhn1_ref[...], (B, H))
    watt = watt_ref[...]                       # (1, H)
    b_att = batt_ref[...]                      # (1, 1)

    # Layer-0 input projection for the WHOLE sequence: one fused (T*B, Din) @ (Din, 3H) pass.
    gi0 = (jnp.dot(x_ref[...], wih0_ref[...], preferred_element_type=jnp.float32)
           + bi0_ref[...])                     # (T*B, 3H)

    def gru_gates(gi, gh, h, bhn):
        r = jax.nn.sigmoid(gi[:, 0:H] + gh[:, 0:H])
        z = jax.nn.sigmoid(gi[:, H:2 * H] + gh[:, H:2 * H])
        n = jnp.tanh(gi[:, 2 * H:3 * H] + r * (gh[:, 2 * H:3 * H] + bhn))
        return (1.0 - z) * n + z * h

    # --- fused 2-layer recurrence: both hidden states vreg-resident; no per-step VMEM traffic ---
    h0 = jnp.zeros((B, H), jnp.float32)
    h1 = jnp.zeros((B, H), jnp.float32)
    seqs = []                                   # per-step layer-1 outputs, masked (pad_packed)
    for t in range(T):                          # static unroll (T known at trace time)
        lo = t * B
        gh0 = jnp.dot(h0, whh0, preferred_element_type=jnp.float32)        # one 3H-wide push
        h0 = gru_gates(gi0[lo:lo + B, :], gh0, h0, bhn0)
        gi1 = jnp.dot(h0, wih1, preferred_element_type=jnp.float32) + bi1  # layer-1 input proj
        gh1 = jnp.dot(h1, whh1, preferred_element_type=jnp.float32)
        h1 = gru_gates(gi1, gh1, h1, bhn1)
        # pad_packed_sequence: zero outputs past each length (where, not *, so NaN padding can't leak)
        seqs.append(jnp.where(mask_ref[lo:lo + B, :] > 0.0, h1, 0.0))

    # --- temporal attention, per B-row chunk (no (T,1) tiles / full-sequence copies) ---
    logits = [jnp.sum(s * watt, axis=-1, keepdims=True) + b_att for s in seqs]   # T x (B, 1)
    m = logits[0]
    for t in range(1, T):
        m = jnp.maximum(m, logits[t])
    es = [jnp.exp(l - m) for l in logits]
    denom = es[0]
    weighted = seqs[0] * es[0]
    for t in range(1, T):
        denom = denom + es[t]
        weighted = weighted + seqs[t] * es[t]
    # Single divide of the (B,1) denominator. pl.reciprocal(approx=True) would move this to the
    # EUP, but its ~2^-12 relative error is at the edge of the 1e-4 reference check, so keep exact.
    weighted = weighted * (1.0 / denom)                                           # (B, H)

    # --- residual add + per-step FC as ONE (T*B, H) @ (H, O) MXU pass ---
    combined = jnp.concatenate([s + weighted for s in seqs], axis=0)              # (T*B, H)
    out_ref[...] = (jnp.dot(combined, wfc_ref[...], preferred_element_type=jnp.float32)
                    + bfc_ref[...])


def _pack_gru_biases(b_ih, b_hh, H):
    """r/z biases pre-summed, n input-bias into the fused (1, 3H) row; n hidden-bias kept separate."""
    bi = jnp.concatenate([b_ih[:, :2 * H] + b_hh[:, :2 * H], b_ih[:, 2 * H:]], axis=1)   # (1, 3H)
    bhn = b_hh[:, 2 * H:]                                                                # (1, H)
    return bi, bhn


def _pick_batch_block(B):
    """Generation-aware grid choice.

    v5e/v6e have one TensorCore: a 1-D grid is just a serial loop, so one block (grid=(1,))
    avoids per-grid-step overhead and doubles MXU M-fill.  v7x has 2 TensorCores: use two equal
    'parallel' blocks so both cores get work.
    """
    try:
        kind = jax.devices()[0].device_kind.lower()
    except Exception:
        kind = ""
    if ("v7" in kind or "7x" in kind) and B % 2 == 0:
        return B // 2
    return B


def imu_to_trajectory(x, lengths, params, batch_block=None):
    """x: (B, T, Din) float32 batch-first (like PyTorch); lengths: (B,) int32 sorted descending
    with lengths[0] == T (so pad_packed_sequence would not trim the time axis)."""
    B, T, Din = x.shape
    H = params['w_hh0'].shape[0]
    O = params['w_fc'].shape[1]

    # Host-side preconditions mirroring pack_padded_sequence(enforce_sorted=True) and the
    # "max length == T" assumption (skipped if lengths is a tracer).
    # TODO(synk): PyTorch's torch.isnan(x) input assert is not reproduced in-kernel; padded-step
    # NaNs are neutralized by the where-mask, NaNs at valid positions propagate as in eager PyTorch.
    try:
        l = jax.device_get(lengths)
        assert (l > 0).all(), "Non-positive lengths"
        assert (l[:-1] >= l[1:]).all(), "lengths must be sorted descending (enforce_sorted=True)"
        assert int(l.max()) == T, "max(lengths) must equal T, else pad_packed_sequence trims the time axis"
    except jax.errors.ConcretizationTypeError:
        pass

    Bb = _pick_batch_block(B) if batch_block is None else batch_block
    assert B % Bb == 0, "batch_block must divide the batch size"
    nb = B // Bb

    # Time-major within each batch block, flattened to 2-D (row = (t, b)); GRU recurrence,
    # attention and FC all share this layout (no in-kernel reshapes of VMEM data).
    # NOTE: this reshape/transpose (and the inverse on the output) are extra HBM passes outside
    # the kernel; at production sizes either accept time-major I/O or fuse into the consumer.
    xb = (x.astype(jnp.float32)
           .reshape(nb, Bb, T, Din).transpose(0, 2, 1, 3).reshape(nb, T * Bb, Din))
    lens_b = jnp.asarray(lengths, jnp.int32).reshape(nb, Bb)
    mask_b = (jnp.arange(T)[None, :, None] < lens_b[:, None, :]).astype(jnp.float32)
    mask_b = mask_b.reshape(nb, T * Bb, 1)

    bi0, bhn0 = _pack_gru_biases(params['b_ih0'], params['b_hh0'], H)
    bi1, bhn1 = _pack_gru_biases(params['b_ih1'], params['b_hh1'], H)
    weights = (params['w_ih0'], params['w_hh0'], bi0, bhn0,
               params['w_ih1'], params['w_hh1'], bi1, bhn1,
               params['w_att'].T, params['b_att'], params['w_fc'], params['b_fc'])

    # VMEM budget (per core): double-buffered x/mask/out blocks + resident weights.  Trivial here
    # (<100 KB), but v7x has only 64 MiB VMEM (32 MiB scoped default) -- re-check before scaling
    # T or batch_block, or raise vmem_limit_bytes in CompilerParams.
    vmem_est = 4 * (2 * T * Bb * (Din + 1) + 2 * T * Bb * O + sum(int(w.size) for w in weights))
    assert vmem_est < 32 * 1024 * 1024, (
        f"VMEM estimate {vmem_est} B exceeds the 32 MiB scoped default; shrink batch_block or "
        "raise vmem_limit_bytes in pltpu.CompilerParams")

    def full_spec(a):
        nd = a.ndim
        return pl.BlockSpec(a.shape, lambda i, _nd=nd: (0,) * _nd)      # resident across the grid

    in_specs = ([pl.BlockSpec((None, T * Bb, Din), lambda i: (i, 0, 0)),
                 pl.BlockSpec((None, T * Bb, 1), lambda i: (i, 0, 0))]
                + [full_spec(w) for w in weights])

    kernel = functools.partial(imu_traj_kernel, T=T, B=Bb)

    out = pl.pallas_call(
        kernel,
        out_shape=jax.ShapeDtypeStruct((nb, T * Bb, O), jnp.float32),
        grid=(nb,),
        in_specs=in_specs,
        out_specs=pl.BlockSpec((None, T * Bb, O), lambda i: (i, 0, 0)),
        compiler_params=pltpu.CompilerParams(
            dimension_semantics=("parallel",)),      # batch blocks are independent (shards TCs on v7x)
    )(xb, mask_b, *weights)

    # (nb, T*Bb, O) -> (B, T, O)
    return out.reshape(nb, T, Bb, O).transpose(0, 2, 1, 3).reshape(B, T, O)


def init_params(key, cfg):
    """Deterministic uniform(-1/sqrt(H), 1/sqrt(H)) init (PyTorch GRU/Linear default style).
    GRU matrices stored pre-transposed as (in, 3H), gate order [r, z, n]."""
    Din, H, O = cfg['input_size'], cfg['hidden_size'], cfg['output_size']
    k = 1.0 / float(H) ** 0.5
    keys = jax.random.split(key, 14)
    u = lambda kk, shape: jax.random.uniform(kk, shape, jnp.float32, -k, k)
    return dict(
        w_ih0=u(keys[0], (Din, 3 * H)), w_hh0=u(keys[1], (H, 3 * H)),
        b_ih0=u(keys[2], (1, 3 * H)), b_hh0=u(keys[3], (1, 3 * H)),
        w_ih1=u(keys[4], (H, 3 * H)), w_hh1=u(keys[5], (H, 3 * H)),
        b_ih1=u(keys[6], (1, 3 * H)), b_hh1=u(keys[7], (1, 3 * H)),
        w_att=u(keys[8], (H, 1)), b_att=u(keys[9], (1, 1)),
        w_fc=u(keys[10], (H, O)), b_fc=u(keys[11], (1, O)),
    )


def reference_forward(x, lengths, params):
    """Pure-JAX reference mirroring the PyTorch forward (eval mode)."""
    B, T, _ = x.shape
    H = params['w_hh0'].shape[0]

    def gru_layer(seq, w_ih, w_hh, b_ih, b_hh):
        def step(h, x_t):
            gi = x_t @ w_ih + b_ih
            gh = h @ w_hh + b_hh
            r = jax.nn.sigmoid(gi[:, :H] + gh[:, :H])
            z = jax.nn.sigmoid(gi[:, H:2 * H] + gh[:, H:2 * H])
            n = jnp.tanh(gi[:, 2 * H:] + r * gh[:, 2 * H:])
            h_new = (1.0 - z) * n + z * h
            return h_new, h_new
        _, ys = jax.lax.scan(step, jnp.zeros((B, H), jnp.float32),
                             jnp.transpose(seq, (1, 0, 2)))
        return jnp.transpose(ys, (1, 0, 2))

    out = gru_layer(x, params['w_ih0'], params['w_hh0'], params['b_ih0'], params['b_hh0'])
    out = gru_layer(out, params['w_ih1'], params['w_hh1'], params['b_ih1'], params['b_hh1'])
    mask = (jnp.arange(T)[None, :] < lengths[:, None]).astype(jnp.float32)     # (B, T)
    out = out * mask[:, :, None]                                               # pad_packed zeros
    logits = out @ params['w_att'] + params['b_att']                           # (B, T, 1)
    att = jax.nn.softmax(logits, axis=1)
    weighted = jnp.sum(out * att, axis=1)                                      # (B, H)
    out = out + weighted[:, None, :]
    return out @ params['w_fc'] + params['b_fc']


if __name__ == "__main__":
    cfg = MODEL_CONFIG
    B, T = 16, 8
    key = jax.random.PRNGKey(0)
    kx, kp = jax.random.split(key)

    params = init_params(kp, cfg)
    x = jax.random.normal(kx, (B, T, cfg['input_size']), jnp.float32)
    # sorted desc (enforce_sorted=True); max == T so pad_packed_sequence keeps the full time axis
    lengths = jnp.array([8, 8, 8, 7, 7, 6, 6, 5, 5, 4, 4, 3, 3, 2, 2, 1], dtype=jnp.int32)

    # batch_block auto: one block (grid=(1,)) on single-TC v5e/v6e, two 'parallel' blocks on v7x.
    out = imu_to_trajectory(x, lengths, params)
    out = jax.block_until_ready(out)

    ref = reference_forward(x, lengths, params)
    assert out.shape == (B, T, cfg['output_size']), out.shape
    max_err = float(jnp.max(jnp.abs(out - ref)))
    assert jnp.allclose(out, ref, atol=1e-4, rtol=1e-4), f"max_err={max_err}"
    print("KERNEL_OK")
</pallas_src>

<mosaic_0001>
module attributes {stable_mosaic.version = 11 : i64} {
  func.func @imu_traj_kernel(%arg0: i32, %arg1: memref<1x128x8xf32, #tpu.memory_space<vmem>>, %arg2: memref<1x128x1xf32, #tpu.memory_space<vmem>>, %arg3: memref<8x96xf32, #tpu.memory_space<vmem>>, %arg4: memref<32x96xf32, #tpu.memory_space<vmem>>, %arg5: memref<1x96xf32, #tpu.memory_space<vmem>>, %arg6: memref<1x32xf32, #tpu.memory_space<vmem>>, %arg7: memref<32x96xf32, #tpu.memory_space<vmem>>, %arg8: memref<32x96xf32, #tpu.memory_space<vmem>>, %arg9: memref<1x96xf32, #tpu.memory_space<vmem>>, %arg10: memref<1x32xf32, #tpu.memory_space<vmem>>, %arg11: memref<1x32xf32, #tpu.memory_space<vmem>>, %arg12: memref<1x1xf32, #tpu.memory_space<vmem>>, %arg13: memref<32x4xf32, #tpu.memory_space<vmem>>, %arg14: memref<1x4xf32, #tpu.memory_space<vmem>>, %arg15: memref<1x128x4xf32, #tpu.memory_space<vmem>>) attributes {dimension_semantics = [#tpu.dimension_semantics<parallel>], iteration_bounds = array<i64: 1>, scalar_prefetch = 0 : i64, scratch_operands = 0 : i64, tpu.core_type = #tpu.core_type<tc>, window_params = [{transform_indices = @transform_0, window_bounds = array<i64: 1, 128, 8>}, {transform_indices = @transform_1, window_bounds = array<i64: 1, 128, 1>}, {pipeline_mode = #tpu.pipeline_mode<synchronous>, transform_indices = @transform_2, window_bounds = array<i64: 8, 96>}, {pipeline_mode = #tpu.pipeline_mode<synchronous>, transform_indices = @transform_3, window_bounds = array<i64: 32, 96>}, {pipeline_mode = #tpu.pipeline_mode<synchronous>, transform_indices = @transform_4, window_bounds = array<i64: 1, 96>}, {pipeline_mode = #tpu.pipeline_mode<synchronous>, transform_indices = @transform_5, window_bounds = array<i64: 1, 32>}, {pipeline_mode = #tpu.pipeline_mode<synchronous>, transform_indices = @transform_6, window_bounds = array<i64: 32, 96>}, {pipeline_mode = #tpu.pipeline_mode<synchronous>, transform_indices = @transform_7, window_bounds = array<i64: 32, 96>}, {pipeline_mode = #tpu.pipeline_mode<synchronous>, transform_indices = @transform_8, window_bounds = array<i64: 1, 96>}, {pipeline_mode = #tpu.pipeline_mode<synchronous>, transform_indices = @transform_9, window_bounds = array<i64: 1, 32>}, {pipeline_mode = #tpu.pipeline_mode<synchronous>, transform_indices = @transform_10, window_bounds = array<i64: 1, 32>}, {pipeline_mode = #tpu.pipeline_mode<synchronous>, transform_indices = @transform_11, window_bounds = array<i64: 1, 1>}, {pipeline_mode = #tpu.pipeline_mode<synchronous>, transform_indices = @transform_12, window_bounds = array<i64: 32, 4>}, {pipeline_mode = #tpu.pipeline_mode<synchronous>, transform_indices = @transform_13, window_bounds = array<i64: 1, 4>}, {transform_indices = @transform_14, window_bounds = array<i64: 1, 128, 4>}]} {
    %c0 = arith.constant 0 : index
    %c0_0 = arith.constant 0 : index
    %0 = vector.load %arg4[%c0, %c0_0] : memref<32x96xf32, #tpu.memory_space<vmem>>, vector<32x96xf32>
    %c0_1 = arith.constant 0 : index
    %c0_2 = arith.constant 0 : index
    %1 = vector.load %arg7[%c0_1, %c0_2] : memref<32x96xf32, #tpu.memory_space<vmem>>, vector<32x96xf32>
    %c0_3 = arith.constant 0 : index
    %c0_4 = arith.constant 0 : index
    %2 = vector.load %arg8[%c0_3, %c0_4] : memref<32x96xf32, #tpu.memory_space<vmem>>, vector<32x96xf32>
    %c0_5 = arith.constant 0 : index
    %c0_6 = arith.constant 0 : index
    %3 = vector.load %arg9[%c0_5, %c0_6] : memref<1x96xf32, #tpu.memory_space<vmem>>, vector<1x96xf32>
    %c0_7 = arith.constant 0 : index
    %c0_8 = arith.constant 0 : index
    %4 = vector.load %arg6[%c0_7, %c0_8] : memref<1x32xf32, #tpu.memory_space<vmem>>, vector<1x32xf32>
    %5 = vector.shape_cast %4 : vector<1x32xf32> to vector<1x32xf32>
    %6 = vector.broadcast %5 : vector<1x32xf32> to vector<16x32xf32>
    %c0_9 = arith.constant 0 : index
    %c0_10 = arith.constant 0 : index
    %7 = vector.load %arg10[%c0_9, %c0_10] : memref<1x32xf32, #tpu.memory_space<vmem>>, vector<1x32xf32>
    %8 = vector.shape_cast %7 : vector<1x32xf32> to vector<1x32xf32>
    %9 = vector.broadcast %8 : vector<1x32xf32> to vector<16x32xf32>
    %c0_11 = arith.constant 0 : index
    %c0_12 = arith.constant 0 : index
    %10 = vector.load %arg11[%c0_11, %c0_12] : memref<1x32xf32, #tpu.memory_space<vmem>>, vector<1x32xf32>
    %c0_13 = arith.constant 0 : index
    %c0_14 = arith.constant 0 : index
    %11 = vector.load %arg12[%c0_13, %c0_14] : memref<1x1xf32, #tpu.memory_space<vmem>>, vector<1x1xf32>
    %c0_15 = arith.constant 0 : index
    %c0_16 = arith.constant 0 : index
    %c0_17 = arith.constant 0 : index
    %12 = vector.load %arg1[%c0_15, %c0_16, %c0_17] : memref<1x128x8xf32, #tpu.memory_space<vmem>>, vector<1x128x8xf32>
    %13 = vector.shape_cast %12 : vector<1x128x8xf32> to vector<128x8xf32>
    %c0_18 = arith.constant 0 : index
    %c0_19 = arith.constant 0 : index
    %14 = vector.load %arg3[%c0_18, %c0_19] : memref<8x96xf32, #tpu.memory_space<vmem>>, vector<8x96xf32>
    %cst = arith.constant dense<0.000000e+00> : vector<128x96xf32>
    %15 = tpu.matmul %13, %14, %cst {dimension_numbers = #tpu.dot_dimension_numbers<[1], [0], [0], [1], [0, 0, 1, 1], [], []>} : vector<128x8xf32>, vector<8x96xf32>, vector<128x96xf32> -> vector<128x96xf32>
    %c0_20 = arith.constant 0 : index
    %c0_21 = arith.constant 0 : index
    %16 = vector.load %arg5[%c0_20, %c0_21] : memref<1x96xf32, #tpu.memory_space<vmem>>, vector<1x96xf32>
    %17 = vector.broadcast %16 : vector<1x96xf32> to vector<128x96xf32>
    %18 = arith.addf %15, %17 : vector<128x96xf32>
    %cst_22 = arith.constant 0.000000e+00 : f32
    %19 = vector.broadcast %cst_22 : f32 to vector<16x32xf32>
    %cst_23 = arith.constant 0.000000e+00 : f32
    %20 = vector.broadcast %cst_23 : f32 to vector<16x32xf32>
    %cst_24 = arith.constant dense<0.000000e+00> : vector<16x96xf32>
    %21 = tpu.matmul %19, %0, %cst_24 {dimension_numbers = #tpu.dot_dimension_numbers<[1], [0], [0], [1], [0, 0, 1, 1], [], []>} : vector<16x32xf32>, vector<32x96xf32>, vector<16x96xf32> -> vector<16x96xf32>
    %22 = vector.extract_strided_slice %18 {offsets = [0, 0], sizes = [16, 96], strides = [1, 1]} : vector<128x96xf32> to vector<16x96xf32>
    %23 = vector.extract_strided_slice %22 {offsets = [0, 0], sizes = [16, 32], strides = [1, 1]} : vector<16x96xf32> to vector<16x32xf32>
    %24 = vector.extract_strided_slice %21 {offsets = [0, 0], sizes = [16, 32], strides = [1, 1]} : vector<16x96xf32> to vector<16x32xf32>
    %25 = arith.addf %23, %24 : vector<16x32xf32>
    %26 = arith.negf %25 : vector<16x32xf32>
    %27 = math.exp %26 : vector<16x32xf32>
    %cst_25 = arith.constant 1.000000e+00 : f32
    %28 = vector.broadcast %cst_25 : f32 to vector<16x32xf32>
    %29 = arith.addf %28, %27 : vector<16x32xf32>
    %30 = arith.divf %28, %29 : vector<16x32xf32>
    %31 = vector.extract_strided_slice %22 {offsets = [0, 32], sizes = [16, 32], strides = [1, 1]} : vector<16x96xf32> to vector<16x32xf32>
    %32 = vector.extract_strided_slice %21 {offsets = [0, 32], sizes = [16, 32], strides = [1, 1]} : vector<16x96xf32> to vector<16x32xf32>
    %33 = arith.addf %31, %32 : vector<16x32xf32>
    %34 = arith.negf %33 : vector<16x32xf32>
    %35 = math.exp %34 : vector<16x32xf32>
    %cst_26 = arith.constant 1.000000e+00 : f32
    %36 = vector.broadcast %cst_26 : f32 to vector<16x32xf32>
    %37 = arith.addf %36, %35 : vector<16x32xf32>
    %38 = arith.divf %36, %37 : vector<16x32xf32>
    %39 = vector.extract_strided_slice %22 {offsets = [0, 64], sizes = [16, 32], strides = [1, 1]} : vector<16x96xf32> to vector<16x32xf32>
    %40 = vector.extract_strided_slice %21 {offsets = [0, 64], sizes = [16, 32], strides = [1, 1]} : vector<16x96xf32> to vector<16x32xf32>
    %41 = arith.addf %40, %6 : vector<16x32xf32>
    %42 = arith.mulf %30, %41 : vector<16x32xf32>
    %43 = arith.addf %39, %42 : vector<16x32xf32>
    %44 = math.tanh %43 : vector<16x32xf32>
    %cst_27 = arith.constant 1.000000e+00 : f32
    %45 = vector.broadcast %cst_27 : f32 to vector<16x32xf32>
    %46 = arith.subf %45, %38 : vector<16x32xf32>
    %47 = arith.mulf %46, %44 : vector<16x32xf32>
    %48 = arith.mulf %38, %19 : vector<16x32xf32>
    %49 = arith.addf %47, %48 : vector<16x32xf32>
    %cst_28 = arith.constant dense<0.000000e+00> : vector<16x96xf32>
    %50 = tpu.matmul %49, %1, %cst_28 {dimension_numbers = #tpu.dot_dimension_numbers<[1], [0], [0], [1], [0, 0, 1, 1], [], []>} : vector<16x32xf32>, vector<32x96xf32>, vector<16x96xf32> -> vector<16x96xf32>
    %51 = vector.broadcast %3 : vector<1x96xf32> to vector<16x96xf32>
    %52 = arith.addf %50, %51 : vector<16x96xf32>
    %cst_29 = arith.constant dense<0.000000e+00> : vector<16x96xf32>
    %53 = tpu.matmul %20, %2, %cst_29 {dimension_numbers = #tpu.dot_dimension_numbers<[1], [0], [0], [1], [0, 0, 1, 1], [], []>} : vector<16x32xf32>, vector<32x96xf32>, vector<16x96xf32> -> vector<16x96xf32>
    %54 = vector.extract_strided_slice %52 {offsets = [0, 0], sizes = [16, 32], strides = [1, 1]} : vector<16x96xf32> to vector<16x32xf32>
    %55 = vector.extract_strided_slice %53 {offsets = [0, 0], sizes = [16, 32], strides = [1, 1]} : vector<16x96xf32> to vector<16x32xf32>
    %56 = arith.addf %54, %55 : vector<16x32xf32>
    %57 = arith.negf %56 : vector<16x32xf32>
    %58 = math.exp %57 : vector<16x32xf32>
    %cst_30 = arith.constant 1.000000e+00 : f32
    %59 = vector.broadcast %cst_30 : f32 to vector<16x32xf32>
    %60 = arith.addf %59, %58 : vector<16x32xf32>
    %61 = arith.divf %59, %60 : vector<16x32xf32>
    %62 = vector.extract_strided_slice %52 {offsets = [0, 32], sizes = [16, 32], strides = [1, 1]} : vector<16x96xf32> to vector<16x32xf32>
    %63 = vector.extract_strided_slice %53 {offsets = [0, 32], sizes = [16, 32], strides = [1, 1]} : vector<16x96xf32> to vector<16x32xf32>
    %64 = arith.addf %62, %63 : vector<16x32xf32>
    %65 = arith.negf %64 : vector<16x32xf32>
    %66 = math.exp %65 : vector<16x32xf32>
    %cst_31 = arith.constant 1.000000e+00 : f32
    %67 = vector.broadcast %cst_31 : f32 to vector<16x32xf32>
    %68 = arith.addf %67, %66 : vector<16x32xf32>
    %69 = arith.divf %67, %68 : vector<16x32xf32>
    %70 = vector.extract_strided_slice %52 {offsets = [0, 64], sizes = [16, 32], strides = [1, 1]} : vector<16x96xf32> to vector<16x32xf32>
    %71 = vector.extract_strided_slice %53 {offsets = [0, 64], sizes = [16, 32], strides = [1, 1]} : vector<16x96xf32> to vector<16x32xf32>
    %72 = arith.addf %71, %9 : vector<16x32xf32>
    %73 = arith.mulf %61, %72 : vector<16x32xf32>
    %74 = arith.addf %70, %73 : vector<16x32xf32>
    %75 = math.tanh %74 : vector<16x32xf32>
    %cst_32 = arith.constant 1.000000e+00 : f32
    %76 = vector.broadcast %cst_32 : f32 to vector<16x32xf32>
    %77 = arith.subf %76, %69 : vector<16x32xf32>
    %78 = arith.mulf %77, %75 : vector<16x32xf32>
    %79 = arith.mulf %69, %20 : vector<16x32xf32>
    %80 = arith.addf %78, %79 : vector<16x32xf32>
    %c0_33 = arith.constant 0 : index
    %c0_34 = arith.constant 0 : index
    %c0_35 = arith.constant 0 : index
    %81 = vector.load %arg2[%c0_33, %c0_34, %c0_35] : memref<1x128x1xf32, #tpu.memory_space<vmem>>, vector<1x16x1xf32>
    %82 = vector.shape_cast %81 : vector<1x16x1xf32> to vector<16x1xf32>
    %cst_36 = arith.constant 0.000000e+00 : f32
    %83 = vector.broadcast %cst_36 : f32 to vector<16x1xf32>
    %84 = arith.cmpf ogt, %82, %83 : vector<16x1xf32>
    %cst_37 = arith.constant 0.000000e+00 : f32
    %85 = vector.shape_cast %84 : vector<16x1xi1> to vector<16x1xi1>
    %86 = vector.broadcast %85 : vector<16x1xi1> to vector<16x32xi1>
    %87 = vector.broadcast %cst_37 : f32 to vector<16x32xf32>
    %88 = arith.select %86, %80, %87 : vector<16x32xi1>, vector<16x32xf32>
    %cst_38 = arith.constant dense<0.000000e+00> : vector<16x96xf32>
    %89 = tpu.matmul %49, %0, %cst_38 {dimension_numbers = #tpu.dot_dimension_numbers<[1], [0], [0], [1], [0, 0, 1, 1], [], []>} : vector<16x32xf32>, vector<32x96xf32>, vector<16x96xf32> -> vector<16x96xf32>
    %90 = vector.extract_strided_slice %18 {offsets = [16, 0], sizes = [16, 96], strides = [1, 1]} : vector<128x96xf32> to vector<16x96xf32>
    %91 = vector.extract_strided_slice %90 {offsets = [0, 0], sizes = [16, 32], strides = [1, 1]} : vector<16x96xf32> to vector<16x32xf32>
    %92 = vector.extract_strided_slice %89 {offsets = [0, 0], sizes = [16, 32], strides = [1, 1]} : vector<16x96xf32> to vector<16x32xf32>
    %93 = arith.addf %91, %92 : vector<16x32xf32>
    %94 = arith.negf %93 : vector<16x32xf32>
    %95 = math.exp %94 : vector<16x32xf32>
    %cst_39 = arith.constant 1.000000e+00 : f32
    %96 = vector.broadcast %cst_39 : f32 to vector<16x32xf32>
    %97 = arith.addf %96, %95 : vector<16x32xf32>
    %98 = arith.divf %96, %97 : vector<16x32xf32>
    %99 = vector.extract_strided_slice %90 {offsets = [0, 32], sizes = [16, 32], strides = [1, 1]} : vector<16x96xf32> to vector<16x32xf32>
    %100 = vector.extract_strided_slice %89 {offsets = [0, 32], sizes = [16, 32], strides = [1, 1]} : vector<16x96xf32> to vector<16x32xf32>
    %101 = arith.addf %99, %100 : vector<16x32xf32>
    %102 = arith.negf %101 : vector<16x32xf32>
    %103 = math.exp %102 : vector<16x32xf32>
    %cst_40 = arith.constant 1.000000e+00 : f32
    %104 = vector.broadcast %cst_40 : f32 to vector<16x32xf32>
    %105 = arith.addf %104, %103 : vector<16x32xf32>
    %106 = arith.divf %104, %105 : vector<16x32xf32>
    %107 = vector.extract_strided_slice %90 {offsets = [0, 64], sizes = [16, 32], strides = [1, 1]} : vector<16x96xf32> to vector<16x32xf32>
    %108 = vector.extract_strided_slice %89 {offsets = [0, 64], sizes = [16, 32], strides = [1, 1]} : vector<16x96xf32> to vector<16x32xf32>
    %109 = arith.addf %108, %6 : vector<16x32xf32>
    %110 = arith.mulf %98, %109 : vector<16x32xf32>
    %111 = arith.addf %107, %110 : vector<16x32xf32>
    %112 = math.tanh %111 : vector<16x32xf32>
    %cst_41 = arith.constant 1.000000e+00 : f32
    %113 = vector.broadcast %cst_41 : f32 to vector<16x32xf32>
    %114 = arith.subf %113, %106 : vector<16x32xf32>
    %115 = arith.mulf %114, %112 : vector<16x32xf32>
    %116 = arith.mulf %106, %49 : vector<16x32xf32>
    %117 = arith.addf %115, %116 : vector<16x32xf32>
    %cst_42 = arith.constant dense<0.000000e+00> : vector<16x96xf32>
    %118 = tpu.matmul %117, %1, %cst_42 {dimension_numbers = #tpu.dot_dimension_numbers<[1], [0], [0], [1], [0, 0, 1, 1], [], []>} : vector<16x32xf32>, vector<32x96xf32>, vector<16x96xf32> -> vector<16x96xf32>
    %119 = vector.broadcast %3 : vector<1x96xf32> to vector<16x96xf32>
    %120 = arith.addf %118, %119 : vector<16x96xf32>
    %cst_43 = arith.constant dense<0.000000e+00> : vector<16x96xf32>
    %121 = tpu.matmul %80, %2, %cst_43 {dimension_numbers = #tpu.dot_dimension_numbers<[1], [0], [0], [1], [0, 0, 1, 1], [], []>} : vector<16x32xf32>, vector<32x96xf32>, vector<16x96xf32> -> vector<16x96xf32>
    %122 = vector.extract_strided_slice %120 {offsets = [0, 0], sizes = [16, 32], strides = [1, 1]} : vector<16x96xf32> to vector<16x32xf32>
    %123 = vector.extract_strided_slice %121 {offsets = [0, 0], sizes = [16, 32], strides = [1, 1]} : vector<16x96xf32> to vector<16x32xf32>
    %124 = arith.addf %122, %123 : vector<16x32xf32>
    %125 = arith.negf %124 : vector<16x32xf32>
    %126 = math.exp %125 : vector<16x32xf32>
    %cst_44 = arith.constant 1.000000e+00 : f32
    %127 = vector.broadcast %cst_44 : f32 to vector<16x32xf32>
    %128 = arith.addf %127, %126 : vector<16x32xf32>
    %129 = arith.divf %127, %128 : vector<16x32xf32>
    %130 = vector.extract_strided_slice %120 {offsets = [0, 32], sizes = [16, 32], strides = [1, 1]} : vector<16x96xf32> to vector<16x32xf32>
    %131 = vector.extract_strided_slice %121 {offsets = [0, 32], sizes = [16, 32], strides = [1, 1]} : vector<16x96xf32> to vector<16x32xf32>
    %132 = arith.addf %130, %131 : vector<16x32xf32>
    %133 = arith.negf %132 : vector<16x32xf32>
    %134 = math.exp %133 : vector<16x32xf32>
    %cst_45 = arith.constant 1.000000e+00 : f32
    %135 = vector.broadcast %cst_45 : f32 to vector<16x32xf32>
    %136 = arith.addf %135, %134 : vector<16x32xf32>
    %137 = arith.divf %135, %136 : vector<16x32xf32>
    %138 = vector.extract_strided_slice %120 {offsets = [0, 64], sizes = [16, 32], strides = [1, 1]} : vector<16x96xf32> to vector<16x32xf32>
    %139 = vector.extract_strided_slice %121 {offsets = [0, 64], sizes = [16, 32], strides = [1, 1]} : vector<16x96xf32> to vector<16x32xf32>
    %140 = arith.addf %139, %9 : vector<16x32xf32>
    %141 = arith.mulf %129, %140 : vector<16x32xf32>
    %142 = arith.addf %138, %141 : vector<16x32xf32>
    %143 = math.tanh %142 : vector<16x32xf32>
    %cst_46 = arith.constant 1.000000e+00 : f32
    %144 = vector.broadcast %cst_46 : f32 to vector<16x32xf32>
    %145 = arith.subf %144, %137 : vector<16x32xf32>
    %146 = arith.mulf %145, %143 : vector<16x32xf32>
    %147 = arith.mulf %137, %80 : vector<16x32xf32>
    %148 = arith.addf %146, %147 : vector<16x32xf32>
    %c0_47 = arith.constant 0 : index
    %c16 = arith.constant 16 : index
    %c0_48 = arith.constant 0 : index
    %149 = vector.load %arg2[%c0_47, %c16, %c0_48] : memref<1x128x1xf32, #tpu.memory_space<vmem>>, vector<1x16x1xf32>
    %150 = vector.shape_cast %149 : vector<1x16x1xf32> to vector<16x1xf32>
    %cst_49 = arith.constant 0.000000e+00 : f32
    %151 = vector.broadcast %cst_49 : f32 to vector<16x1xf32>
    %152 = arith.cmpf ogt, %150, %151 : vector<16x1xf32>
    %cst_50 = arith.constant 0.000000e+00 : f32
    %153 = vector.shape_cast %152 : vector<16x1xi1> to vector<16x1xi1>
    %154 = vector.broadcast %153 : vector<16x1xi1> to vector<16x32xi1>
    %155 = vector.broadcast %cst_50 : f32 to vector<16x32xf32>
    %156 = arith.select %154, %148, %155 : vector<16x32xi1>, vector<16x32xf32>
    %cst_51 = arith.constant dense<0.000000e+00> : vector<16x96xf32>
    %157 = tpu.matmul %117, %0, %cst_51 {dimension_numbers = #tpu.dot_dimension_numbers<[1], [0], [0], [1], [0, 0, 1, 1], [], []>} : vector<16x32xf32>, vector<32x96xf32>, vector<16x96xf32> -> vector<16x96xf32>
    %158 = vector.extract_strided_slice %18 {offsets = [32, 0], sizes = [16, 96], strides = [1, 1]} : vector<128x96xf32> to vector<16x96xf32>
    %159 = vector.extract_strided_slice %158 {offsets = [0, 0], sizes = [16, 32], strides = [1, 1]} : vector<16x96xf32> to vector<16x32xf32>
    %160 = vector.extract_strided_slice %157 {offsets = [0, 0], sizes = [16, 32], strides = [1, 1]} : vector<16x96xf32> to vector<16x32xf32>
    %161 = arith.addf %159, %160 : vector<16x32xf32>
    %162 = arith.negf %161 : vector<16x32xf32>
    %163 = math.exp %162 : vector<16x32xf32>
    %cst_52 = arith.constant 1.000000e+00 : f32
    %164 = vector.broadcast %cst_52 : f32 to vector<16x32xf32>
    %165 = arith.addf %164, %163 : vector<16x32xf32>
    %166 = arith.divf %164, %165 : vector<16x32xf32>
    %167 = vector.extract_strided_slice %158 {offsets = [0, 32], sizes = [16, 32], strides = [1, 1]} : vector<16x96xf32> to vector<16x32xf32>
    %168 = vector.extract_strided_slice %157 {offsets = [0, 32], sizes = [16, 32], strides = [1, 1]} : vector<16x96xf32> to vector<16x32xf32>
    %169 = arith.addf %167, %168 : vector<16x32xf32>
    %170 = arith.negf %169 : vector<16x32xf32>
    %171 = math.exp %170 : vector<16x32xf32>
    %cst_53 = arith.constant 1.000000e+00 : f32
    %172 = vector.broadcast %cst_53 : f32 to vector<16x32xf32>
    %173 = arith.addf %172, %171 : vector<16x32xf32>
    %174 = arith.divf %172, %173 : vector<16x32xf32>
    %175 = vector.extract_strided_slice %158 {offsets = [0, 64], sizes = [16, 32], strides = [1, 1]} : vector<16x96xf32> to vector<16x32xf32>
    %176 = vector.extract_strided_slice %157 {offsets = [0, 64], sizes = [16, 32], strides = [1, 1]} : vector<16x96xf32> to vector<16x32xf32>
    %177 = arith.addf %176, %6 : vector<16x32xf32>
    %178 = arith.mulf %166, %177 : vector<16x32xf32>
    %179 = arith.addf %175, %178 : vector<16x32xf32>
    %180 = math.tanh %179 : vector<16x32xf32>
    %cst_54 = arith.constant 1.000000e+00 : f32
    %181 = vector.broadcast %cst_54 : f32 to vector<16x32xf32>
    %182 = arith.subf %181, %174 : vector<16x32xf32>
    %183 = arith.mulf %182, %180 : vector<16x32xf32>
    %184 = arith.mulf %174, %117 : vector<16x32xf32>
    %185 = arith.addf %183, %184 : vector<16x32xf32>
    %cst_55 = arith.constant dense<0.000000e+00> : vector<16x96xf32>
    %186 = tpu.matmul %185, %1, %cst_55 {dimension_numbers = #tpu.dot_dimension_numbers<[1], [0], [0], [1], [0, 0, 1, 1], [], []>} : vector<16x32xf32>, vector<32x96xf32>, vector<16x96xf32> -> vector<16x96xf32>
    %187 = vector.broadcast %3 : vector<1x96xf32> to vector<16x96xf32>
    %188 = arith.addf %186, %187 : vector<16x96xf32>
    %cst_56 = arith.constant dense<0.000000e+00> : vector<16x96xf32>
    %189 = tpu.matmul %148, %2, %cst_56 {dimension_numbers = #tpu.dot_dimension_numbers<[1], [0], [0], [1], [0, 0, 1, 1], [], []>} : vector<16x32xf32>, vector<32x96xf32>, vector<16x96xf32> -> vector<16x96xf32>
    %190 = vector.extract_strided_slice %188 {offsets = [0, 0], sizes = [16, 32], strides = [1, 1]} : vector<16x96xf32> to vector<16x32xf32>
    %191 = vector.extract_strided_slice %189 {offsets = [0, 0], sizes = [16, 32], strides = [1, 1]} : vector<16x96xf32> to vector<16x32xf32>
    %192 = arith.addf %190, %191 : vector<16x32xf32>
    %193 = arith.negf %192 : vector<16x32xf32>
    %194 = math.exp %193 : vector<16x32xf32>
    %cst_57 = arith.constant 1.000000e+00 : f32
    %195 = vector.broadcast %cst_57 : f32 to vector<16x32xf32>
    %196 = arith.addf %195, %194 : vector<16x32xf32>
    %197 = arith.divf %195, %196 : vector<16x32xf32>
    %198 = vector.extract_strided_slice %188 {offsets = [0, 32], sizes = [16, 32], strides = [1, 1]} : vector<16x96xf32> to vector<16x32xf32>
    %199 = vector.extract_strided_slice %189 {offsets = [0, 32], sizes = [16, 32], strides = [1, 1]} : vector<16x96xf32> to vector<16x32xf32>
    %200 = arith.addf %198, %199 : vector<16x32xf32>
    %201 = arith.negf %200 : vector<16x32xf32>
    %202 = math.exp %201 : vector<16x32xf32>
    %cst_58 = arith.constant 1.000000e+00 : f32
    %203 = vector.broadcast %cst_58 : f32 to vector<16x32xf32>
    %204 = arith.addf %203, %202 : vector<16x32xf32>
    %205 = arith.divf %203, %204 : vector<16x32xf32>
    %206 = vector.extract_strided_slice %188 {offsets = [0, 64], sizes = [16, 32], strides = [1, 1]} : vector<16x96xf32> to vector<16x32xf32>
    %207 = vector.extract_strided_slice %189 {offsets = [0, 64], sizes = [16, 32], strides = [1, 1]} : vector<16x96xf32> to vector<16x32xf32>
    %208 = arith.addf %207, %9 : vector<16x32xf32>
    %209 = arith.mulf %197, %208 : vector<16x32xf32>
    %210 = arith.addf %206, %209 : vector<16x32xf32>
    %211 = math.tanh %210 : vector<16x32xf32>
    %cst_59 = arith.constant 1.000000e+00 : f32
    %212 = vector.broadcast %cst_59 : f32 to vector<16x32xf32>
    %213 = arith.subf %212, %205 : vector<16x32xf32>
    %214 = arith.mulf %213, %211 : vector<16x32xf32>
    %215 = arith.mulf %205, %148 : vector<16x32xf32>
    %216 = arith.addf %214, %215 : vector<16x32xf32>
    %c0_60 = arith.constant 0 : index
    %c32 = arith.constant 32 : index
    %c0_61 = arith.constant 0 : index
    %217 = vector.load %arg2[%c0_60, %c32, %c0_61] : memref<1x128x1xf32, #tpu.memory_space<vmem>>, vector<1x16x1xf32>
    %218 = vector.shape_cast %217 : vector<1x16x1xf32> to vector<16x1xf32>
    %cst_62 = arith.constant 0.000000e+00 : f32
    %219 = vector.broadcast %cst_62 : f32 to vector<16x1xf32>
    %220 = arith.cmpf ogt, %218, %219 : vector<16x1xf32>
    %cst_63 = arith.constant 0.000000e+00 : f32
    %221 = vector.shape_cast %220 : vector<16x1xi1> to vector<16x1xi1>
    %222 = vector.broadcast %221 : vector<16x1xi1> to vector<16x32xi1>
    %223 = vector.broadcast %cst_63 : f32 to vector<16x32xf32>
    %224 = arith.select %222, %216, %223 : vector<16x32xi1>, vector<16x32xf32>
    %cst_64 = arith.constant dense<0.000000e+00> : vector<16x96xf32>
    %225 = tpu.matmul %185, %0, %cst_64 {dimension_numbers = #tpu.dot_dimension_numbers<[1], [0], [0], [1], [0, 0, 1, 1], [], []>} : vector<16x32xf32>, vector<32x96xf32>, vector<16x96xf32> -> vector<16x96xf32>
    %226 = vector.extract_strided_slice %18 {offsets = [48, 0], sizes = [16, 96], strides = [1, 1]} : vector<128x96xf32> to vector<16x96xf32>
    %227 = vector.extract_strided_slice %226 {offsets = [0, 0], sizes = [16, 32], strides = [1, 1]} : vector<16x96xf32> to vector<16x32xf32>
    %228 = vector.extract_strided_slice %225 {offsets = [0, 0], sizes = [16, 32], strides = [1, 1]} : vector<16x96xf32> to vector<16x32xf32>
    %229 = arith.addf %227, %228 : vector<16x32xf32>
    %230 = arith.negf %229 : vector<16x32xf32>
    %231 = math.exp %230 : vector<16x32xf32>
    %cst_65 = arith.constant 1.000000e+00 : f32
    %232 = vector.broadcast %cst_65 : f32 to vector<16x32xf32>
    %233 = arith.addf %232, %231 : vector<16x32xf32>
    %234 = arith.divf %232, %233 : vector<16x32xf32>
    %235 = vector.extract_strided_slice %226 {offsets = [0, 32], sizes = [16, 32], strides = [1, 1]} : vector<16x96xf32> to vector<16x32xf32>
    %236 = vector.extract_strided_slice %225 {offsets = [0, 32], sizes = [16, 32], strides = [1, 1]} : vector<16x96xf32> to vector<16x32xf32>
    %237 = arith.addf %235, %236 : vector<16x32xf32>
    %238 = arith.negf %237 : vector<16x32xf32>
    %239 = math.exp %238 : vector<16x32xf32>
    %cst_66 = arith.constant 1.000000e+00 : f32
    %240 = vector.broadcast %cst_66 : f32 to vector<16x32xf32>
    %241 = arith.addf %240, %239 : vector<16x32xf32>
    %242 = arith.divf %240, %241 : vector<16x32xf32>
    %243 = vector.extract_strided_slice %226 {offsets = [0, 64], sizes = [16, 32], strides = [1, 1]} : vector<16x96xf32> to vector<16x32xf32>
    %244 = vector.extract_strided_slice %225 {offsets = [0, 64], sizes = [16, 32], strides = [1, 1]} : vector<16x96xf32> to vector<16x32xf32>
    %245 = arith.addf %244, %6 : vector<16x32xf32>
    %246 = arith.mulf %234, %245 : vector<16x32xf32>
    %247 = arith.addf %243, %246 : vector<16x32xf32>
    %248 = math.tanh %247 : vector<16x32xf32>
    %cst_67 = arith.constant 1.000000e+00 : f32
    %249 = vector.broadcast %cst_67 : f32 to vector<16x32xf32>
    %250 = arith.subf %249, %242 : vector<16x32xf32>
    %251 = arith.mulf %250, %248 : vector<16x32xf32>
    %252 = arith.mulf %242, %185 : vector<16x32xf32>
    %253 = arith.addf %251, %252 : vector<16x32xf32>
    %cst_68 = arith.constant dense<0.000000e+00> : vector<16x96xf32>
    %254 = tpu.matmul %253, %1, %cst_68 {dimension_numbers = #tpu.dot_dimension_numbers<[1], [0], [0], [1], [0, 0, 1, 1], [], []>} : vector<16x32xf32>, vector<32x96xf32>, vector<16x96xf32> -> vector<16x96xf32>
    %255 = vector.broadcast %3 : vector<1x96xf32> to vector<16x96xf32>
    %256 = arith.addf %254, %255 : vector<16x96xf32>
    %cst_69 = arith.constant dense<0.000000e+00> : vector<16x96xf32>
    %257 = tpu.matmul %216, %2, %cst_69 {dimension_numbers = #tpu.dot_dimension_numbers<[1], [0], [0], [1], [0, 0, 1, 1], [], []>} : vector<16x32xf32>, vector<32x96xf32>, vector<16x96xf32> -> vector<16x96xf32>
    %258 = vector.extract_strided_slice %256 {offsets = [0, 0], sizes = [16, 32], strides = [1, 1]} : vector<16x96xf32> to vector<16x32xf32>
    %259 = vector.extract_strided_slice %257 {offsets = [0, 0], sizes = [16, 32], strides = [1, 1]} : vector<16x96xf32> to vector<16x32xf32>
    %260 = arith.addf %258, %259 : vector<16x32xf32>
    %261 = arith.negf %260 : vector<16x32xf32>
    %262 = math.exp %261 : vector<16x32xf32>
    %cst_70 = arith.constant 1.000000e+00 : f32
    %263 = vector.broadcast %cst_70 : f32 to vector<16x32xf32>
    %264 = arith.addf %263, %262 : vector<16x32xf32>
    %265 = arith.divf %263, %264 : vector<16x32xf32>
    %266 = vector.extract_strided_slice %256 {offsets = [0, 32], sizes = [16, 32], strides = [1, 1]} : vector<16x96xf32> to vector<16x32xf32>
    %267 = vector.extract_strided_slice %257 {offsets = [0, 32], sizes = [16, 32], strides = [1, 1]} : vector<16x96xf32> to vector<16x32xf32>
    %268 = arith.addf %266, %267 : vector<16x32xf32>
    %269 = arith.negf %268 : vector<16x32xf32>
    %270 = math.exp %269 : vector<16x32xf32>
    %cst_71 = arith.constant 1.000000e+00 : f32
    %271 = vector.broadcast %cst_71 : f32 to vector<16x32xf32>
    %272 = arith.addf %271, %270 : vector<16x32xf32>
    %273 = arith.divf %271, %272 : vector<16x32xf32>
    %274 = vector.extract_strided_slice %256 {offsets = [0, 64], sizes = [16, 32], strides = [1, 1]} : vector<16x96xf32> to vector<16x32xf32>
    %275 = vector.extract_strided_slice %257 {offsets = [0, 64], sizes = [16, 32], strides = [1, 1]} : vector<16x96xf32> to vector<16x32xf32>
    %276 = arith.addf %275, %9 : vector<16x32xf32>
    %277 = arith.mulf %265, %276 : vector<16x32xf32>
    %278 = arith.addf %274, %277 : vector<16x32xf32>
    %279 = math.tanh %278 : vector<16x32xf32>
    %cst_72 = arith.constant 1.000000e+00 : f32
    %280 = vector.broadcast %cst_72 : f32 to vector<16x32xf32>
    %281 = arith.subf %280, %273 : vector<16x32xf32>
    %282 = arith.mulf %281, %279 : vector<16x32xf32>
    %283 = arith.mulf %273, %216 : vector<16x32xf32>
    %284 = arith.addf %282, %283 : vector<16x32xf32>
    %c0_73 = arith.constant 0 : index
    %c48 = arith.constant 48 : index
    %c0_74 = arith.constant 0 : index
    %285 = vector.load %arg2[%c0_73, %c48, %c0_74] : memref<1x128x1xf32, #tpu.memory_space<vmem>>, vector<1x16x1xf32>
    %286 = vector.shape_cast %285 : vector<1x16x1xf32> to vector<16x1xf32>
    %cst_75 = arith.constant 0.000000e+00 : f32
    %287 = vector.broadcast %cst_75 : f32 to vector<16x1xf32>
    %288 = arith.cmpf ogt, %286, %287 : vector<16x1xf32>
    %cst_76 = arith.constant 0.000000e+00 : f32
    %289 = vector.shape_cast %288 : vector<16x1xi1> to vector<16x1xi1>
    %290 = vector.broadcast %289 : vector<16x1xi1> to vector<16x32xi1>
    %291 = vector.broadcast %cst_76 : f32 to vector<16x32xf32>
    %292 = arith.select %290, %284, %291 : vector<16x32xi1>, vector<16x32xf32>
    %cst_77 = arith.constant dense<0.000000e+00> : vector<16x96xf32>
    %293 = tpu.matmul %253, %0, %cst_77 {dimension_numbers = #tpu.dot_dimension_numbers<[1], [0], [0], [1], [0, 0, 1, 1], [], []>} : vector<16x32xf32>, vector<32x96xf32>, vector<16x96xf32> -> vector<16x96xf32>
    %294 = vector.extract_strided_slice %18 {offsets = [64, 0], sizes = [16, 96], strides = [1, 1]} : vector<128x96xf32> to vector<16x96xf32>
    %295 = vector.extract_strided_slice %294 {offsets = [0, 0], sizes = [16, 32], strides = [1, 1]} : vector<16x96xf32> to vector<16x32xf32>
    %296 = vector.extract_strided_slice %293 {offsets = [0, 0], sizes = [16, 32], strides = [1, 1]} : vector<16x96xf32> to vector<16x32xf32>
    %297 = arith.addf %295, %296 : vector<16x32xf32>
    %298 = arith.negf %297 : vector<16x32xf32>
    %299 = math.exp %298 : vector<16x32xf32>
    %cst_78 = arith.constant 1.000000e+00 : f32
    %300 = vector.broadcast %cst_78 : f32 to vector<16x32xf32>
    %301 = arith.addf %300, %299 : vector<16x32xf32>
    %302 = arith.divf %300, %301 : vector<16x32xf32>
    %303 = vector.extract_strided_slice %294 {offsets = [0, 32], sizes = [16, 32], strides = [1, 1]} : vector<16x96xf32> to vector<16x32xf32>
    %304 = vector.extract_strided_slice %293 {offsets = [0, 32], sizes = [16, 32], strides = [1, 1]} : vector<16x96xf32> to vector<16x32xf32>
    %305 = arith.addf %303, %304 : vector<16x32xf32>
    %306 = arith.negf %305 : vector<16x32xf32>
    %307 = math.exp %306 : vector<16x32xf32>
    %cst_79 = arith.constant 1.000000e+00 : f32
    %308 = vector.broadcast %cst_79 : f32 to vector<16x32xf32>
    %309 = arith.addf %308, %307 : vector<16x32xf32>
    %310 = arith.divf %308, %309 : vector<16x32xf32>
    %311 = vector.extract_strided_slice %294 {offsets = [0, 64], sizes = [16, 32], strides = [1, 1]} : vector<16x96xf32> to vector<16x32xf32>
    %312 = vector.extract_strided_slice %293 {offsets = [0, 64], sizes = [16, 32], strides = [1, 1]} : vector<16x96xf32> to vector<16x32xf32>
    %313 = arith.addf %312, %6 : vector<16x32xf32>
    %314 = arith.mulf %302, %313 : vector<16x32xf32>
    %315 = arith.addf %311, %314 : vector<16x32xf32>
    %316 = math.tanh %315 : vector<16x32xf32>
    %cst_80 = arith.constant 1.000000e+00 : f32
    %317 = vector.broadcast %cst_80 : f32 to vector<16x32xf32>
    %318 = arith.subf %317, %310 : vector<16x32xf32>
    %319 = arith.mulf %318, %316 : vector<16x32xf32>
    %320 = arith.mulf %310, %253 : vector<16x32xf32>
    %321 = arith.addf %319, %320 : vector<16x32xf32>
    %cst_81 = arith.constant dense<0.000000e+00> : vector<16x96xf32>
    %322 = tpu.matmul %321, %1, %cst_81 {dimension_numbers = #tpu.dot_dimension_numbers<[1], [0], [0], [1], [0, 0, 1, 1], [], []>} : vector<16x32xf32>, vector<32x96xf32>, vector<16x96xf32> -> vector<16x96xf32>
    %323 = vector.broadcast %3 : vector<1x96xf32> to vector<16x96xf32>
    %324 = arith.addf %322, %323 : vector<16x96xf32>
    %cst_82 = arith.constant dense<0.000000e+00> : vector<16x96xf32>
    %325 = tpu.matmul %284, %2, %cst_82 {dimension_numbers = #tpu.dot_dimension_numbers<[1], [0], [0], [1], [0, 0, 1, 1], [], []>} : vector<16x32xf32>, vector<32x96xf32>, vector<16x96xf32> -> vector<16x96xf32>
    %326 = vector.extract_strided_slice %324 {offsets = [0, 0], sizes = [16, 32], strides = [1, 1]} : vector<16x96xf32> to vector<16x32xf32>
    %327 = vector.extract_strided_slice %325 {offsets = [0, 0], sizes = [16, 32], strides = [1, 1]} : vector<16x96xf32> to vector<16x32xf32>
    %328 = arith.addf %326, %327 : vector<16x32xf32>
    %329 = arith.negf %328 : vector<16x32xf32>
    %330 = math.exp %329 : vector<16x32xf32>
    %cst_83 = arith.constant 1.000000e+00 : f32
    %331 = vector.broadcast %cst_83 : f32 to vector<16x32xf32>
    %332 = arith.addf %331, %330 : vector<16x32xf32>
    %333 = arith.divf %331, %332 : vector<16x32xf32>
    %334 = vector.extract_strided_slice %324 {offsets = [0, 32], sizes = [16, 32], strides = [1, 1]} : vector<16x96xf32> to vector<16x32xf32>
    %335 = vector.extract_strided_slice %325 {offsets = [0, 32], sizes = [16, 32], strides = [1, 1]} : vector<16x96xf32> to vector<16x32xf32>
    %336 = arith.addf %334, %335 : vector<16x32xf32>
    %337 = arith.negf %336 : vector<16x32xf32>
    %338 = math.exp %337 : vector<16x32xf32>
    %cst_84 = arith.constant 1.000000e+00 : f32
    %339 = vector.broadcast %cst_84 : f32 to vector<16x32xf32>
    %340 = arith.addf %339, %338 : vector<16x32xf32>
    %341 = arith.divf %339, %340 : vector<16x32xf32>
    %342 = vector.extract_strided_slice %324 {offsets = [0, 64], sizes = [16, 32], strides = [1, 1]} : vector<16x96xf32> to vector<16x32xf32>
    %343 = vector.extract_strided_slice %325 {offsets = [0, 64], sizes = [16, 32], strides = [1, 1]} : vector<16x96xf32> to vector<16x32xf32>
    %344 = arith.addf %343, %9 : vector<16x32xf32>
    %345 = arith.mulf %333, %344 : vector<16x32xf32>
    %346 = arith.addf %342, %345 : vector<16x32xf32>
    %347 = math.tanh %346 : vector<16x32xf32>
    %cst_85 = arith.constant 1.000000e+00 : f32
    %348 = vector.broadcast %cst_85 : f32 to vector<16x32xf32>
    %349 = arith.subf %348, %341 : vector<16x32xf32>
    %350 = arith.mulf %349, %347 : vector<16x32xf32>
    %351 = arith.mulf %341, %284 : vector<16x32xf32>
    %352 = arith.addf %350, %351 : vector<16x32xf32>
    %c0_86 = arith.constant 0 : index
    %c64 = arith.constant 64 : index
    %c0_87 = arith.constant 0 : index
    %353 = vector.load %arg2[%c0_86, %c64, %c0_87] : memref<1x128x1xf32, #tpu.memory_space<vmem>>, vector<1x16x1xf32>
    %354 = vector.shape_cast %353 : vector<1x16x1xf32> to vector<16x1xf32>
    %cst_88 = arith.constant 0.000000e+00 : f32
    %355 = vector.broadcast %cst_88 : f32 to vector<16x1xf32>
    %356 = arith.cmpf ogt, %354, %355 : vector<16x1xf32>
    %cst_89 = arith.constant 0.000000e+00 : f32
    %357 = vector.shape_cast %356 : vector<16x1xi1> to vector<16x1xi1>
    %358 = vector.broadcast %357 : vector<16x1xi1> to vector<16x32xi1>
    %359 = vector.broadcast %cst_89 : f32 to vector<16x32xf32>
    %360 = arith.select %358, %352, %359 : vector<16x32xi1>, vector<16x32xf32>
    %cst_90 = arith.constant dense<0.000000e+00> : vector<16x96xf32>
    %361 = tpu.matmul %321, %0, %cst_90 {dimension_numbers = #tpu.dot_dimension_numbers<[1], [0], [0], [1], [0, 0, 1, 1], [], []>} : vector<16x32xf32>, vector<32x96xf32>, vector<16x96xf32> -> vector<16x96xf32>
    %362 = vector.extract_strided_slice %18 {offsets = [80, 0], sizes = [16, 96], strides = [1, 1]} : vector<128x96xf32> to vector<16x96xf32>
    %363 = vector.extract_strided_slice %362 {offsets = [0, 0], sizes = [16, 32], strides = [1, 1]} : vector<16x96xf32> to vector<16x32xf32>
    %364 = vector.extract_strided_slice %361 {offsets = [0, 0], sizes = [16, 32], strides = [1, 1]} : vector<16x96xf32> to vector<16x32xf32>
    %365 = arith.addf %363, %364 : vector<16x32xf32>
    %366 = arith.negf %365 : vector<16x32xf32>
    %367 = math.exp %366 : vector<16x32xf32>
    %cst_91 = arith.constant 1.000000e+00 : f32
    %368 = vector.broadcast %cst_91 : f32 to vector<16x32xf32>
    %369 = arith.addf %368, %367 : vector<16x32xf32>
    %370 = arith.divf %368, %369 : vector<16x32xf32>
    %371 = vector.extract_strided_slice %362 {offsets = [0, 32], sizes = [16, 32], strides = [1, 1]} : vector<16x96xf32> to vector<16x32xf32>
    %372 = vector.extract_strided_slice %361 {offsets = [0, 32], sizes = [16, 32], strides = [1, 1]} : vector<16x96xf32> to vector<16x32xf32>
    %373 = arith.addf %371, %372 : vector<16x32xf32>
    %374 = arith.negf %373 : vector<16x32xf32>
    %375 = math.exp %374 : vector<16x32xf32>
    %cst_92 = arith.constant 1.000000e+00 : f32
    %376 = vector.broadcast %cst_92 : f32 to vector<16x32xf32>
    %377 = arith.addf %376, %375 : vector<16x32xf32>
    %378 = arith.divf %376, %377 : vector<16x32xf32>
    %379 = vector.extract_strided_slice %362 {offsets = [0, 64], sizes = [16, 32], strides = [1, 1]} : vector<16x96xf32> to vector<16x32xf32>
    %380 = vector.extract_strided_slice %361 {offsets = [0, 64], sizes = [16, 32], strides = [1, 1]} : vector<16x96xf32> to vector<16x32xf32>
    %381 = arith.addf %380, %6 : vector<16x32xf32>
    %382 = arith.mulf %370, %381 : vector<16x32xf32>
    %383 = arith.addf %379, %382 : vector<16x32xf32>
    %384 = math.tanh %383 : vector<16x32xf32>
    %cst_93 = arith.constant 1.000000e+00 : f32
    %385 = vector.broadcast %cst_93 : f32 to vector<16x32xf32>
    %386 = arith.subf %385, %378 : vector<16x32xf32>
    %387 = arith.mulf %386, %384 : vector<16x32xf32>
    %388 = arith.mulf %378, %321 : vector<16x32xf32>
    %389 = arith.addf %387, %388 : vector<16x32xf32>
    %cst_94 = arith.constant dense<0.000000e+00> : vector<16x96xf32>
    %390 = tpu.matmul %389, %1, %cst_94 {dimension_numbers = #tpu.dot_dimension_numbers<[1], [0], [0], [1], [0, 0, 1, 1], [], []>} : vector<16x32xf32>, vector<32x96xf32>, vector<16x96xf32> -> vector<16x96xf32>
    %391 = vector.broadcast %3 : vector<1x96xf32> to vector<16x96xf32>
    %392 = arith.addf %390, %391 : vector<16x96xf32>
    %cst_95 = arith.constant dense<0.000000e+00> : vector<16x96xf32>
    %393 = tpu.matmul %352, %2, %cst_95 {dimension_numbers = #tpu.dot_dimension_numbers<[1], [0], [0], [1], [0, 0, 1, 1], [], []>} : vector<16x32xf32>, vector<32x96xf32>, vector<16x96xf32> -> vector<16x96xf32>
    %394 = vector.extract_strided_slice %392 {offsets = [0, 0], sizes = [16, 32], strides = [1, 1]} : vector<16x96xf32> to vector<16x32xf32>
    %395 = vector.extract_strided_slice %393 {offsets = [0, 0], sizes = [16, 32], strides = [1, 1]} : vector<16x96xf32> to vector<16x32xf32>
    %396 = arith.addf %394, %395 : vector<16x32xf32>
    %397 = arith.negf %396 : vector<16x32xf32>
    %398 = math.exp %397 : vector<16x32xf32>
    %cst_96 = arith.constant 1.000000e+00 : f32
    %399 = vector.broadcast %cst_96 : f32 to vector<16x32xf32>
    %400 = arith.addf %399, %398 : vector<16x32xf32>
    %401 = arith.divf %399, %400 : vector<16x32xf32>
    %402 = vector.extract_strided_slice %392 {offsets = [0, 32], sizes = [16, 32], strides = [1, 1]} : vector<16x96xf32> to vector<16x32xf32>
    %403 = vector.extract_strided_slice %393 {offsets = [0, 32], sizes = [16, 32], strides = [1, 1]} : vector<16x96xf32> to vector<16x32xf32>
    %404 = arith.addf %402, %403 : vector<16x32xf32>
    %405 = arith.negf %404 : vector<16x32xf32>
    %406 = math.exp %405 : vector<16x32xf32>
    %cst_97 = arith.constant 1.000000e+00 : f32
    %407 = vector.broadcast %cst_97 : f32 to vector<16x32xf32>
    %408 = arith.addf %407, %406 : vector<16x32xf32>
    %409 = arith.divf %407, %408 : vector<16x32xf32>
    %410 = vector.extract_strided_slice %392 {offsets = [0, 64], sizes = [16, 32], strides = [1, 1]} : vector<16x96xf32> to vector<16x32xf32>
    %411 = vector.extract_strided_slice %393 {offsets = [0, 64], sizes = [16, 32], strides = [1, 1]} : vector<16x96xf32> to vector<16x32xf32>
    %412 = arith.addf %411, %9 : vector<16x32xf32>
    %413 = arith.mulf %401, %412 : vector<16x32xf32>
    %414 = arith.addf %410, %413 : vector<16x32xf32>
    %415 = math.tanh %414 : vector<16x32xf32>
    %cst_98 = arith.constant 1.000000e+00 : f32
    %416 = vector.broadcast %cst_98 : f32 to vector<16x32xf32>
    %417 = arith.subf %416, %409 : vector<16x32xf32>
    %418 = arith.mulf %417, %415 : vector<16x32xf32>
    %419 = arith.mulf %409, %352 : vector<16x32xf32>
    %420 = arith.addf %418, %419 : vector<16x32xf32>
    %c0_99 = arith.constant 0 : index
    %c80 = arith.constant 80 : index
    %c0_100 = arith.constant 0 : index
    %421 = vector.load %arg2[%c0_99, %c80, %c0_100] : memref<1x128x1xf32, #tpu.memory_space<vmem>>, vector<1x16x1xf32>
    %422 = vector.shape_cast %421 : vector<1x16x1xf32> to vector<16x1xf32>
    %cst_101 = arith.constant 0.000000e+00 : f32
    %423 = vector.broadcast %cst_101 : f32 to vector<16x1xf32>
    %424 = arith.cmpf ogt, %422, %423 : vector<16x1xf32>
    %cst_102 = arith.constant 0.000000e+00 : f32
    %425 = vector.shape_cast %424 : vector<16x1xi1> to vector<16x1xi1>
    %426 = vector.broadcast %425 : vector<16x1xi1> to vector<16x32xi1>
    %427 = vector.broadcast %cst_102 : f32 to vector<16x32xf32>
    %428 = arith.select %426, %420, %427 : vector<16x32xi1>, vector<16x32xf32>
    %cst_103 = arith.constant dense<0.000000e+00> : vector<16x96xf32>
    %429 = tpu.matmul %389, %0, %cst_103 {dimension_numbers = #tpu.dot_dimension_numbers<[1], [0], [0], [1], [0, 0, 1, 1], [], []>} : vector<16x32xf32>, vector<32x96xf32>, vector<16x96xf32> -> vector<16x96xf32>
    %430 = vector.extract_strided_slice %18 {offsets = [96, 0], sizes = [16, 96], strides = [1, 1]} : vector<128x96xf32> to vector<16x96xf32>
    %431 = vector.extract_strided_slice %430 {offsets = [0, 0], sizes = [16, 32], strides = [1, 1]} : vector<16x96xf32> to vector<16x32xf32>
    %432 = vector.extract_strided_slice %429 {offsets = [0, 0], sizes = [16, 32], strides = [1, 1]} : vector<16x96xf32> to vector<16x32xf32>
    %433 = arith.addf %431, %432 : vector<16x32xf32>
    %434 = arith.negf %433 : vector<16x32xf32>
    %435 = math.exp %434 : vector<16x32xf32>
    %cst_104 = arith.constant 1.000000e+00 : f32
    %436 = vector.broadcast %cst_104 : f32 to vector<16x32xf32>
    %437 = arith.addf %436, %435 : vector<16x32xf32>
    %438 = arith.divf %436, %437 : vector<16x32xf32>
    %439 = vector.extract_strided_slice %430 {offsets = [0, 32], sizes = [16, 32], strides = [1, 1]} : vector<16x96xf32> to vector<16x32xf32>
    %440 = vector.extract_strided_slice %429 {offsets = [0, 32], sizes = [16, 32], strides = [1, 1]} : vector<16x96xf32> to vector<16x32xf32>
    %441 = arith.addf %439, %440 : vector<16x32xf32>
    %442 = arith.negf %441 : vector<16x32xf32>
    %443 = math.exp %442 : vector<16x32xf32>
    %cst_105 = arith.constant 1.000000e+00 : f32
    %444 = vector.broadcast %cst_105 : f32 to vector<16x32xf32>
    %445 = arith.addf %444, %443 : vector<16x32xf32>
    %446 = arith.divf %444, %445 : vector<16x32xf32>
    %447 = vector.extract_strided_slice %430 {offsets = [0, 64], sizes = [16, 32], strides = [1, 1]} : vector<16x96xf32> to vector<16x32xf32>
    %448 = vector.extract_strided_slice %429 {offsets = [0, 64], sizes = [16, 32], strides = [1, 1]} : vector<16x96xf32> to vector<16x32xf32>
    %449 = arith.addf %448, %6 : vector<16x32xf32>
    %450 = arith.mulf %438, %449 : vector<16x32xf32>
    %451 = arith.addf %447, %450 : vector<16x32xf32>
    %452 = math.tanh %451 : vector<16x32xf32>
    %cst_106 = arith.constant 1.000000e+00 : f32
    %453 = vector.broadcast %cst_106 : f32 to vector<16x32xf32>
    %454 = arith.subf %453, %446 : vector<16x32xf32>
    %455 = arith.mulf %454, %452 : vector<16x32xf32>
    %456 = arith.mulf %446, %389 : vector<16x32xf32>
    %457 = arith.addf %455, %456 : vector<16x32xf32>
    %cst_107 = arith.constant dense<0.000000e+00> : vector<16x96xf32>
    %458 = tpu.matmul %457, %1, %cst_107 {dimension_numbers = #tpu.dot_dimension_numbers<[1], [0], [0], [1], [0, 0, 1, 1], [], []>} : vector<16x32xf32>, vector<32x96xf32>, vector<16x96xf32> -> vector<16x96xf32>
    %459 = vector.broadcast %3 : vector<1x96xf32> to vector<16x96xf32>
    %460 = arith.addf %458, %459 : vector<16x96xf32>
    %cst_108 = arith.constant dense<0.000000e+00> : vector<16x96xf32>
    %461 = tpu.matmul %420, %2, %cst_108 {dimension_numbers = #tpu.dot_dimension_numbers<[1], [0], [0], [1], [0, 0, 1, 1], [], []>} : vector<16x32xf32>, vector<32x96xf32>, vector<16x96xf32> -> vector<16x96xf32>
    %462 = vector.extract_strided_slice %460 {offsets = [0, 0], sizes = [16, 32], strides = [1, 1]} : vector<16x96xf32> to vector<16x32xf32>
    %463 = vector.extract_strided_slice %461 {offsets = [0, 0], sizes = [16, 32], strides = [1, 1]} : vector<16x96xf32> to vector<16x32xf32>
    %464 = arith.addf %462, %463 : vector<16x32xf32>
    %465 = arith.negf %464 : vector<16x32xf32>
    %466 = math.exp %465 : vector<16x32xf32>
    %cst_109 = arith.constant 1.000000e+00 : f32
    %467 = vector.broadcast %cst_109 : f32 to vector<16x32xf32>
    %468 = arith.addf %467, %466 : vector<16x32xf32>
    %469 = arith.divf %467, %468 : vector<16x32xf32>
    %470 = vector.extract_strided_slice %460 {offsets = [0, 32], sizes = [16, 32], strides = [1, 1]} : vector<16x96xf32> to vector<16x32xf32>
    %471 = vector.extract_strided_slice %461 {offsets = [0, 32], sizes = [16, 32], strides = [1, 1]} : vector<16x96xf32> to vector<16x32xf32>
    %472 = arith.addf %470, %471 : vector<16x32xf32>
    %473 = arith.negf %472 : vector<16x32xf32>
    %474 = math.exp %473 : vector<16x32xf32>
    %cst_110 = arith.constant 1.000000e+00 : f32
    %475 = vector.broadcast %cst_110 : f32 to vector<16x32xf32>
    %476 = arith.addf %475, %474 : vector<16x32xf32>
    %477 = arith.divf %475, %476 : vector<16x32xf32>
    %478 = vector.extract_strided_slice %460 {offsets = [0, 64], sizes = [16, 32], strides = [1, 1]} : vector<16x96xf32> to vector<16x32xf32>
    %479 = vector.extract_strided_slice %461 {offsets = [0, 64], sizes = [16, 32], strides = [1, 1]} : vector<16x96xf32> to vector<16x32xf32>
    %480 = arith.addf %479, %9 : vector<16x32xf32>
    %481 = arith.mulf %469, %480 : vector<16x32xf32>
    %482 = arith.addf %478, %481 : vector<16x32xf32>
    %483 = math.tanh %482 : vector<16x32xf32>
    %cst_111 = arith.constant 1.000000e+00 : f32
    %484 = vector.broadcast %cst_111 : f32 to vector<16x32xf32>
    %485 = arith.subf %484, %477 : vector<16x32xf32>
    %486 = arith.mulf %485, %483 : vector<16x32xf32>
    %487 = arith.mulf %477, %420 : vector<16x32xf32>
    %488 = arith.addf %486, %487 : vector<16x32xf32>
    %c0_112 = arith.constant 0 : index
    %c96 = arith.constant 96 : index
    %c0_113 = arith.constant 0 : index
    %489 = vector.load %arg2[%c0_112, %c96, %c0_113] : memref<1x128x1xf32, #tpu.memory_space<vmem>>, vector<1x16x1xf32>
    %490 = vector.shape_cast %489 : vector<1x16x1xf32> to vector<16x1xf32>
    %cst_114 = arith.constant 0.000000e+00 : f32
    %491 = vector.broadcast %cst_114 : f32 to vector<16x1xf32>
    %492 = arith.cmpf ogt, %490, %491 : vector<16x1xf32>
    %cst_115 = arith.constant 0.000000e+00 : f32
    %493 = vector.shape_cast %492 : vector<16x1xi1> to vector<16x1xi1>
    %494 = vector.broadcast %493 : vector<16x1xi1> to vector<16x32xi1>
    %495 = vector.broadcast %cst_115 : f32 to vector<16x32xf32>
    %496 = arith.select %494, %488, %495 : vector<16x32xi1>, vector<16x32xf32>
    %cst_116 = arith.constant dense<0.000000e+00> : vector<16x96xf32>
    %497 = tpu.matmul %457, %0, %cst_116 {dimension_numbers = #tpu.dot_dimension_numbers<[1], [0], [0], [1], [0, 0, 1, 1], [], []>} : vector<16x32xf32>, vector<32x96xf32>, vector<16x96xf32> -> vector<16x96xf32>
    %498 = vector.extract_strided_slice %18 {offsets = [112, 0], sizes = [16, 96], strides = [1, 1]} : vector<128x96xf32> to vector<16x96xf32>
    %499 = vector.extract_strided_slice %498 {offsets = [0, 0], sizes = [16, 32], strides = [1, 1]} : vector<16x96xf32> to vector<16x32xf32>
    %500 = vector.extract_strided_slice %497 {offsets = [0, 0], sizes = [16, 32], strides = [1, 1]} : vector<16x96xf32> to vector<16x32xf32>
    %501 = arith.addf %499, %500 : vector<16x32xf32>
    %502 = arith.negf %501 : vector<16x32xf32>
    %503 = math.exp %502 : vector<16x32xf32>
    %cst_117 = arith.constant 1.000000e+00 : f32
    %504 = vector.broadcast %cst_117 : f32 to vector<16x32xf32>
    %505 = arith.addf %504, %503 : vector<16x32xf32>
    %506 = arith.divf %504, %505 : vector<16x32xf32>
    %507 = vector.extract_strided_slice %498 {offsets = [0, 32], sizes = [16, 32], strides = [1, 1]} : vector<16x96xf32> to vector<16x32xf32>
    %508 = vector.extract_strided_slice %497 {offsets = [0, 32], sizes = [16, 32], strides = [1, 1]} : vector<16x96xf32> to vector<16x32xf32>
    %509 = arith.addf %507, %508 : vector<16x32xf32>
    %510 = arith.negf %509 : vector<16x32xf32>
    %511 = math.exp %510 : vector<16x32xf32>
    %cst_118 = arith.constant 1.000000e+00 : f32
    %512 = vector.broadcast %cst_118 : f32 to vector<16x32xf32>
    %513 = arith.addf %512, %511 : vector<16x32xf32>
    %514 = arith.divf %512, %513 : vector<16x32xf32>
    %515 = vector.extract_strided_slice %498 {offsets = [0, 64], sizes = [16, 32], strides = [1, 1]} : vector<16x96xf32> to vector<16x32xf32>
    %516 = vector.extract_strided_slice %497 {offsets = [0, 64], sizes = [16, 32], strides = [1, 1]} : vector<16x96xf32> to vector<16x32xf32>
    %517 = arith.addf %516, %6 : vector<16x32xf32>
    %518 = arith.mulf %506, %517 : vector<16x32xf32>
    %519 = arith.addf %515, %518 : vector<16x32xf32>
    %520 = math.tanh %519 : vector<16x32xf32>
    %cst_119 = arith.constant 1.000000e+00 : f32
    %521 = vector.broadcast %cst_119 : f32 to vector<16x32xf32>
    %522 = arith.subf %521, %514 : vector<16x32xf32>
    %523 = arith.mulf %522, %520 : vector<16x32xf32>
    %524 = arith.mulf %514, %457 : vector<16x32xf32>
    %525 = arith.addf %523, %524 : vector<16x32xf32>
    %cst_120 = arith.constant dense<0.000000e+00> : vector<16x96xf32>
    %526 = tpu.matmul %525, %1, %cst_120 {dimension_numbers = #tpu.dot_dimension_numbers<[1], [0], [0], [1], [0, 0, 1, 1], [], []>} : vector<16x32xf32>, vector<32x96xf32>, vector<16x96xf32> -> vector<16x96xf32>
    %527 = vector.broadcast %3 : vector<1x96xf32> to vector<16x96xf32>
    %528 = arith.addf %526, %527 : vector<16x96xf32>
    %cst_121 = arith.constant dense<0.000000e+00> : vector<16x96xf32>
    %529 = tpu.matmul %488, %2, %cst_121 {dimension_numbers = #tpu.dot_dimension_numbers<[1], [0], [0], [1], [0, 0, 1, 1], [], []>} : vector<16x32xf32>, vector<32x96xf32>, vector<16x96xf32> -> vector<16x96xf32>
    %530 = vector.extract_strided_slice %528 {offsets = [0, 0], sizes = [16, 32], strides = [1, 1]} : vector<16x96xf32> to vector<16x32xf32>
    %531 = vector.extract_strided_slice %529 {offsets = [0, 0], sizes = [16, 32], strides = [1, 1]} : vector<16x96xf32> to vector<16x32xf32>
    %532 = arith.addf %530, %531 : vector<16x32xf32>
    %533 = arith.negf %532 : vector<16x32xf32>
    %534 = math.exp %533 : vector<16x32xf32>
    %cst_122 = arith.constant 1.000000e+00 : f32
    %535 = vector.broadcast %cst_122 : f32 to vector<16x32xf32>
    %536 = arith.addf %535, %534 : vector<16x32xf32>
    %537 = arith.divf %535, %536 : vector<16x32xf32>
    %538 = vector.extract_strided_slice %528 {offsets = [0, 32], sizes = [16, 32], strides = [1, 1]} : vector<16x96xf32> to vector<16x32xf32>
    %539 = vector.extract_strided_slice %529 {offsets = [0, 32], sizes = [16, 32], strides = [1, 1]} : vector<16x96xf32> to vector<16x32xf32>
    %540 = arith.addf %538, %539 : vector<16x32xf32>
    %541 = arith.negf %540 : vector<16x32xf32>
    %542 = math.exp %541 : vector<16x32xf32>
    %cst_123 = arith.constant 1.000000e+00 : f32
    %543 = vector.broadcast %cst_123 : f32 to vector<16x32xf32>
    %544 = arith.addf %543, %542 : vector<16x32xf32>
    %545 = arith.divf %543, %544 : vector<16x32xf32>
    %546 = vector.extract_strided_slice %528 {offsets = [0, 64], sizes = [16, 32], strides = [1, 1]} : vector<16x96xf32> to vector<16x32xf32>
    %547 = vector.extract_strided_slice %529 {offsets = [0, 64], sizes = [16, 32], strides = [1, 1]} : vector<16x96xf32> to vector<16x32xf32>
    %548 = arith.addf %547, %9 : vector<16x32xf32>
    %549 = arith.mulf %537, %548 : vector<16x32xf32>
    %550 = arith.addf %546, %549 : vector<16x32xf32>
    %551 = math.tanh %550 : vector<16x32xf32>
    %cst_124 = arith.constant 1.000000e+00 : f32
    %552 = vector.broadcast %cst_124 : f32 to vector<16x32xf32>
    %553 = arith.subf %552, %545 : vector<16x32xf32>
    %554 = arith.mulf %553, %551 : vector<16x32xf32>
    %555 = arith.mulf %545, %488 : vector<16x32xf32>
    %556 = arith.addf %554, %555 : vector<16x32xf32>
    %c0_125 = arith.constant 0 : index
    %c112 = arith.constant 112 : index
    %c0_126 = arith.constant 0 : index
    %557 = vector.load %arg2[%c0_125, %c112, %c0_126] : memref<1x128x1xf32, #tpu.memory_space<vmem>>, vector<1x16x1xf32>
    %558 = vector.shape_cast %557 : vector<1x16x1xf32> to vector<16x1xf32>
    %cst_127 = arith.constant 0.000000e+00 : f32
    %559 = vector.broadcast %cst_127 : f32 to vector<16x1xf32>
    %560 = arith.cmpf ogt, %558, %559 : vector<16x1xf32>
    %cst_128 = arith.constant 0.000000e+00 : f32
    %561 = vector.shape_cast %560 : vector<16x1xi1> to vector<16x1xi1>
    %562 = vector.broadcast %561 : vector<16x1xi1> to vector<16x32xi1>
    %563 = vector.broadcast %cst_128 : f32 to vector<16x32xf32>
    %564 = arith.select %562, %556, %563 : vector<16x32xi1>, vector<16x32xf32>
    %565 = vector.broadcast %10 : vector<1x32xf32> to vector<16x32xf32>
    %566 = arith.mulf %88, %565 : vector<16x32xf32>
    %cst_129 = arith.constant dense<0.000000e+00> : vector<16xf32>
    %567 = vector.multi_reduction <add>, %566, %cst_129 [1] : vector<16x32xf32> to vector<16xf32>
    %568 = vector.shape_cast %567 : vector<16xf32> to vector<16x1xf32>
    %569 = vector.broadcast %11 : vector<1x1xf32> to vector<16x1xf32>
    %570 = arith.addf %568, %569 : vector<16x1xf32>
    %571 = vector.broadcast %10 : vector<1x32xf32> to vector<16x32xf32>
    %572 = arith.mulf %156, %571 : vector<16x32xf32>
    %cst_130 = arith.constant dense<0.000000e+00> : vector<16xf32>
    %573 = vector.multi_reduction <add>, %572, %cst_130 [1] : vector<16x32xf32> to vector<16xf32>
    %574 = vector.shape_cast %573 : vector<16xf32> to vector<16x1xf32>
    %575 = vector.broadcast %11 : vector<1x1xf32> to vector<16x1xf32>
    %576 = arith.addf %574, %575 : vector<16x1xf32>
    %577 = vector.broadcast %10 : vector<1x32xf32> to vector<16x32xf32>
    %578 = arith.mulf %224, %577 : vector<16x32xf32>
    %cst_131 = arith.constant dense<0.000000e+00> : vector<16xf32>
    %579 = vector.multi_reduction <add>, %578, %cst_131 [1] : vector<16x32xf32> to vector<16xf32>
    %580 = vector.shape_cast %579 : vector<16xf32> to vector<16x1xf32>
    %581 = vector.broadcast %11 : vector<1x1xf32> to vector<16x1xf32>
    %582 = arith.addf %580, %581 : vector<16x1xf32>
    %583 = vector.broadcast %10 : vector<1x32xf32> to vector<16x32xf32>
    %584 = arith.mulf %292, %583 : vector<16x32xf32>
    %cst_132 = arith.constant dense<0.000000e+00> : vector<16xf32>
    %585 = vector.multi_reduction <add>, %584, %cst_132 [1] : vector<16x32xf32> to vector<16xf32>
    %586 = vector.shape_cast %585 : vector<16xf32> to vector<16x1xf32>
    %587 = vector.broadcast %11 : vector<1x1xf32> to vector<16x1xf32>
    %588 = arith.addf %586, %587 : vector<16x1xf32>
    %589 = vector.broadcast %10 : vector<1x32xf32> to vector<16x32xf32>
    %590 = arith.mulf %360, %589 : vector<16x32xf32>
    %cst_133 = arith.constant dense<0.000000e+00> : vector<16xf32>
    %591 = vector.multi_reduction <add>, %590, %cst_133 [1] : vector<16x32xf32> to vector<16xf32>
    %592 = vector.shape_cast %591 : vector<16xf32> to vector<16x1xf32>
    %593 = vector.broadcast %11 : vector<1x1xf32> to vector<16x1xf32>
    %594 = arith.addf %592, %593 : vector<16x1xf32>
    %595 = vector.broadcast %10 : vector<1x32xf32> to vector<16x32xf32>
    %596 = arith.mulf %428, %595 : vector<16x32xf32>
    %cst_134 = arith.constant dense<0.000000e+00> : vector<16xf32>
    %597 = vector.multi_reduction <add>, %596, %cst_134 [1] : vector<16x32xf32> to vector<16xf32>
    %598 = vector.shape_cast %597 : vector<16xf32> to vector<16x1xf32>
    %599 = vector.broadcast %11 : vector<1x1xf32> to vector<16x1xf32>
    %600 = arith.addf %598, %599 : vector<16x1xf32>
    %601 = vector.broadcast %10 : vector<1x32xf32> to vector<16x32xf32>
    %602 = arith.mulf %496, %601 : vector<16x32xf32>
    %cst_135 = arith.constant dense<0.000000e+00> : vector<16xf32>
    %603 = vector.multi_reduction <add>, %602, %cst_135 [1] : vector<16x32xf32> to vector<16xf32>
    %604 = vector.shape_cast %603 : vector<16xf32> to vector<16x1xf32>
    %605 = vector.broadcast %11 : vector<1x1xf32> to vector<16x1xf32>
    %606 = arith.addf %604, %605 : vector<16x1xf32>
    %607 = vector.broadcast %10 : vector<1x32xf32> to vector<16x32xf32>
    %608 = arith.mulf %564, %607 : vector<16x32xf32>
    %cst_136 = arith.constant dense<0.000000e+00> : vector<16xf32>
    %609 = vector.multi_reduction <add>, %608, %cst_136 [1] : vector<16x32xf32> to vector<16xf32>
    %610 = vector.shape_cast %609 : vector<16xf32> to vector<16x1xf32>
    %611 = vector.broadcast %11 : vector<1x1xf32> to vector<16x1xf32>
    %612 = arith.addf %610, %611 : vector<16x1xf32>
    %613 = arith.maximumf %570, %576 : vector<16x1xf32>
    %614 = arith.maximumf %613, %582 : vector<16x1xf32>
    %615 = arith.maximumf %614, %588 : vector<16x1xf32>
    %616 = arith.maximumf %615, %594 : vector<16x1xf32>
    %617 = arith.maximumf %616, %600 : vector<16x1xf32>
    %618 = arith.maximumf %617, %606 : vector<16x1xf32>
    %619 = arith.maximumf %618, %612 : vector<16x1xf32>
    %620 = arith.subf %570, %619 : vector<16x1xf32>
    %621 = math.exp %620 : vector<16x1xf32>
    %622 = arith.subf %576, %619 : vector<16x1xf32>
    %623 = math.exp %622 : vector<16x1xf32>
    %624 = arith.subf %582, %619 : vector<16x1xf32>
    %625 = math.exp %624 : vector<16x1xf32>
    %626 = arith.subf %588, %619 : vector<16x1xf32>
    %627 = math.exp %626 : vector<16x1xf32>
    %628 = arith.subf %594, %619 : vector<16x1xf32>
    %629 = math.exp %628 : vector<16x1xf32>
    %630 = arith.subf %600, %619 : vector<16x1xf32>
    %631 = math.exp %630 : vector<16x1xf32>
    %632 = arith.subf %606, %619 : vector<16x1xf32>
    %633 = math.exp %632 : vector<16x1xf32>
    %634 = arith.subf %612, %619 : vector<16x1xf32>
    %635 = math.exp %634 : vector<16x1xf32>
    %636 = vector.broadcast %621 : vector<16x1xf32> to vector<16x32xf32>
    %637 = arith.mulf %88, %636 : vector<16x32xf32>
    %638 = arith.addf %621, %623 : vector<16x1xf32>
    %639 = vector.broadcast %623 : vector<16x1xf32> to vector<16x32xf32>
    %640 = arith.mulf %156, %639 : vector<16x32xf32>
    %641 = arith.addf %637, %640 : vector<16x32xf32>
    %642 = arith.addf %638, %625 : vector<16x1xf32>
    %643 = vector.broadcast %625 : vector<16x1xf32> to vector<16x32xf32>
    %644 = arith.mulf %224, %643 : vector<16x32xf32>
    %645 = arith.addf %641, %644 : vector<16x32xf32>
    %646 = arith.addf %642, %627 : vector<16x1xf32>
    %647 = vector.broadcast %627 : vector<16x1xf32> to vector<16x32xf32>
    %648 = arith.mulf %292, %647 : vector<16x32xf32>
    %649 = arith.addf %645, %648 : vector<16x32xf32>
    %650 = arith.addf %646, %629 : vector<16x1xf32>
    %651 = vector.broadcast %629 : vector<16x1xf32> to vector<16x32xf32>
    %652 = arith.mulf %360, %651 : vector<16x32xf32>
    %653 = arith.addf %649, %652 : vector<16x32xf32>
    %654 = arith.addf %650, %631 : vector<16x1xf32>
    %655 = vector.broadcast %631 : vector<16x1xf32> to vector<16x32xf32>
    %656 = arith.mulf %428, %655 : vector<16x32xf32>
    %657 = arith.addf %653, %656 : vector<16x32xf32>
    %658 = arith.addf %654, %633 : vector<16x1xf32>
    %659 = vector.broadcast %633 : vector<16x1xf32> to vector<16x32xf32>
    %660 = arith.mulf %496, %659 : vector<16x32xf32>
    %661 = arith.addf %657, %660 : vector<16x32xf32>
    %662 = arith.addf %658, %635 : vector<16x1xf32>
    %663 = vector.broadcast %635 : vector<16x1xf32> to vector<16x32xf32>
    %664 = arith.mulf %564, %663 : vector<16x32xf32>
    %665 = arith.addf %661, %664 : vector<16x32xf32>
    %cst_137 = arith.constant 1.000000e+00 : f32
    %666 = vector.broadcast %cst_137 : f32 to vector<16x1xf32>
    %667 = arith.divf %666, %662 : vector<16x1xf32>
    %668 = vector.broadcast %667 : vector<16x1xf32> to vector<16x32xf32>
    %669 = arith.mulf %665, %668 : vector<16x32xf32>
    %670 = arith.addf %88, %669 : vector<16x32xf32>
    %671 = arith.addf %156, %669 : vector<16x32xf32>
    %672 = arith.addf %224, %669 : vector<16x32xf32>
    %673 = arith.addf %292, %669 : vector<16x32xf32>
    %674 = arith.addf %360, %669 : vector<16x32xf32>
    %675 = arith.addf %428, %669 : vector<16x32xf32>
    %676 = arith.addf %496, %669 : vector<16x32xf32>
    %677 = arith.addf %564, %669 : vector<16x32xf32>
    %678 = tpu.concatenate %670, %671, %672, %673, %674, %675, %676, %677 in 0 : vector<16x32xf32>, vector<16x32xf32>, vector<16x32xf32>, vector<16x32xf32>, vector<16x32xf32>, vector<16x32xf32>, vector<16x32xf32>, vector<16x32xf32> -> vector<128x32xf32>
    %c0_138 = arith.constant 0 : index
    %c0_139 = arith.constant 0 : index
    %679 = vector.load %arg13[%c0_138, %c0_139] : memref<32x4xf32, #tpu.memory_space<vmem>>, vector<32x4xf32>
    %cst_140 = arith.constant dense<0.000000e+00> : vector<128x4xf32>
    %680 = tpu.matmul %678, %679, %cst_140 {dimension_numbers = #tpu.dot_dimension_numbers<[1], [0], [0], [1], [0, 0, 1, 1], [], []>} : vector<128x32xf32>, vector<32x4xf32>, vector<128x4xf32> -> vector<128x4xf32>
    %c0_141 = arith.constant 0 : index
    %c0_142 = arith.constant 0 : index
    %681 = vector.load %arg14[%c0_141, %c0_142] : memref<1x4xf32, #tpu.memory_space<vmem>>, vector<1x4xf32>
    %682 = vector.broadcast %681 : vector<1x4xf32> to vector<128x4xf32>
    %683 = arith.addf %680, %682 : vector<128x4xf32>
    %c0_143 = arith.constant 0 : index
    %c0_144 = arith.constant 0 : index
    %c0_145 = arith.constant 0 : index
    %684 = vector.load %arg15[%c0_143, %c0_144, %c0_145] : memref<1x128x4xf32, #tpu.memory_space<vmem>>, vector<1x128x4xf32>
    %685 = vector.shape_cast %684 : vector<1x128x4xf32> to vector<128x4xf32>
    %686 = vector.shape_cast %683 : vector<128x4xf32> to vector<1x128x4xf32>
    tpu.vector_store %arg15[%c0_143, %c0_144, %c0_145], %686 {strides = array<i32>} : memref<1x128x4xf32, #tpu.memory_space<vmem>>, vector<1x128x4xf32>,
    return
  }
  func.func @transform_0(%arg0: i32) -> (i32, i32, i32) {
    %c0_i32 = arith.constant 0 : i32
    %c0_i32_0 = arith.constant 0 : i32
    %c0_i32_1 = arith.constant 0 : i32
    return %arg0, %c0_i32, %c0_i32_0 : i32, i32, i32
  }
  func.func @transform_1(%arg0: i32) -> (i32, i32, i32) {
    %c0_i32 = arith.constant 0 : i32
    %c0_i32_0 = arith.constant 0 : i32
    %c0_i32_1 = arith.constant 0 : i32
    return %arg0, %c0_i32, %c0_i32_0 : i32, i32, i32
  }
  func.func @transform_2(%arg0: i32) -> (i32, i32) {
    %c0_i32 = arith.constant 0 : i32
    %c0_i32_0 = arith.constant 0 : i32
    %c0_i32_1 = arith.constant 0 : i32
    return %c0_i32, %c0_i32_0 : i32, i32
  }
  func.func @transform_3(%arg0: i32) -> (i32, i32) {
    %c0_i32 = arith.constant 0 : i32
    %c0_i32_0 = arith.constant 0 : i32
    %c0_i32_1 = arith.constant 0 : i32
    return %c0_i32, %c0_i32_0 : i32, i32
  }
  func.func @transform_4(%arg0: i32) -> (i32, i32) {
    %c0_i32 = arith.constant 0 : i32
    %c0_i32_0 = arith.constant 0 : i32
    %c0_i32_1 = arith.constant 0 : i32
    return %c0_i32, %c0_i32_0 : i32, i32
  }
  func.func @transform_5(%arg0: i32) -> (i32, i32) {
    %c0_i32 = arith.constant 0 : i32
    %c0_i32_0 = arith.constant 0 : i32
    %c0_i32_1 = arith.constant 0 : i32
    return %c0_i32, %c0_i32_0 : i32, i32
  }
  func.func @transform_6(%arg0: i32) -> (i32, i32) {
    %c0_i32 = arith.constant 0 : i32
    %c0_i32_0 = arith.constant 0 : i32
    %c0_i32_1 = arith.constant 0 : i32
    return %c0_i32, %c0_i32_0 : i32, i32
  }
  func.func @transform_7(%arg0: i32) -> (i32, i32) {
    %c0_i32 = arith.constant 0 : i32
    %c0_i32_0 = arith.constant 0 : i32
    %c0_i32_1 = arith.constant 0 : i32
    return %c0_i32, %c0_i32_0 : i32, i32
  }
  func.func @transform_8(%arg0: i32) -> (i32, i32) {
    %c0_i32 = arith.constant 0 : i32
    %c0_i32_0 = arith.constant 0 : i32
    %c0_i32_1 = arith.constant 0 : i32
    return %c0_i32, %c0_i32_0 : i32, i32
  }
  func.func @transform_9(%arg0: i32) -> (i32, i32) {
    %c0_i32 = arith.constant 0 : i32
    %c0_i32_0 = arith.constant 0 : i32
    %c0_i32_1 = arith.constant 0 : i32
    return %c0_i32, %c0_i32_0 : i32, i32
  }
  func.func @transform_10(%arg0: i32) -> (i32, i32) {
    %c0_i32 = arith.constant 0 : i32
    %c0_i32_0 = arith.constant 0 : i32
    %c0_i32_1 = arith.constant 0 : i32
    return %c0_i32, %c0_i32_0 : i32, i32
  }
  func.func @transform_11(%arg0: i32) -> (i32, i32) {
    %c0_i32 = arith.constant 0 : i32
    %c0_i32_0 = arith.constant 0 : i32
    %c0_i32_1 = arith.constant 0 : i32
    return %c0_i32, %c0_i32_0 : i32, i32
  }
  func.func @transform_12(%arg0: i32) -> (i32, i32) {
    %c0_i32 = arith.constant 0 : i32
    %c0_i32_0 = arith.constant 0 : i32
    %c0_i32_1 = arith.constant 0 : i32
    return %c0_i32, %c0_i32_0 : i32, i32
  }
  func.func @transform_13(%arg0: i32) -> (i32, i32) {
    %c0_i32 = arith.constant 0 : i32
    %c0_i32_0 = arith.constant 0 : i32
    %c0_i32_1 = arith.constant 0 : i32
    return %c0_i32, %c0_i32_0 : i32, i32
  }
  func.func @transform_14(%arg0: i32) -> (i32, i32, i32) {
    %c0_i32 = arith.constant 0 : i32
    %c0_i32_0 = arith.constant 0 : i32
    %c0_i32_1 = arith.constant 0 : i32
    return %arg0, %c0_i32, %c0_i32_0 : i32, i32, i32
  }
}

</mosaic_0001>

<bundles_post_ra>
// kernel: tpu_custom_call.1
= control target key start
LH: loop header
LB: loop body
LE: loop exit
PB: predicated region body
PF: predicated region fallthrough
CT: control target
= control target key end

     0   :  { %vm91_vm0 = vcmask 64512   ;;  %s3268_s16 = smov 64   ;;  %v3269_v12 = vmov 0.0   ;;  %s3270_s21 = smov 96   ;;  %vm205_vm9 = vcmask 261120   ;;  %s4608_s2 = inlined_call_operand.vmem [shape: f32[8,96], index: 2, kind: input, shape index: {}]   ;;  %s4609_s0 = inlined_call_operand.vmem [shape: f32[1,128,8], index: 0, kind: input, shape index: {}]   ;;  %s4610_s3 = inlined_call_operand.vmem [shape: f32[32,96], index: 3, kind: input, shape index: {}]   ;;  %s4611_s5 = inlined_call_operand.vmem [shape: f32[1,32], index: 5, kind: input, shape index: {}]   ;;  %s4612_s4 = inlined_call_operand.vmem [shape: f32[1,96], index: 4, kind: input, shape index: {}]   ;;  %s4613_s9 = inlined_call_operand.vmem [shape: f32[1,32], index: 9, kind: input, shape index: {}]   ;;  %s4614_s7 = inlined_call_operand.vmem [shape: f32[32,96], index: 7, kind: input, shape index: {}]   ;;  %s4615_s6 = inlined_call_operand.vmem [shape: f32[32,96], index: 6, kind: input, shape index: {}]   ;;  %s4616_s8 = inlined_call_operand.vmem [shape: f32[1,96], index: 8, kind: input, shape index: {}]   ;;  %s4617_s10 = inlined_call_operand.vmem [shape: f32[1,32], index: 10, kind: input, shape index: {}]   ;;  %s4618_s1 = inlined_call_operand.vmem [shape: f32[1,128,1], index: 1, kind: input, shape index: {}]   ;;  %s4619_s11 = inlined_call_operand.<no memory space> [shape: f32[1,1], index: 11, kind: input, shape index: {}]   ;;  %s4620_s12 = inlined_call_operand.vmem [shape: f32[32,4], index: 12, kind: input, shape index: {}]   ;;  %s4621_s13 = inlined_call_operand.vmem [shape: f32[1,4], index: 13, kind: input, shape index: {}]   ;;  %s4622_s14 = inlined_call_operand.vmem [shape: f32[1,128,4], index: 14, kind: output, shape index: {}]  }
   0x1   :  { %v86_v0 = vld [vmem:[%s4608_s2] sm:$0xff]  ;;  %v3357_v2 = vld [vmem:[%s4610_s3 + $0x18] sm:$0xff]  ;;  %v3363_v3 = vld [vmem:[%s4610_s3 + $0x10] sm:$0xff]  ;;  %s3272_s24 = smov 32  }
   0x2   :  { %v74_v1 = vld [vmem:[%s4609_s0 + $0x20] sm:$0xff]  ;;  %3006 = vmatpush.msra.mxu1 %v86_v0  ;;  %155 = vmatpush.msra.mxu0 %v86_v0  ;;  %v3372_v5 = vld [vmem:[%s4610_s3 + $0x8] sm:$0xff]  ;;  %v76_v10 = vld [vmem:[%s4609_s0 + $0x30] sm:$0xff] }
   0x3   :  { %2902 = vmatmul.msk.f32.vlgmr.msra.gmra.mxu1 %vm91_vm0, %v74_v1  ;;  %3008 = vmatpush.msra.mxu3 %v86_v0  ;;  %v70_v4 = vld [vmem:[%s4609_s0] sm:$0xff]  ;;  %v75_v7 = vld [vmem:[%s4609_s0 + $0x28] sm:$0xff]  ;;  %v77_v11 = vld [vmem:[%s4609_s0 + $0x38] sm:$0xff] }
   0x4   :  { %221 = vmatpush.msrb.mxu1 %v3357_v2  ;;  %3007 = vmatpush.msra.mxu2 %v86_v0  ;;  %v3379_v6 = vld [vmem:[%s4610_s3] sm:$0xff]  ;;  %v71_v9 = vld [vmem:[%s4609_s0 + $0x8] sm:$0xff] }
   0x5   :  { %2898 = vmatmul.msk.f32.vlgmr.msra.gmra.mxu0 %vm91_vm0, %v70_v4  ;;  %v3017_v8 = vld [vmem:[%s4611_s5] ss:$0 sm:$0xff]  ;;  %v83_v4 = vld [vmem:[%s4609_s0 + $0x68] sm:$0xff] }
   0x6   :  { %222 = vmatpush.msrb.mxu1 %v3363_v3  ;;  %272 = vrot.lane.b32.xlu0 %v3017_v8, %s3268_s16  ;;  %v3430_v23 = vld [vmem:[%s4612_s4] ss:$0 sm:$0xff]  ;;  %v3455_v8 = vld [vmem:[%s4614_s7 + $0x10] sm:$0xff] }
   0x7   :  { %v82_v1 = vld [vmem:[%s4609_s0 + $0x60] sm:$0xff] }
   0x8   :  { %223 = vmatpush.msrb.mxu1 %v3372_v5  ;;  %2910 = vmatmul.msk.f32.vlgmr.msra.gmra.mxu3 %vm91_vm0, %v82_v1 }
   0xa   :  { %224 = vmatpush.msrb.mxu1 %v3379_v6 }
   0xb   :  { %2903 = vmatmul.msk.f32.gmra.mxu1 %vm91_vm0, %v75_v7  ;;  %v3449_v7 = vld [vmem:[%s4614_s7 + $0x18] sm:$0xff] }
   0xc   :  { %485 = vmatpush.msra.mxu1 %v3357_v2  ;;  %363 = vmatpush.msrb.mxu3 %v3449_v7 }
   0xd   :  { %2899 = vmatmul.msk.f32.gmra.mxu0 %vm91_vm0, %v71_v9  ;;  %v3460_v9 = vld [vmem:[%s4614_s7 + $0x8] sm:$0xff] }
   0xe   :  { %486 = vmatpush.msra.mxu1 %v3363_v3  ;;  %364 = vmatpush.msrb.mxu3 %v3455_v8 }
  0x10   :  { %487 = vmatpush.msra.mxu1 %v3372_v5  ;;  %2911 = vmatmul.msk.f32.gmra.mxu3 %vm91_vm0, %v83_v4 }
  0x11   :  { %365 = vmatpush.msrb.mxu3 %v3460_v9 }
  0x12   :  { %488 = vmatpush.msra.mxu1 %v3379_v6 }
  0x13   :  { %2904 = vmatmul.msk.f32.gmra.mxu1 %vm91_vm0, %v76_v10  ;;  %v3019_v10 = vld [vmem:[%s4613_s9] ss:$0 sm:$0xff] }
  0x1b   :  { %2905 = vmatmul.msk.f32.gmra.mxu1 %vm91_vm0, %v77_v11  ;;  %v78_v11 = vld [vmem:[%s4609_s0 + $0x40] sm:$0xff] }
  0x1c   :  { %2906 = vmatmul.msk.f32.vlgmr.msra.gmra.mxu2 %vm91_vm0, %v78_v11 }
  0x23   :  { %225 = vmatmul.f32.vlgmr.msrb.gmra.mxu1 %v3269_v12 }
  0x24   :  { %750 = vmatpush.msrb.mxu1 %v3357_v2 }
  0x26   :  { %751 = vmatpush.msrb.mxu1 %v3363_v3 }
  0x28   :  { %752 = vmatpush.msrb.mxu1 %v3372_v5 }
  0x2a   :  { %753 = vmatpush.msrb.mxu1 %v3379_v6 }
  0x2b   :  { %228 = vmatmul.f32.gmra.mxu1 %v3269_v12 }
  0x78   :  { %v3421_v17 = vpop.permute.xlu0 %272 }
  0x80   :  { %v3413_v13 = vpop.f32.mrf.mxu1 }
  0x82   :  { %v157_v22 = vpop.f32.mrf.mxu0 }
  0x83   :  { %v158_v24 = vadd.f32 %v3430_v23, %v157_v22 }
  0x88   :  { %v3415_v14 = vpop.f32.mrf.mxu1 }
  0x8a   :  { %v160_v26 = vpop.f32.mrf.mxu0 }
  0x8b   :  { %v161_v28 = vadd.f32 %v3430_v23, %v160_v26 }
  0x90   :  { %v3417_v15 = vpop.f32.mrf.mxu1 }
  0x98   :  { %v3419_v16 = vpop.f32.mrf.mxu1 }
  0xa0   :  { %v226_v18 = vpop.f32.mrf.mxu1 }
  0xa1   :  { %v275_v19 = vadd.f32 %v3421_v17, %v226_v18  ;;  %v232_v25 = vadd.f32 %v226_v18, %v158_v24  ;;  %v84_v18 = vld [vmem:[%s4609_s0 + $0x70] sm:$0xff] }
  0xa2   :  { %2912 = vmatmul.msk.f32.gmra.mxu3 %vm91_vm0, %v84_v18 }
  0xa3   :  { %279 = vrot.lane.b32.xlu0 %v275_v19, %s3268_s16  ;;  %v2914_v27 = vmul.f32 -1.442695, %v232_v25  ;;  %v3476_v19 = vld [vmem:[%s4614_s7] sm:$0xff] }
  0xa4   :  { %366 = vmatpush.msrb.mxu3 %v3476_v19 }
  0xa5   :  { %3024 = vpow2.f32 %v2914_v27 }
  0xa6   :  { %631 = vmatpush.msra.mxu3 %v3449_v7 }
  0xa8   :  { %v229_v20 = vpop.f32.mrf.mxu1  ;;  %632 = vmatpush.msra.mxu3 %v3455_v8 }
  0xa9   :  { %v276_v21 = vadd.f32 %v3421_v17, %v229_v20  ;;  %v233_v29 = vadd.f32 %v229_v20, %v161_v28  ;;  %v79_v20 = vld [vmem:[%s4609_s0 + $0x48] sm:$0xff] }
  0xaa   :  { %2907 = vmatmul.msk.f32.gmra.mxu2 %vm91_vm0, %v79_v20  ;;  %633 = vmatpush.msra.mxu3 %v3460_v9 }
  0xab   :  { %281 = vrot.lane.b32.xlu1 %v276_v21, %s3268_s16  ;;  %v2915_v30 = vmul.f32 -1.442695, %v233_v29  ;;  %v3025_v31 = vpop.eup %3024  ;;  %v85_v21 = vld [vmem:[%s4609_s0 + $0x78] sm:$0xff] }
  0xac   :  { %v240_v32 = vadd.f32 1.0, %v3025_v31  ;;  %2913 = vmatmul.msk.f32.gmra.mxu3 %vm91_vm0, %v85_v21 }
  0xad   :  { %3026 = vpow2.f32 %v2915_v30  ;;  %634 = vmatpush.msra.mxu3 %v3476_v19 }
  0xae   :  { %3028 = vrcp.f32 %v240_v32  ;;  %v253_v43 = vand.u32 2147483648, %v240_v32  ;;  %vm247_vm2 = vweird.f32 %v240_v32  ;;  %v251_v44 = vand.u32 2147483647, %v240_v32 }
  0xb0   :  { %v254_v47 = vor.u32 1.1754944e-38, %v253_v43  ;;  %vm252_vm4 = vcmp.eq.f32.partialorder %v251_v44, 8.507059e+37 }
  0xb3   :  { %v3027_v33 = vpop.eup %3026 }
  0xb4   :  { %v241_v34 = vadd.f32 1.0, %v3027_v33  ;;  %v3029_v35 = vpop.eup %3028  ;;  %367 = vmatmul.f32.vlgmr.msrb.gmra.mxu3 %v3269_v12  ;;  %v80_v33 = vld [vmem:[%s4609_s0 + $0x50] sm:$0xff] }
  0xb5   :  { %v243_v36 = vmul.f32 %v3029_v35, %v240_v32  ;;  %vm248_vm1 = vweird.f32 %v3029_v35  ;;  %896 = vmatpush.msrb.mxu3 %v3449_v7  ;;  %2908 = vmatmul.msk.f32.gmra.mxu2 %vm91_vm0, %v80_v33 }
  0xb6   :  { %3030 = vrcp.f32 %v241_v34  ;;  %vm249_vm3 = vmor %vm247_vm2, %vm248_vm1  ;;  %vm262_vm5 = vweird.f32 %v241_v34  ;;  %v268_v50 = vand.u32 2147483648, %v241_v34  ;;  %v266_v53 = vand.u32 2147483647, %v241_v34 }
  0xb7   :  { %v244_v37 = vsub.f32 1.0, %v243_v36  ;;  %897 = vmatpush.msrb.mxu3 %v3455_v8  ;;  %v3530_v36 = vld [vmem:[%s4615_s6 + $0x8] sm:$0xff] }
  0xb8   :  { %v269_v54 = vor.u32 1.1754944e-38, %v268_v50  ;;  %vm267_vm8 = vcmp.eq.f32.partialorder %v266_v53, 8.507059e+37 }
  0xb9   :  { %v245_v39 = vmul.f32 %v3029_v35, %v244_v37  ;;  %898 = vmatpush.msrb.mxu3 %v3460_v9  ;;  %v3536_v37 = vld [vmem:[%s4615_s6] sm:$0xff] }
  0xbb   :  { %v246_v41 = vadd.f32 %v3029_v35, %v245_v39  ;;  %899 = vmatpush.msrb.mxu3 %v3476_v19  ;;  %v73_v39 = vld [vmem:[%s4609_s0 + $0x18] sm:$0xff] }
  0xbc   :  { %v3031_v38 = vpop.eup %3030  ;;  %370 = vmatmul.f32.gmra.mxu3 %v3269_v12  ;;  %v72_v12 = vld [vmem:[%s4609_s0 + $0x10] sm:$0xff] }
  0xbd   :  { %v258_v40 = vmul.f32 %v3031_v38, %v241_v34  ;;  %v250_v45 = vsel %vm249_vm3, %v3029_v35, %v246_v41  ;;  %vm263_vm6 = vweird.f32 %v3031_v38  ;;  %v3514_v34 = vld [vmem:[%s4615_s6 + $0x18] sm:$0xff]  ;;  %v3520_v35 = vld [vmem:[%s4615_s6 + $0x10] sm:$0xff]  ;;  %2900 = vmatmul.msk.f32.gmra.mxu0 %vm91_vm0, %v72_v12 }
  0xbe   :  { %v255_v49 = vsel %vm252_vm4, %v254_v47, %v250_v45  ;;  %vm264_vm7 = vmor %vm262_vm5, %vm263_vm6  ;;  %340 = vmatpush.msrb.mxu2 %v3514_v34 }
  0xbf   :  { %v259_v42 = vsub.f32 1.0, %v258_v40  ;;  %v299_v22 = vsub.f32 1.0, %v255_v49  ;;  %v311_v25 = vmul.f32 0.0, %v255_v49  ;;  %v3552_v40 = vpop.f32.mrf.mxu3 }
  0xc0   :  { %341 = vmatpush.msrb.mxu2 %v3520_v35 }
  0xc1   :  { %v260_v46 = vmul.f32 %v3031_v38, %v259_v42 }
  0xc2   :  { %342 = vmatpush.msrb.mxu2 %v3530_v36 }
  0xc3   :  { %v261_v52 = vadd.f32 %v3031_v38, %v260_v46 }
  0xc4   :  { %343 = vmatpush.msrb.mxu2 %v3536_v37 }
  0xc5   :  { %v265_v55 = vsel %vm264_vm7, %v3031_v38, %v261_v52  ;;  %v81_v38 = vld [vmem:[%s4609_s0 + $0x58] sm:$0xff]  ;;  %2901 = vmatmul.msk.f32.gmra.mxu0 %vm91_vm0, %v73_v39 }
  0xc6   :  { %v270_v57 = vsel %vm267_vm8, %v269_v54, %v265_v55  ;;  %2909 = vmatmul.msk.f32.gmra.mxu2 %vm91_vm0, %v81_v38 }
  0xc7   :  { %v312_v30 = vmul.f32 0.0, %v270_v57  ;;  %598 = vmatpush.msra.mxu2 %v3514_v34  ;;  %v3554_v41 = vpop.f32.mrf.mxu3 }
  0xc9   :  { %599 = vmatpush.msra.mxu2 %v3520_v35 }
  0xcb   :  { %600 = vmatpush.msra.mxu2 %v3530_v36 }
  0xcd   :  { %601 = vmatpush.msra.mxu2 %v3536_v37 }
 0x115   :  { %v280_v48 = vpop.permute.xlu0 %279 }
 0x116   :  { %v285_v51 = vmul.f32 %v280_v48, %v255_v49 }
 0x118   :  { %289 = vrot.lane.b32.xlu1 %v285_v51, %s3268_s16  ;;  %v3578_v51 = vpop.f32.mrf.mxu2 }
 0x11d   :  { %v282_v56 = vpop.permute.xlu1 %281 }
 0x11e   :  { %v286_v58 = vmul.f32 %v282_v56, %v270_v57 }
 0x120   :  { %291 = vrot.lane.b32.xlu2 %v286_v58, %s3268_s16 }
 0x125   :  { %v3556_v42 = vpop.f32.mrf.mxu3 }
 0x12d   :  { %v3580_v52 = vpop.f32.mrf.mxu2 }
 0x12f   :  { %v3566_v44 = vpop.f32.mrf.mxu3 }
 0x137   :  { %v368_v47 = vpop.f32.mrf.mxu3 }
 0x138   :  { %v3582_v53 = vpop.f32.mrf.mxu2 }
 0x13f   :  { %v371_v49 = vpop.f32.mrf.mxu3 }
 0x149   :  { %v3584_v54 = vpop.f32.mrf.mxu2 }
 0x17a   :  { %v292_v59 = vpop.permute.xlu2 %291 }
 0x17b   :  { %v296_v60 = vadd.f32 %v292_v59, %v161_v28  ;;  %v300_v28 = vsub.f32 1.0, %v270_v57  ;;  %v3591_v57 = vld [vmem:[%s4616_s8] ss:$0 sm:$0xff] }
 0x17d   :  { %3032 = vtanh.f32 %v296_v60 }
 0x183   :  { %v3033_v61 = vpop.eup %3032 }
 0x184   :  { %305 = vrot.lane.b32.xlu0 %v3033_v61, %s3270_s21 }
 0x18a   :  { %v290_v62 = vpop.permute.xlu1 %289 }
 0x18b   :  { %v295_v63 = vadd.f32 %v290_v62, %v158_v24 }
 0x18c   :  { %414 = vrot.lane.b32.xlu0 %v3019_v10, %s3268_s16 }
 0x18d   :  { %3034 = vtanh.f32 %v295_v63 }
 0x193   :  { %v3035_v0 = vpop.eup %3034 }
 0x194   :  { %303 = vrot.lane.b32.xlu2 %v3035_v0, %s3270_s21 }
 0x1ee   :  { %v304_v24 = vpop.permute.xlu2 %303 }
 0x1ef   :  { %v309_v26 = vmul.f32 %v304_v24, %v299_v22 }
 0x1f1   :  { %v3494_v27 = vadd.f32 %v311_v25, %v309_v26 }
 0x1f3   :  { %320 = vrot.lane.b32.xlu1 %v3494_v27, %s3270_s21 }
 0x1f6   :  { %v306_v29 = vpop.permute.xlu0 %305 }
 0x1f7   :  { %v310_v31 = vmul.f32 %v306_v29, %v300_v28 }
 0x1f9   :  { %v3503_v32 = vadd.f32 %v312_v30, %v310_v31 }
 0x1fb   :  { %322 = vrot.lane.b32.xlu2 %v3503_v32, %s3270_s21 }
 0x1fe   :  { %v3572_v46 = vpop.permute.xlu0 %414 }
 0x1ff   :  { %v417_v48 = vadd.f32 %v3572_v46, %v368_v47  ;;  %v418_v50 = vadd.f32 %v3572_v46, %v371_v49 }
 0x201   :  { %421 = vrot.lane.b32.xlu1 %v417_v48, %s3268_s16 }
 0x203   :  { %423 = vrot.lane.b32.xlu2 %v418_v50, %s3268_s16 }
 0x255   :  { %v323_v45 = vpop.permute.xlu2 %322 }
 0x265   :  { %v321_v43 = vpop.permute.xlu1 %320 }
 0x266   :  { %2916 = vmatmul.msk.f32.vlgmr.msrb.gmra.mxu2 %vm205_vm9, %v321_v43  ;;  %2920 = vmatmul.msk.f32.vlgmr.msra.gmra.mxu1 %vm205_vm9, %v321_v43 }
 0x267   :  { %863 = vmatpush.msrb.mxu2 %v3514_v34  ;;  %1015 = vmatpush.msra.mxu1 %v3357_v2 }
 0x269   :  { %864 = vmatpush.msrb.mxu2 %v3520_v35  ;;  %1016 = vmatpush.msra.mxu1 %v3363_v3 }
 0x26b   :  { %865 = vmatpush.msrb.mxu2 %v3530_v36  ;;  %1017 = vmatpush.msra.mxu1 %v3372_v5 }
 0x26d   :  { %866 = vmatpush.msrb.mxu2 %v3536_v37  ;;  %1018 = vmatpush.msra.mxu1 %v3379_v6 }
 0x26e   :  { %2917 = vmatmul.msk.f32.gmra.mxu2 %vm205_vm9, %v323_v45  ;;  %2921 = vmatmul.msk.f32.gmra.mxu1 %vm205_vm9, %v323_v45 }
 0x273   :  { %v422_v12 = vpop.permute.xlu1 %421 }
 0x2e3   :  { %v490_v55 = vpop.f32.mrf.mxu1 }
 0x2e4   :  { %v536_v56 = vadd.f32 %v490_v55, %v3421_v17 }
 0x2e6   :  { %540 = vrot.lane.b32.xlu0 %v536_v56, %s3268_s16 }
 0x2e9   :  { %v345_v58 = vpop.f32.mrf.mxu2 }
 0x2ea   :  { %v3594_v59 = vadd.f32 %v3591_v57, %v345_v58 }
 0x2eb   :  { %v493_v60 = vpop.f32.mrf.mxu1 }
 0x2ec   :  { %v374_v61 = vadd.f32 %v368_v47, %v3594_v59  ;;  %v537_v62 = vadd.f32 %v493_v60, %v3421_v17 }
 0x2ee   :  { %v2918_v63 = vmul.f32 -1.442695, %v374_v61  ;;  %542 = vrot.lane.b32.xlu1 %v537_v62, %s3268_s16 }
 0x2f0   :  { %3036 = vpow2.f32 %v2918_v63  ;;  %v424_v63 = vpop.permute.xlu2 %423 }
 0x2f1   :  { %v348_v0 = vpop.f32.mrf.mxu2 }
 0x2f2   :  { %v3600_v1 = vadd.f32 %v3591_v57, %v348_v0 }
 0x2f4   :  { %v375_v4 = vadd.f32 %v371_v49, %v3600_v1 }
 0x2f6   :  { %v3037_v10 = vpop.eup %3036  ;;  %v2919_v11 = vmul.f32 -1.442695, %v375_v4  ;;  %v163_v4 = vpop.f32.mrf.mxu0 }
 0x2f7   :  { %v382_v18 = vadd.f32 1.0, %v3037_v10  ;;  %v3612_v10 = vadd.f32 %v3430_v23, %v163_v4 }
 0x2f8   :  { %3038 = vpow2.f32 %v2919_v11 }
 0x2f9   :  { %3040 = vrcp.f32 %v382_v18  ;;  %v395_v26 = vand.u32 2147483648, %v382_v18  ;;  %v393_v29 = vand.u32 2147483647, %v382_v18  ;;  %vm389_vm11 = vweird.f32 %v382_v18 }
 0x2fa   :  { %v496_v11 = vadd.f32 %v490_v55, %v3612_v10 }
 0x2fb   :  { %v396_v33 = vor.u32 1.1754944e-38, %v395_v26  ;;  %vm394_vm13 = vcmp.eq.f32.partialorder %v393_v29, 8.507059e+37 }
 0x2fe   :  { %v3039_v20 = vpop.eup %3038 }
 0x2ff   :  { %v3041_v21 = vpop.eup %3040  ;;  %v383_v22 = vadd.f32 1.0, %v3039_v20  ;;  %v2922_v20 = vmul.f32 -1.442695, %v496_v11 }
 0x300   :  { %v385_v24 = vmul.f32 %v3041_v21, %v382_v18  ;;  %vm390_vm10 = vweird.f32 %v3041_v21  ;;  %v166_v18 = vpop.f32.mrf.mxu0 }
 0x301   :  { %3042 = vrcp.f32 %v383_v22  ;;  %vm391_vm12 = vmor %vm389_vm11, %vm390_vm10  ;;  %v410_v48 = vand.u32 2147483648, %v383_v22  ;;  %v408_v50 = vand.u32 2147483647, %v383_v22  ;;  %vm404_vm15 = vweird.f32 %v383_v22 }
 0x302   :  { %v386_v25 = vsub.f32 1.0, %v385_v24  ;;  %3044 = vpow2.f32 %v2922_v20 }
 0x303   :  { %v411_v58 = vor.u32 1.1754944e-38, %v410_v48  ;;  %vm409_vm1 = vcmp.eq.f32.partialorder %v408_v50, 8.507059e+37 }
 0x304   :  { %v387_v28 = vmul.f32 %v3041_v21, %v386_v25 }
 0x306   :  { %v388_v30 = vadd.f32 %v3041_v21, %v387_v28 }
 0x307   :  { %v3043_v31 = vpop.eup %3042 }
 0x308   :  { %v400_v38 = vmul.f32 %v3043_v31, %v383_v22  ;;  %v392_v39 = vsel %vm391_vm12, %v3041_v21, %v388_v30  ;;  %vm405_vm14 = vweird.f32 %v3043_v31  ;;  %v167_v21 = vadd.f32 %v3430_v23, %v166_v18  ;;  %v3045_v25 = vpop.eup %3044 }
 0x309   :  { %v3603_v43 = vsel %vm394_vm13, %v396_v33, %v392_v39  ;;  %vm406_vm0 = vmor %vm404_vm15, %vm405_vm14  ;;  %v504_v26 = vadd.f32 1.0, %v3045_v25 }
 0x30a   :  { %v401_v45 = vsub.f32 1.0, %v400_v38  ;;  %v427_v47 = vmul.f32 %v422_v12, %v3603_v43  ;;  %v497_v22 = vadd.f32 %v493_v60, %v167_v21 }
 0x30b   :  { %vm511_vm3 = vweird.f32 %v504_v26  ;;  %v515_v60 = vand.u32 2147483647, %v504_v26 }
 0x30c   :  { %v402_v49 = vmul.f32 %v3043_v31, %v401_v45  ;;  %431 = vrot.lane.b32.xlu2 %v427_v47, %s3268_s16  ;;  %v2923_v24 = vmul.f32 -1.442695, %v497_v22  ;;  %v517_v47 = vand.u32 2147483648, %v504_v26 }
 0x30d   :  { %vm516_vm5 = vcmp.eq.f32.partialorder %v515_v60, 8.507059e+37 }
 0x30e   :  { %v403_v56 = vadd.f32 %v3043_v31, %v402_v49  ;;  %3046 = vpow2.f32 %v2923_v24  ;;  %v518_v50 = vor.u32 1.1754944e-38, %v517_v47  ;;  %v453_v47 = vmul.f32 0.0, %v3603_v43 }
 0x30f   :  { %3048 = vrcp.f32 %v504_v26 }
 0x310   :  { %v407_v61 = vsel %vm406_vm0, %v3043_v31, %v403_v56 }
 0x311   :  { %v3607_v62 = vsel %vm409_vm1, %v411_v58, %v407_v61 }
 0x312   :  { %v428_v0 = vmul.f32 %v424_v63, %v3607_v62 }
 0x314   :  { %433 = vrot.lane.b32.xlu0 %v428_v0, %s3268_s16  ;;  %v3047_v28 = vpop.eup %3046 }
 0x315   :  { %v505_v29 = vadd.f32 1.0, %v3047_v28  ;;  %v3049_v30 = vpop.eup %3048 }
 0x316   :  { %v507_v31 = vmul.f32 %v3049_v30, %v504_v26  ;;  %vm512_vm2 = vweird.f32 %v3049_v30 }
 0x317   :  { %3050 = vrcp.f32 %v505_v29  ;;  %vm513_vm4 = vmor %vm511_vm3, %vm512_vm2  ;;  %v532_v0 = vand.u32 2147483648, %v505_v29  ;;  %vm526_vm7 = vweird.f32 %v505_v29  ;;  %v530_v4 = vand.u32 2147483647, %v505_v29 }
 0x318   :  { %v508_v33 = vsub.f32 1.0, %v507_v31 }
 0x319   :  { %v533_v18 = vor.u32 1.1754944e-38, %v532_v0  ;;  %vm531_vm10 = vcmp.eq.f32.partialorder %v530_v4, 8.507059e+37 }
 0x31a   :  { %v509_v38 = vmul.f32 %v3049_v30, %v508_v33 }
 0x31c   :  { %v510_v39 = vadd.f32 %v3049_v30, %v509_v38 }
 0x31d   :  { %v3051_v12 = vpop.eup %3050 }
 0x31e   :  { %v522_v55 = vmul.f32 %v3051_v12, %v505_v29  ;;  %v514_v48 = vsel %vm513_vm4, %v3049_v30, %v510_v39  ;;  %vm527_vm6 = vweird.f32 %v3051_v12 }
 0x31f   :  { %v519_v58 = vsel %vm516_vm5, %v518_v50, %v514_v48  ;;  %vm528_vm8 = vmor %vm526_vm7, %vm527_vm6 }
 0x320   :  { %v523_v45 = vsub.f32 1.0, %v522_v55 }
 0x322   :  { %v524_v49 = vmul.f32 %v3051_v12, %v523_v45  ;;  %v441_v45 = vsub.f32 1.0, %v3603_v43  ;;  %v572_v43 = vmul.f32 %v519_v58, %v3494_v27 }
 0x324   :  { %v525_v63 = vadd.f32 %v3051_v12, %v524_v49 }
 0x326   :  { %v529_v11 = vsel %vm528_vm8, %v3051_v12, %v525_v63 }
 0x327   :  { %v534_v22 = vsel %vm531_vm10, %v533_v18, %v529_v11 }
 0x328   :  { %v561_v11 = vsub.f32 1.0, %v534_v22 }
 0x358   :  { %v541_v56 = vpop.permute.xlu0 %540 }
 0x359   :  { %v546_v61 = vmul.f32 %v541_v56, %v519_v58 }
 0x35b   :  { %550 = vrot.lane.b32.xlu1 %v546_v61, %s3268_s16  ;;  %v560_v61 = vsub.f32 1.0, %v519_v58 }
 0x360   :  { %v543_v20 = vpop.permute.xlu1 %542 }
 0x361   :  { %v547_v24 = vmul.f32 %v543_v20, %v534_v22 }
 0x363   :  { %552 = vrot.lane.b32.xlu2 %v547_v24, %s3268_s16 }
 0x366   :  { %v432_v25 = vpop.permute.xlu2 %431 }
 0x367   :  { %v437_v26 = vadd.f32 %v432_v25, %v3594_v59 }
 0x369   :  { %3052 = vtanh.f32 %v437_v26 }
 0x36f   :  { %v3053_v28 = vpop.eup %3052 }
 0x370   :  { %445 = vrot.lane.b32.xlu0 %v3053_v28, %s3270_s21 }
 0x386   :  { %v434_v30 = vpop.permute.xlu0 %433 }
 0x387   :  { %v438_v31 = vadd.f32 %v434_v30, %v3600_v1 }
 0x389   :  { %3054 = vtanh.f32 %v438_v31 }
 0x38f   :  { %v3055_v29 = vpop.eup %3054 }
 0x390   :  { %447 = vrot.lane.b32.xlu1 %v3055_v29, %s3270_s21 }
 0x3bd   :  { %v553_v33 = vpop.permute.xlu2 %552 }
 0x3be   :  { %v557_v12 = vadd.f32 %v553_v33, %v167_v21  ;;  %v442_v21 = vsub.f32 1.0, %v3607_v62 }
 0x3c0   :  { %3056 = vtanh.f32 %v557_v12 }
 0x3c6   :  { %v3057_v38 = vpop.eup %3056 }
 0x3c7   :  { %566 = vrot.lane.b32.xlu0 %v3057_v38, %s3270_s21 }
 0x3cd   :  { %v551_v55 = vpop.permute.xlu1 %550 }
 0x3ce   :  { %v556_v59 = vadd.f32 %v551_v55, %v3612_v10  ;;  %v454_v10 = vmul.f32 0.0, %v3607_v62  ;;  %v573_v62 = vmul.f32 %v534_v22, %v3503_v32 }
 0x3d0   :  { %3058 = vtanh.f32 %v556_v59 }
 0x3d6   :  { %v3059_v39 = vpop.eup %3058 }
 0x3d7   :  { %564 = vrot.lane.b32.xlu2 %v3059_v39, %s3270_s21 }
 0x3e2   :  { %v446_v1 = vpop.permute.xlu0 %445 }
 0x3e3   :  { %v451_v60 = vmul.f32 %v446_v1, %v441_v45 }
 0x3e5   :  { %v3627_v48 = vadd.f32 %v453_v47, %v451_v60 }
 0x3e7   :  { %611 = vrot.lane.b32.xlu1 %v3627_v48, %s3270_s21 }
 0x402   :  { %v448_v49 = vpop.permute.xlu1 %447 }
 0x403   :  { %v452_v50 = vmul.f32 %v448_v49, %v442_v21 }
 0x405   :  { %v3633_v56 = vadd.f32 %v454_v10, %v452_v50 }
 0x407   :  { %613 = vrot.lane.b32.xlu2 %v3633_v56, %s3270_s21 }
 0x431   :  { %v565_v63 = vpop.permute.xlu2 %564 }
 0x432   :  { %v570_v0 = vmul.f32 %v565_v63, %v560_v61 }
 0x434   :  { %v3638_v4 = vadd.f32 %v572_v43, %v570_v0 }
 0x436   :  { %578 = vrot.lane.b32.xlu0 %v3638_v4, %s3270_s21 }
 0x439   :  { %v567_v18 = vpop.permute.xlu0 %566 }
 0x43a   :  { %v571_v20 = vmul.f32 %v567_v18, %v561_v11 }
 0x43c   :  { %v3643_v24 = vadd.f32 %v573_v62, %v571_v20 }
 0x43e   :  { %580 = vrot.lane.b32.xlu1 %v3643_v24, %s3270_s21 }
 0x459   :  { %v612_v25 = vpop.permute.xlu1 %611 }
 0x45a   :  { %2926 = vmatmul.msk.f32.vlgmr.msra.gmra.mxu3 %vm205_vm9, %v612_v25 }
 0x45b   :  { %1161 = vmatpush.msra.mxu3 %v3449_v7 }
 0x45d   :  { %1162 = vmatpush.msra.mxu3 %v3455_v8 }
 0x45f   :  { %1163 = vmatpush.msra.mxu3 %v3460_v9 }
 0x461   :  { %v614_v27 = vpop.permute.xlu2 %613  ;;  %1164 = vmatpush.msra.mxu3 %v3476_v19 }
 0x462   :  { %2927 = vmatmul.msk.f32.gmra.mxu3 %vm205_vm9, %v614_v27 }
 0x4a8   :  { %v579_v32 = vpop.permute.xlu0 %578 }
 0x4a9   :  { %2924 = vmatmul.msk.f32.vlgmr.msra.gmra.mxu2 %vm205_vm9, %v579_v32  ;;  %2930 = vmatmul.msk.f32.vlgmr.msrb.gmra.mxu1 %vm205_vm9, %v579_v32 }
 0x4aa   :  { %1128 = vmatpush.msra.mxu2 %v3514_v34  ;;  %1280 = vmatpush.msrb.mxu1 %v3357_v2 }
 0x4ac   :  { %1129 = vmatpush.msra.mxu2 %v3520_v35  ;;  %1281 = vmatpush.msrb.mxu1 %v3363_v3 }
 0x4ae   :  { %1130 = vmatpush.msra.mxu2 %v3530_v36  ;;  %1282 = vmatpush.msrb.mxu1 %v3372_v5 }
 0x4b0   :  { %v581_v58 = vpop.permute.xlu1 %580  ;;  %1131 = vmatpush.msra.mxu2 %v3536_v37  ;;  %1283 = vmatpush.msrb.mxu1 %v3379_v6 }
 0x4b1   :  { %2925 = vmatmul.msk.f32.gmra.mxu2 %vm205_vm9, %v581_v58  ;;  %2931 = vmatmul.msk.f32.gmra.mxu1 %vm205_vm9, %v581_v58 }
 0x4dd   :  { %v636_v22 = vpop.f32.mrf.mxu3 }
 0x4de   :  { %v682_v2 = vadd.f32 %v636_v22, %v3572_v46 }
 0x4e0   :  { %686 = vrot.lane.b32.xlu2 %v682_v2, %s3268_s16 }
 0x4e5   :  { %v639_v26 = vpop.f32.mrf.mxu3 }
 0x4e6   :  { %v683_v3 = vadd.f32 %v639_v26, %v3572_v46 }
 0x4e8   :  { %688 = vrot.lane.b32.xlu0 %v683_v3, %s3268_s16 }
 0x526   :  { %v755_v5 = vpop.f32.mrf.mxu1 }
 0x527   :  { %v801_v28 = vadd.f32 %v755_v5, %v3421_v17 }
 0x529   :  { %805 = vrot.lane.b32.xlu1 %v801_v28, %s3268_s16  ;;  %v3687_v28 = vadd.f32 %v3430_v23, %v3415_v14 }
 0x52c   :  { %v603_v6 = vpop.f32.mrf.mxu2 }
 0x52d   :  { %v3672_v30 = vadd.f32 %v3591_v57, %v603_v6 }
 0x52e   :  { %v758_v31 = vpop.f32.mrf.mxu1 }
 0x52f   :  { %v642_v29 = vadd.f32 %v636_v22, %v3672_v30  ;;  %v802_v33 = vadd.f32 %v758_v31, %v3421_v17 }
 0x531   :  { %v2928_v12 = vmul.f32 -1.442695, %v642_v29  ;;  %807 = vrot.lane.b32.xlu2 %v802_v33, %s3268_s16  ;;  %v762_v29 = vadd.f32 %v758_v31, %v3687_v28 }
 0x533   :  { %3060 = vpow2.f32 %v2928_v12 }
 0x534   :  { %v606_v38 = vpop.f32.mrf.mxu2 }
 0x535   :  { %v3678_v55 = vadd.f32 %v3591_v57, %v606_v38 }
 0x537   :  { %v643_v59 = vadd.f32 %v639_v26, %v3678_v55 }
 0x539   :  { %v3061_v39 = vpop.eup %3060  ;;  %v2929_v45 = vmul.f32 -1.442695, %v643_v59  ;;  %v2933_v59 = vmul.f32 -1.442695, %v762_v29 }
 0x53a   :  { %v650_v1 = vadd.f32 1.0, %v3061_v39  ;;  %v687_v25 = vpop.permute.xlu2 %686 }
 0x53b   :  { %3062 = vpow2.f32 %v2929_v45  ;;  %v170_v45 = vadd.f32 %v3430_v23, %v3413_v13 }
 0x53c   :  { %3064 = vrcp.f32 %v650_v1  ;;  %v663_v50 = vand.u32 2147483648, %v650_v1  ;;  %v661_v63 = vand.u32 2147483647, %v650_v1  ;;  %vm657_vm12 = vweird.f32 %v650_v1 }
 0x53e   :  { %v664_v11 = vor.u32 1.1754944e-38, %v663_v50  ;;  %vm662_vm14 = vcmp.eq.f32.partialorder %v661_v63, 8.507059e+37 }
 0x541   :  { %v3063_v47 = vpop.eup %3062 }
 0x542   :  { %v3065_v60 = vpop.eup %3064  ;;  %v651_v21 = vadd.f32 1.0, %v3063_v47 }
 0x543   :  { %v653_v49 = vmul.f32 %v3065_v60, %v650_v1  ;;  %vm658_vm11 = vweird.f32 %v3065_v60  ;;  %v761_v1 = vadd.f32 %v755_v5, %v170_v45 }
 0x544   :  { %3066 = vrcp.f32 %v651_v21  ;;  %vm659_vm13 = vmor %vm657_vm12, %vm658_vm11  ;;  %v678_v2 = vand.u32 2147483648, %v651_v21  ;;  %vm672_vm0 = vweird.f32 %v651_v21  ;;  %v676_v26 = vand.u32 2147483647, %v651_v21 }
 0x545   :  { %v654_v10 = vsub.f32 1.0, %v653_v49  ;;  %3068 = vpow2.f32 %v2933_v59  ;;  %v2932_v47 = vmul.f32 -1.442695, %v761_v1 }
 0x546   :  { %v679_v6 = vor.u32 1.1754944e-38, %v678_v2  ;;  %vm677_vm2 = vcmp.eq.f32.partialorder %v676_v26, 8.507059e+37 }
 0x547   :  { %v655_v61 = vmul.f32 %v3065_v60, %v654_v10 }
 0x549   :  { %v656_v43 = vadd.f32 %v3065_v60, %v655_v61 }
 0x54a   :  { %v3067_v0 = vpop.eup %3066 }
 0x54b   :  { %v660_v18 = vsel %vm659_vm13, %v3065_v60, %v656_v43  ;;  %v668_v62 = vmul.f32 %v3067_v0, %v651_v21  ;;  %vm673_vm15 = vweird.f32 %v3067_v0  ;;  %v3069_v39 = vpop.eup %3068 }
 0x54c   :  { %v3681_v20 = vsel %vm662_vm14, %v664_v11, %v660_v18  ;;  %vm674_vm1 = vmor %vm672_vm0, %vm673_vm15  ;;  %v770_v14 = vadd.f32 1.0, %v3069_v39 }
 0x54d   :  { %v692_v27 = vmul.f32 %v687_v25, %v3681_v20  ;;  %v669_v32 = vsub.f32 1.0, %v668_v62 }
 0x54e   :  { %3070 = vrcp.f32 %v770_v14  ;;  %v797_v43 = vand.u32 2147483648, %v770_v14  ;;  %vm791_vm4 = vweird.f32 %v770_v14 }
 0x54f   :  { %696 = vrot.lane.b32.xlu0 %v692_v27, %s3268_s16  ;;  %v670_v58 = vmul.f32 %v3067_v0, %v669_v32  ;;  %3072 = vpow2.f32 %v2932_v47 }
 0x550   :  { %v798_v5 = vor.u32 1.1754944e-38, %v797_v43  ;;  %v718_v43 = vmul.f32 %v3681_v20, %v3627_v48 }
 0x551   :  { %v671_v22 = vadd.f32 %v3067_v0, %v670_v58 }
 0x553   :  { %v675_v3 = vsel %vm674_vm1, %v3067_v0, %v671_v22  ;;  %v795_v0 = vand.u32 2147483647, %v770_v14 }
 0x554   :  { %v3690_v12 = vsel %vm677_vm2, %v679_v6, %v675_v3  ;;  %v3071_v60 = vpop.eup %3070 }
 0x555   :  { %v3073_v31 = vpop.eup %3072  ;;  %v787_v21 = vmul.f32 %v3071_v60, %v770_v14  ;;  %vm792_vm3 = vweird.f32 %v3071_v60  ;;  %vm796_vm6 = vcmp.eq.f32.partialorder %v795_v0, 8.507059e+37 }
 0x556   :  { %v769_v49 = vadd.f32 1.0, %v3073_v31  ;;  %vm793_vm5 = vmor %vm791_vm4, %vm792_vm3 }
 0x557   :  { %v788_v10 = vsub.f32 1.0, %v787_v21 }
 0x558   :  { %3074 = vrcp.f32 %v769_v49  ;;  %v782_v58 = vand.u32 2147483648, %v769_v49  ;;  %vm776_vm8 = vweird.f32 %v769_v49  ;;  %v780_v22 = vand.u32 2147483647, %v769_v49 }
 0x559   :  { %v789_v50 = vmul.f32 %v3071_v60, %v788_v10  ;;  %v707_v10 = vsub.f32 1.0, %v3690_v12 }
 0x55a   :  { %v689_v33 = vpop.permute.xlu0 %688  ;;  %v783_v26 = vor.u32 1.1754944e-38, %v782_v58  ;;  %vm781_vm11 = vcmp.eq.f32.partialorder %v780_v22, 8.507059e+37 }
 0x55b   :  { %v693_v38 = vmul.f32 %v689_v33, %v3690_v12  ;;  %v790_v61 = vadd.f32 %v3071_v60, %v789_v50  ;;  %v719_v50 = vmul.f32 %v3690_v12, %v3633_v56 }
 0x55d   :  { %698 = vrot.lane.b32.xlu1 %v693_v38, %s3268_s16  ;;  %v794_v13 = vsel %vm793_vm5, %v3071_v60, %v790_v61 }
 0x55e   :  { %v3075_v63 = vpop.eup %3074  ;;  %v799_v11 = vsel %vm796_vm6, %v798_v5, %v794_v13 }
 0x55f   :  { %v772_v23 = vmul.f32 %v3075_v63, %v769_v49  ;;  %vm777_vm7 = vweird.f32 %v3075_v63 }
 0x560   :  { %vm778_vm10 = vmor %vm776_vm8, %vm777_vm7 }
 0x561   :  { %v773_v25 = vsub.f32 1.0, %v772_v23 }
 0x563   :  { %v774_v27 = vmul.f32 %v3075_v63, %v773_v25  ;;  %v826_v25 = vsub.f32 1.0, %v799_v11 }
 0x565   :  { %v775_v32 = vadd.f32 %v3075_v63, %v774_v27 }
 0x567   :  { %v779_v2 = vsel %vm778_vm10, %v3075_v63, %v775_v32 }
 0x568   :  { %v784_v6 = vsel %vm781_vm11, %v783_v26, %v779_v2 }
 0x569   :  { %v825_v23 = vsub.f32 1.0, %v784_v6  ;;  %v837_v5 = vmul.f32 %v784_v6, %v3638_v4 }
 0x58b   :  { %v808_v18 = vpop.permute.xlu2 %807 }
 0x58c   :  { %v812_v62 = vmul.f32 %v808_v18, %v799_v11 }
 0x58e   :  { %817 = vrot.lane.b32.xlu0 %v812_v62, %s3268_s16 }
 0x59b   :  { %v806_v3 = vpop.permute.xlu1 %805 }
 0x59c   :  { %v811_v29 = vmul.f32 %v806_v3, %v784_v6 }
 0x59e   :  { %815 = vrot.lane.b32.xlu2 %v811_v29, %s3268_s16 }
 0x5c1   :  { %v697_v33 = vpop.permute.xlu0 %696 }
 0x5c2   :  { %v702_v38 = vadd.f32 %v697_v33, %v3672_v30 }
 0x5c4   :  { %3076 = vtanh.f32 %v702_v38 }
 0x5ca   :  { %v3077_v59 = vpop.eup %3076 }
 0x5cb   :  { %710 = vrot.lane.b32.xlu1 %v3077_v59, %s3270_s21 }
 0x5cf   :  { %v699_v39 = vpop.permute.xlu1 %698 }
 0x5d0   :  { %v703_v1 = vadd.f32 %v699_v39, %v3678_v55 }
 0x5d2   :  { %3078 = vtanh.f32 %v703_v1 }
 0x5d8   :  { %v3079_v14 = vpop.eup %3078 }
 0x5d9   :  { %712 = vrot.lane.b32.xlu2 %v3079_v14, %s3270_s21 }
 0x5f8   :  { %v816_v47 = vpop.permute.xlu2 %815 }
 0x5f9   :  { %v821_v60 = vadd.f32 %v816_v47, %v170_v45 }
 0x5fb   :  { %3080 = vtanh.f32 %v821_v60 }
 0x600   :  { %v818_v31 = vpop.permute.xlu0 %817 }
 0x601   :  { %v3081_v21 = vpop.eup %3080  ;;  %v822_v49 = vadd.f32 %v818_v31, %v3687_v28  ;;  %v706_v28 = vsub.f32 1.0, %v3681_v20  ;;  %v838_v20 = vmul.f32 %v799_v11, %v3643_v24 }
 0x602   :  { %829 = vrot.lane.b32.xlu0 %v3081_v21, %s3270_s21 }
 0x603   :  { %3082 = vtanh.f32 %v822_v49 }
 0x609   :  { %v3083_v30 = vpop.eup %3082 }
 0x60a   :  { %831 = vrot.lane.b32.xlu1 %v3083_v30, %s3270_s21 }
 0x633   :  { %v713_v55 = vpop.permute.xlu2 %712 }
 0x634   :  { %v717_v61 = vmul.f32 %v713_v55, %v707_v10 }
 0x636   :  { %v3708_v63 = vadd.f32 %v719_v50, %v717_v61 }
 0x638   :  { %878 = vrot.lane.b32.xlu0 %v3708_v63, %s3270_s21 }
 0x63d   :  { %v711_v45 = vpop.permute.xlu1 %710 }
 0x63e   :  { %v716_v0 = vmul.f32 %v711_v45, %v706_v28 }
 0x640   :  { %v3715_v13 = vadd.f32 %v718_v43, %v716_v0 }
 0x642   :  { %876 = vrot.lane.b32.xlu2 %v3715_v13, %s3270_s21 }
 0x674   :  { %v830_v12 = vpop.permute.xlu0 %829 }
 0x675   :  { %v835_v18 = vmul.f32 %v830_v12, %v825_v23  ;;  %v3786_v23 = vld [vmem:[%s4612_s4] ss:$0 sm:$0xff] }
 0x676   :  { %v3790_v12 = vadd.f32 %v3786_v23, %v3417_v15 }
 0x677   :  { %v3720_v62 = vadd.f32 %v837_v5, %v835_v18 }
 0x679   :  { %843 = vrot.lane.b32.xlu1 %v3720_v62, %s3270_s21 }
 0x67c   :  { %v832_v27 = vpop.permute.xlu1 %831 }
 0x67d   :  { %v836_v32 = vmul.f32 %v832_v27, %v826_v25 }
 0x67f   :  { %v3725_v58 = vadd.f32 %v838_v20, %v836_v32 }
 0x681   :  { %845 = vrot.lane.b32.xlu2 %v3725_v58, %s3270_s21 }
 0x69c   :  { %v877_v22 = vpop.permute.xlu2 %876 }
 0x69d   :  { %2936 = vmatmul.msk.f32.vlgmr.msrb.gmra.mxu3 %vm205_vm9, %v877_v22 }
 0x69e   :  { %1426 = vmatpush.msrb.mxu3 %v3449_v7  ;;  %v3741_v7 = vld [vmem:[%s4610_s3 + $0x18] sm:$0xff] }
 0x6a0   :  { %1427 = vmatpush.msrb.mxu3 %v3455_v8  ;;  %v3748_v8 = vld [vmem:[%s4610_s3 + $0x10] sm:$0xff] }
 0x6a2   :  { %1428 = vmatpush.msrb.mxu3 %v3460_v9  ;;  %v3755_v9 = vld [vmem:[%s4610_s3 + $0x8] sm:$0xff] }
 0x6a4   :  { %1429 = vmatpush.msrb.mxu3 %v3476_v19 }
 0x6aa   :  { %v879_v4 = vpop.permute.xlu0 %878 }
 0x6ab   :  { %2937 = vmatmul.msk.f32.gmra.mxu3 %vm205_vm9, %v879_v4 }
 0x6db   :  { %v846_v19 = vpop.permute.xlu2 %845 }
 0x6eb   :  { %v844_v24 = vpop.permute.xlu1 %843 }
 0x6ec   :  { %2934 = vmatmul.msk.f32.vlgmr.msrb.gmra.mxu2 %vm205_vm9, %v844_v24  ;;  %2940 = vmatmul.msk.f32.vlgmr.msra.gmra.mxu1 %vm205_vm9, %v844_v24 }
 0x6ed   :  { %1393 = vmatpush.msrb.mxu2 %v3514_v34  ;;  %1545 = vmatpush.msra.mxu1 %v3741_v7  ;;  %v3762_v34 = vld [vmem:[%s4610_s3] sm:$0xff] }
 0x6ef   :  { %1394 = vmatpush.msrb.mxu2 %v3520_v35  ;;  %1546 = vmatpush.msra.mxu1 %v3748_v8 }
 0x6f1   :  { %1395 = vmatpush.msrb.mxu2 %v3530_v36  ;;  %1547 = vmatpush.msra.mxu1 %v3755_v9 }
 0x6f3   :  { %1396 = vmatpush.msrb.mxu2 %v3536_v37  ;;  %1548 = vmatpush.msra.mxu1 %v3762_v34 }
 0x6f4   :  { %2935 = vmatmul.msk.f32.gmra.mxu2 %vm205_vm9, %v846_v19  ;;  %2941 = vmatmul.msk.f32.gmra.mxu1 %vm205_vm9, %v846_v19 }
 0x720   :  { %v901_v35 = vpop.f32.mrf.mxu3 }
 0x721   :  { %v947_v36 = vadd.f32 %v901_v35, %v3572_v46 }
 0x723   :  { %951 = vrot.lane.b32.xlu0 %v947_v36, %s3268_s16 }
 0x72e   :  { %v904_v11 = vpop.f32.mrf.mxu3 }
 0x72f   :  { %v948_v2 = vadd.f32 %v904_v11, %v3572_v46 }
 0x731   :  { %953 = vrot.lane.b32.xlu1 %v948_v2, %s3268_s16 }
 0x769   :  { %v1020_v37 = vpop.f32.mrf.mxu1 }
 0x76a   :  { %v1066_v26 = vadd.f32 %v1020_v37, %v3421_v17  ;;  %v1026_v25 = vadd.f32 %v1020_v37, %v3790_v12 }
 0x76c   :  { %1070 = vrot.lane.b32.xlu2 %v1066_v26, %s3268_s16  ;;  %v2942_v4 = vmul.f32 -1.442695, %v1026_v25 }
 0x76f   :  { %v868_v3 = vpop.f32.mrf.mxu2 }
 0x770   :  { %v3774_v6 = vadd.f32 %v3591_v57, %v868_v3 }
 0x771   :  { %v1023_v29 = vpop.f32.mrf.mxu1 }
 0x772   :  { %v907_v33 = vadd.f32 %v901_v35, %v3774_v6  ;;  %v1067_v38 = vadd.f32 %v1023_v29, %v3421_v17 }
 0x774   :  { %v2938_v59 = vmul.f32 -1.442695, %v907_v33  ;;  %1072 = vrot.lane.b32.xlu0 %v1067_v38, %s3268_s16  ;;  %v179_v38 = vadd.f32 %v3786_v23, %v3419_v16 }
 0x776   :  { %3084 = vpow2.f32 %v2938_v59 }
 0x777   :  { %v871_v39 = vpop.f32.mrf.mxu2 }
 0x778   :  { %v3780_v1 = vadd.f32 %v3591_v57, %v871_v39  ;;  %v1027_v39 = vadd.f32 %v1023_v29, %v179_v38 }
 0x77a   :  { %v908_v14 = vadd.f32 %v904_v11, %v3780_v1 }
 0x77c   :  { %v3085_v47 = vpop.eup %3084  ;;  %v2939_v60 = vmul.f32 -1.442695, %v908_v14 }
 0x77d   :  { %v915_v31 = vadd.f32 1.0, %v3085_v47  ;;  %v2943_v47 = vmul.f32 -1.442695, %v1027_v39 }
 0x77e   :  { %3086 = vpow2.f32 %v2939_v60 }
 0x77f   :  { %3088 = vrcp.f32 %v915_v31  ;;  %v928_v45 = vand.u32 2147483648, %v915_v31  ;;  %vm922_vm13 = vweird.f32 %v915_v31  ;;  %v926_v57 = vand.u32 2147483647, %v915_v31 }
 0x781   :  { %v929_v5 = vor.u32 1.1754944e-38, %v928_v45  ;;  %vm927_vm15 = vcmp.eq.f32.partialorder %v926_v57, 8.507059e+37 }
 0x784   :  { %v3087_v21 = vpop.eup %3086 }
 0x785   :  { %v3089_v49 = vpop.eup %3088  ;;  %v916_v30 = vadd.f32 1.0, %v3087_v21 }
 0x786   :  { %v918_v10 = vmul.f32 %v3089_v49, %v915_v31  ;;  %vm923_vm12 = vweird.f32 %v3089_v49 }
 0x787   :  { %3090 = vrcp.f32 %v916_v30  ;;  %vm924_vm14 = vmor %vm922_vm13, %vm923_vm12  ;;  %v943_v19 = vand.u32 2147483648, %v916_v30  ;;  %vm937_vm1 = vweird.f32 %v916_v30  ;;  %v941_v15 = vand.u32 2147483647, %v916_v30 }
 0x788   :  { %v919_v55 = vsub.f32 1.0, %v918_v10  ;;  %3092 = vpow2.f32 %v2942_v4 }
 0x789   :  { %v944_v36 = vor.u32 1.1754944e-38, %v943_v19  ;;  %vm942_vm3 = vcmp.eq.f32.partialorder %v941_v15, 8.507059e+37 }
 0x78a   :  { %v920_v50 = vmul.f32 %v3089_v49, %v919_v55 }
 0x78c   :  { %v921_v28 = vadd.f32 %v3089_v49, %v920_v50 }
 0x78d   :  { %v3091_v61 = vpop.eup %3090 }
 0x78e   :  { %v933_v43 = vmul.f32 %v3091_v61, %v916_v30  ;;  %v925_v0 = vsel %vm924_vm14, %v3089_v49, %v921_v28  ;;  %vm938_vm0 = vweird.f32 %v3091_v61  ;;  %v3093_v11 = vpop.eup %3092 }
 0x78f   :  { %v3793_v20 = vsel %vm927_vm15, %v929_v5, %v925_v0  ;;  %vm939_vm2 = vmor %vm937_vm1, %vm938_vm0  ;;  %v1034_v3 = vadd.f32 1.0, %v3093_v11 }
 0x790   :  { %v934_v18 = vsub.f32 1.0, %v933_v43  ;;  %v971_v39 = vsub.f32 1.0, %v3793_v20 }
 0x791   :  { %3094 = vrcp.f32 %v1034_v3  ;;  %v1047_v21 = vand.u32 2147483648, %v1034_v3  ;;  %vm1041_vm5 = vweird.f32 %v1034_v3  ;;  %v1045_v49 = vand.u32 2147483647, %v1034_v3 }
 0x792   :  { %v935_v22 = vmul.f32 %v3091_v61, %v934_v18  ;;  %3096 = vpow2.f32 %v2943_v47 }
 0x793   :  { %v1048_v55 = vor.u32 1.1754944e-38, %v1047_v21  ;;  %vm1046_vm7 = vcmp.eq.f32.partialorder %v1045_v49, 8.507059e+37 }
 0x794   :  { %v936_v24 = vadd.f32 %v3091_v61, %v935_v22 }
 0x795   :  { %v952_v27 = vpop.permute.xlu0 %951 }
 0x796   :  { %v957_v32 = vmul.f32 %v952_v27, %v3793_v20  ;;  %v940_v35 = vsel %vm939_vm2, %v3091_v61, %v936_v24 }
 0x797   :  { %v3797_v37 = vsel %vm942_vm3, %v944_v36, %v940_v35  ;;  %v3095_v33 = vpop.eup %3094 }
 0x798   :  { %961 = vrot.lane.b32.xlu1 %v957_v32, %s3268_s16  ;;  %v1037_v59 = vmul.f32 %v3095_v33, %v1034_v3  ;;  %vm1042_vm4 = vweird.f32 %v3095_v33  ;;  %v3097_v30 = vpop.eup %3096 }
 0x799   :  { %vm1043_vm6 = vmor %vm1041_vm5, %vm1042_vm4  ;;  %v1035_v50 = vadd.f32 1.0, %v3097_v30 }
 0x79a   :  { %v1038_v14 = vsub.f32 1.0, %v1037_v59 }
 0x79b   :  { %3098 = vrcp.f32 %v1035_v50  ;;  %v1062_v5 = vand.u32 2147483648, %v1035_v50  ;;  %vm1056_vm10 = vweird.f32 %v1035_v50  ;;  %v1060_v18 = vand.u32 2147483647, %v1035_v50 }
 0x79c   :  { %v1039_v60 = vmul.f32 %v3095_v33, %v1038_v14  ;;  %v983_v14 = vmul.f32 %v3793_v20, %v3715_v13 }
 0x79d   :  { %v1063_v27 = vor.u32 1.1754944e-38, %v1062_v5  ;;  %vm1061_vm12 = vcmp.eq.f32.partialorder %v1060_v18, 8.507059e+37  ;;  %v3867_v18 = vld [vmem:[%s4615_s6 + $0x18] sm:$0xff] }
 0x79e   :  { %v1040_v31 = vadd.f32 %v3095_v33, %v1039_v60 }
 0x7a0   :  { %v1044_v10 = vsel %vm1043_vm6, %v3095_v33, %v1040_v31 }
 0x7a1   :  { %v1049_v61 = vsel %vm1046_vm7, %v1048_v55, %v1044_v10  ;;  %v3099_v29 = vpop.eup %3098 }
 0x7a2   :  { %v1052_v45 = vmul.f32 %v3099_v29, %v1035_v50  ;;  %vm1057_vm8 = vweird.f32 %v3099_v29  ;;  %v1090_v30 = vsub.f32 1.0, %v1049_v61  ;;  %v1102_v10 = vmul.f32 %v1049_v61, %v3720_v62  ;;  %v3840_v62 = vld [vmem:[%s4614_s7 + $0x18] sm:$0xff] }
 0x7a3   :  { %v954_v2 = vpop.permute.xlu1 %953  ;;  %vm1058_vm11 = vmor %vm1056_vm10, %vm1057_vm8 }
 0x7a4   :  { %v958_v26 = vmul.f32 %v954_v2, %v3797_v37  ;;  %v1053_v57 = vsub.f32 1.0, %v1052_v45 }
 0x7a6   :  { %963 = vrot.lane.b32.xlu2 %v958_v26, %s3268_s16  ;;  %v1054_v43 = vmul.f32 %v3099_v29, %v1053_v57 }
 0x7a8   :  { %v1055_v0 = vadd.f32 %v3099_v29, %v1054_v43  ;;  %v3858_v43 = vld [vmem:[%s4614_s7] sm:$0xff] }
 0x7aa   :  { %v1059_v25 = vsel %vm1058_vm11, %v3099_v29, %v1055_v0 }
 0x7ab   :  { %v1064_v22 = vsel %vm1061_vm12, %v1063_v27, %v1059_v25  ;;  %v3874_v25 = vld [vmem:[%s4615_s6 + $0x10] sm:$0xff]  ;;  %v3881_v27 = vld [vmem:[%s4615_s6 + $0x8] sm:$0xff] }
 0x7c6   :  { %v1071_v28 = vpop.permute.xlu2 %1070 }
 0x7c7   :  { %v1076_v16 = vmul.f32 %v1071_v28, %v1049_v61  ;;  %v1091_v28 = vsub.f32 1.0, %v1064_v22  ;;  %v3852_v61 = vld [vmem:[%s4614_s7 + $0x8] sm:$0xff] }
 0x7c9   :  { %1080 = vrot.lane.b32.xlu0 %v1076_v16, %s3268_s16 }
 0x7e6   :  { %v1073_v32 = vpop.permute.xlu0 %1072 }
 0x7e7   :  { %v1077_v4 = vmul.f32 %v1073_v32, %v1064_v22  ;;  %v3888_v32 = vld [vmem:[%s4615_s6] sm:$0xff] }
 0x7e9   :  { %1082 = vrot.lane.b32.xlu1 %v1077_v4, %s3268_s16 }
 0x800   :  { %v964_v24 = vpop.permute.xlu2 %963 }
 0x801   :  { %v968_v19 = vadd.f32 %v964_v24, %v3780_v1 }
 0x803   :  { %3100 = vtanh.f32 %v968_v19 }
 0x809   :  { %v3101_v15 = vpop.eup %3100 }
 0x80a   :  { %v962_v35 = vpop.permute.xlu1 %961  ;;  %977 = vrot.lane.b32.xlu0 %v3101_v15, %s3270_s21 }
 0x80b   :  { %v967_v36 = vadd.f32 %v962_v35, %v3774_v6 }
 0x80d   :  { %3102 = vtanh.f32 %v967_v36 }
 0x813   :  { %v3103_v11 = vpop.eup %3102 }
 0x814   :  { %975 = vrot.lane.b32.xlu2 %v3103_v11, %s3270_s21 }
 0x83b   :  { %v1081_v2 = vpop.permute.xlu0 %1080 }
 0x83c   :  { %v1086_v26 = vadd.f32 %v1081_v2, %v3790_v12  ;;  %v972_v12 = vsub.f32 1.0, %v3797_v37  ;;  %v3903_v2 = vld [vmem:[%s4616_s8] ss:$0 sm:$0xff] }
 0x83e   :  { %3104 = vtanh.f32 %v1086_v26 }
 0x844   :  { %v3105_v3 = vpop.eup %3104 }
 0x845   :  { %1094 = vrot.lane.b32.xlu1 %v3105_v3, %s3270_s21 }
 0x85b   :  { %v1083_v33 = vpop.permute.xlu1 %1082 }
 0x85c   :  { %v1087_v1 = vadd.f32 %v1083_v33, %v179_v38  ;;  %v984_v38 = vmul.f32 %v3797_v37, %v3708_v63  ;;  %v1103_v37 = vmul.f32 %v1064_v22, %v3725_v58  ;;  %v3846_v58 = vld [vmem:[%s4614_s7 + $0x10] sm:$0xff] }
 0x85e   :  { %3106 = vtanh.f32 %v1087_v1 }
 0x864   :  { %v3107_v59 = vpop.eup %3106 }
 0x865   :  { %1096 = vrot.lane.b32.xlu2 %v3107_v59, %s3270_s21 }
 0x86e   :  { %v976_v6 = vpop.permute.xlu2 %975 }
 0x86f   :  { %v981_v47 = vmul.f32 %v976_v6, %v971_v39 }
 0x871   :  { %v3815_v60 = vadd.f32 %v983_v14, %v981_v47 }
 0x873   :  { %1141 = vrot.lane.b32.xlu0 %v3815_v60, %s3270_s21 }
 0x87c   :  { %v978_v31 = vpop.permute.xlu0 %977 }
 0x87d   :  { %v982_v21 = vmul.f32 %v978_v31, %v972_v12 }
 0x87f   :  { %v3822_v49 = vadd.f32 %v984_v38, %v982_v21 }
 0x881   :  { %1143 = vrot.lane.b32.xlu1 %v3822_v49, %s3270_s21 }
 0x8b7   :  { %v1095_v20 = vpop.permute.xlu1 %1094 }
 0x8b8   :  { %v1100_v55 = vmul.f32 %v1095_v20, %v1090_v30 }
 0x8ba   :  { %v3827_v50 = vadd.f32 %v1102_v10, %v1100_v55 }
 0x8bc   :  { %1108 = vrot.lane.b32.xlu2 %v3827_v50, %s3270_s21 }
 0x8bf   :  { %v1097_v16 = vpop.permute.xlu2 %1096 }
 0x8c0   :  { %v1101_v29 = vmul.f32 %v1097_v16, %v1091_v28 }
 0x8c2   :  { %v3832_v45 = vadd.f32 %v1103_v37, %v1101_v29 }
 0x8c4   :  { %1110 = vrot.lane.b32.xlu0 %v3832_v45, %s3270_s21 }
 0x8e5   :  { %v1142_v57 = vpop.permute.xlu0 %1141 }
 0x8e6   :  { %2946 = vmatmul.msk.f32.vlgmr.msra.gmra.mxu3 %vm205_vm9, %v1142_v57 }
 0x8e7   :  { %1691 = vmatpush.msra.mxu3 %v3840_v62 }
 0x8e9   :  { %1692 = vmatpush.msra.mxu3 %v3846_v58 }
 0x8eb   :  { %1693 = vmatpush.msra.mxu3 %v3852_v61 }
 0x8ed   :  { %1694 = vmatpush.msra.mxu3 %v3858_v43 }
 0x8f3   :  { %v1144_v0 = vpop.permute.xlu1 %1143 }
 0x8f4   :  { %2947 = vmatmul.msk.f32.gmra.mxu3 %vm205_vm9, %v1144_v0 }
 0x916   :  { %v1109_v5 = vpop.permute.xlu2 %1108 }
 0x917   :  { %2944 = vmatmul.msk.f32.vlgmr.msra.gmra.mxu2 %vm205_vm9, %v1109_v5  ;;  %2950 = vmatmul.msk.f32.vlgmr.msrb.gmra.mxu1 %vm205_vm9, %v1109_v5  ;;  %v3917_v5 = vadd.f32 %v3786_v23, %v3578_v51 }
 0x918   :  { %1658 = vmatpush.msra.mxu2 %v3867_v18  ;;  %1810 = vmatpush.msrb.mxu1 %v3741_v7 }
 0x91a   :  { %1659 = vmatpush.msra.mxu2 %v3874_v25  ;;  %1811 = vmatpush.msrb.mxu1 %v3748_v8 }
 0x91c   :  { %1660 = vmatpush.msra.mxu2 %v3881_v27  ;;  %1812 = vmatpush.msrb.mxu1 %v3755_v9 }
 0x91e   :  { %1661 = vmatpush.msra.mxu2 %v3888_v32  ;;  %1813 = vmatpush.msrb.mxu1 %v3762_v34 }
 0x936   :  { %v1111_v22 = vpop.permute.xlu0 %1110 }
 0x937   :  { %2945 = vmatmul.msk.f32.gmra.mxu2 %vm205_vm9, %v1111_v22  ;;  %2951 = vmatmul.msk.f32.gmra.mxu1 %vm205_vm9, %v1111_v22 }
 0x969   :  { %v1166_v4 = vpop.f32.mrf.mxu3 }
 0x96a   :  { %v1212_v24 = vadd.f32 %v1166_v4, %v3572_v46 }
 0x96c   :  { %1216 = vrot.lane.b32.xlu1 %v1212_v24, %s3268_s16 }
 0x977   :  { %v1169_v19 = vpop.f32.mrf.mxu3 }
 0x978   :  { %v1213_v15 = vadd.f32 %v1169_v19, %v3572_v46 }
 0x97a   :  { %1218 = vrot.lane.b32.xlu2 %v1213_v15, %s3268_s16 }
 0x994   :  { %v1285_v35 = vpop.f32.mrf.mxu1 }
 0x995   :  { %v1331_v36 = vadd.f32 %v1285_v35, %v3421_v17  ;;  %v1291_v24 = vadd.f32 %v1285_v35, %v3917_v5 }
 0x997   :  { %1335 = vrot.lane.b32.xlu0 %v1331_v36, %s3268_s16 }
 0x99a   :  { %v1133_v11 = vpop.f32.mrf.mxu2 }
 0x99b   :  { %v3906_v26 = vadd.f32 %v3903_v2, %v1133_v11 }
 0x99d   :  { %v1172_v3 = vadd.f32 %v1166_v4, %v3906_v26 }
 0x99f   :  { %v2948_v33 = vmul.f32 -1.442695, %v1172_v3 }
 0x9a1   :  { %3108 = vpow2.f32 %v2948_v33 }
 0x9a7   :  { %v3109_v6 = vpop.eup %3108 }
 0x9a8   :  { %v1180_v12 = vadd.f32 1.0, %v3109_v6 }
 0x9aa   :  { %v1193_v15 = vand.u32 2147483648, %v1180_v12  ;;  %vm1187_vm2 = vweird.f32 %v1180_v12  ;;  %v1191_v11 = vand.u32 2147483647, %v1180_v12 }
 0x9ac   :  { %v1194_v6 = vor.u32 1.1754944e-38, %v1193_v15  ;;  %vm1192_vm4 = vcmp.eq.f32.partialorder %v1191_v11, 8.507059e+37 }
 0x9b4   :  { %v1288_v1 = vpop.f32.mrf.mxu1 }
 0x9b5   :  { %v1332_v59 = vadd.f32 %v1288_v1, %v3421_v17 }
 0x9b7   :  { %1337 = vrot.lane.b32.xlu1 %v1332_v59, %s3268_s16 }
 0x9ba   :  { %v1136_v39 = vpop.f32.mrf.mxu2 }
 0x9bb   :  { %v3912_v14 = vadd.f32 %v3903_v2, %v1136_v39  ;;  %v2952_v39 = vmul.f32 -1.442695, %v1291_v24 }
 0x9bd   :  { %v1173_v47 = vadd.f32 %v1169_v19, %v3912_v14 }
 0x9bf   :  { %v2949_v31 = vmul.f32 -1.442695, %v1173_v47 }
 0x9c1   :  { %3110 = vpow2.f32 %v2949_v31 }
 0x9c2   :  { %3112 = vrcp.f32 %v1180_v12 }
 0x9c7   :  { %v3111_v38 = vpop.eup %3110 }
 0x9c8   :  { %v3113_v21 = vpop.eup %3112  ;;  %v1181_v30 = vadd.f32 1.0, %v3111_v38 }
 0x9c9   :  { %v1183_v20 = vmul.f32 %v3113_v21, %v1180_v12  ;;  %vm1188_vm15 = vweird.f32 %v3113_v21 }
 0x9ca   :  { %3114 = vrcp.f32 %v1181_v30  ;;  %v1208_v29 = vand.u32 2147483648, %v1181_v30  ;;  %v1206_v0 = vand.u32 2147483647, %v1181_v30  ;;  %vm1202_vm14 = vweird.f32 %v1181_v30  ;;  %vm1189_vm3 = vmor %vm1187_vm2, %vm1188_vm15 }
 0x9cb   :  { %v1184_v10 = vsub.f32 1.0, %v1183_v20  ;;  %3116 = vpow2.f32 %v2952_v39 }
 0x9cc   :  { %v1209_v19 = vor.u32 1.1754944e-38, %v1208_v29  ;;  %vm1207_vm1 = vcmp.eq.f32.partialorder %v1206_v0, 8.507059e+37 }
 0x9cd   :  { %v1185_v37 = vmul.f32 %v3113_v21, %v1184_v10 }
 0x9cf   :  { %v1186_v4 = vadd.f32 %v3113_v21, %v1185_v37 }
 0x9d0   :  { %v3115_v55 = vpop.eup %3114 }
 0x9d1   :  { %v1198_v28 = vmul.f32 %v3115_v55, %v1181_v30  ;;  %vm1203_vm13 = vweird.f32 %v3115_v55  ;;  %v1190_v59 = vsel %vm1189_vm3, %v3113_v21, %v1186_v4  ;;  %v3117_v12 = vpop.eup %3116  ;;  %v185_v21 = vadd.f32 %v3786_v23, %v3580_v52 }
 0x9d2   :  { %vm1204_vm0 = vmor %vm1202_vm14, %vm1203_vm13  ;;  %v3924_v47 = vsel %vm1192_vm4, %v1194_v6, %v1190_v59  ;;  %v1299_v38 = vadd.f32 1.0, %v3117_v12 }
 0x9d3   :  { %v1199_v16 = vsub.f32 1.0, %v1198_v28  ;;  %v1292_v10 = vadd.f32 %v1288_v1, %v185_v21 }
 0x9d4   :  { %v1219_v33 = vpop.permute.xlu2 %1218  ;;  %3118 = vrcp.f32 %v1299_v38  ;;  %v1312_v29 = vand.u32 2147483648, %v1299_v38  ;;  %vm1306_vm6 = vweird.f32 %v1299_v38 }
 0x9d5   :  { %v1200_v57 = vmul.f32 %v3115_v55, %v1199_v16  ;;  %v2953_v28 = vmul.f32 -1.442695, %v1292_v10 }
 0x9d6   :  { %v1313_v4 = vor.u32 1.1754944e-38, %v1312_v29 }
 0x9d7   :  { %v1201_v22 = vadd.f32 %v3115_v55, %v1200_v57  ;;  %3120 = vpow2.f32 %v2953_v28  ;;  %v1310_v57 = vand.u32 2147483647, %v1299_v38 }
 0x9d9   :  { %v1205_v36 = vsel %vm1204_vm0, %v3115_v55, %v1201_v22  ;;  %vm1311_vm8 = vcmp.eq.f32.partialorder %v1310_v57, 8.507059e+37 }
 0x9da   :  { %v3920_v3 = vsel %vm1207_vm1, %v1209_v19, %v1205_v36  ;;  %v3119_v30 = vpop.eup %3118 }
 0x9db   :  { %v1223_v51 = vmul.f32 %v1219_v33, %v3920_v3  ;;  %v1302_v20 = vmul.f32 %v3119_v30, %v1299_v38  ;;  %vm1307_vm5 = vweird.f32 %v3119_v30 }
 0x9dc   :  { %vm1308_vm7 = vmor %vm1306_vm6, %vm1307_vm5 }
 0x9dd   :  { %1228 = vrot.lane.b32.xlu0 %v1223_v51, %s3268_s16  ;;  %v1303_v55 = vsub.f32 1.0, %v1302_v20  ;;  %v3121_v0 = vpop.eup %3120 }
 0x9de   :  { %v1217_v35 = vpop.permute.xlu1 %1216  ;;  %v1300_v24 = vadd.f32 1.0, %v3121_v0 }
 0x9df   :  { %v1222_v31 = vmul.f32 %v1217_v35, %v3924_v47  ;;  %v1304_v16 = vmul.f32 %v3119_v30, %v1303_v55 }
 0x9e0   :  { %3122 = vrcp.f32 %v1300_v24  ;;  %v1327_v59 = vand.u32 2147483648, %v1300_v24  ;;  %vm1321_vm11 = vweird.f32 %v1300_v24  ;;  %v1325_v39 = vand.u32 2147483647, %v1300_v24 }
 0x9e1   :  { %1226 = vrot.lane.b32.xlu2 %v1222_v31, %s3268_s16  ;;  %v1305_v37 = vadd.f32 %v3119_v30, %v1304_v16 }
 0x9e2   :  { %v1328_v35 = vor.u32 1.1754944e-38, %v1327_v59  ;;  %vm1326_vm13 = vcmp.eq.f32.partialorder %v1325_v39, 8.507059e+37 }
 0x9e3   :  { %v1309_v22 = vsel %vm1308_vm7, %v3119_v30, %v1305_v37 }
 0x9e4   :  { %v1314_v15 = vsel %vm1311_vm8, %v1313_v4, %v1309_v22  ;;  %v1236_v4 = vsub.f32 1.0, %v3924_v47 }
 0x9e6   :  { %v3123_v1 = vpop.eup %3122 }
 0x9e7   :  { %v1317_v36 = vmul.f32 %v3123_v1, %v1300_v24  ;;  %vm1322_vm10 = vweird.f32 %v3123_v1  ;;  %v1248_v24 = vmul.f32 %v3924_v47, %v3815_v60 }
 0x9e8   :  { %vm1323_vm12 = vmor %vm1321_vm11, %vm1322_vm10 }
 0x9e9   :  { %v1318_v11 = vsub.f32 1.0, %v1317_v36 }
 0x9eb   :  { %v1319_v33 = vmul.f32 %v3123_v1, %v1318_v11 }
 0x9ed   :  { %v1320_v51 = vadd.f32 %v3123_v1, %v1319_v33  ;;  %v1355_v33 = vsub.f32 1.0, %v1314_v15 }
 0x9ef   :  { %v1324_v6 = vsel %vm1323_vm12, %v3123_v1, %v1320_v51  ;;  %v1249_v1 = vmul.f32 %v3920_v3, %v3822_v49  ;;  %v1367_v51 = vmul.f32 %v1314_v15, %v3827_v50 }
 0x9f0   :  { %v1329_v12 = vsel %vm1326_vm13, %v1328_v35, %v1324_v6 }
 0x9f1   :  { %v1356_v6 = vsub.f32 1.0, %v1329_v12 }
 0xa09   :  { %v1336_v19 = vpop.permute.xlu0 %1335 }
 0xa0a   :  { %v1341_v52 = vmul.f32 %v1336_v19, %v1314_v15 }
 0xa0c   :  { %1345 = vrot.lane.b32.xlu1 %v1341_v52, %s3268_s16 }
 0xa29   :  { %v1338_v31 = vpop.permute.xlu1 %1337 }
 0xa2a   :  { %v1342_v38 = vmul.f32 %v1338_v31, %v1329_v12 }
 0xa2c   :  { %1347 = vrot.lane.b32.xlu2 %v1342_v38, %s3268_s16 }
 0xa3b   :  { %v1227_v30 = vpop.permute.xlu2 %1226 }
 0xa3c   :  { %v1232_v20 = vadd.f32 %v1227_v30, %v3906_v26 }
 0xa3e   :  { %3124 = vtanh.f32 %v1232_v20 }
 0xa44   :  { %v3125_v10 = vpop.eup %3124 }
 0xa45   :  { %1240 = vrot.lane.b32.xlu0 %v3125_v10, %s3270_s21 }
 0xa4f   :  { %v1229_v55 = vpop.permute.xlu0 %1228 }
 0xa50   :  { %v1233_v28 = vadd.f32 %v1229_v55, %v3912_v14 }
 0xa52   :  { %3126 = vtanh.f32 %v1233_v28 }
 0xa58   :  { %v3127_v16 = vpop.eup %3126 }
 0xa59   :  { %1242 = vrot.lane.b32.xlu1 %v3127_v16, %s3270_s21 }
 0xa7e   :  { %v1346_v37 = vpop.permute.xlu1 %1345 }
 0xa7f   :  { %v1351_v29 = vadd.f32 %v1346_v37, %v3917_v5  ;;  %v1237_v5 = vsub.f32 1.0, %v3920_v3  ;;  %v1368_v3 = vmul.f32 %v1329_v12, %v3832_v45 }
 0xa81   :  { %3128 = vtanh.f32 %v1351_v29 }
 0xa86   :  { %v1348_v57 = vpop.permute.xlu2 %1347 }
 0xa87   :  { %v3129_v0 = vpop.eup %3128  ;;  %v1352_v22 = vadd.f32 %v1348_v57, %v185_v21 }
 0xa88   :  { %1359 = vrot.lane.b32.xlu2 %v3129_v0, %s3270_s21 }
 0xa89   :  { %3130 = vtanh.f32 %v1352_v22 }
 0xa8f   :  { %v3131_v26 = vpop.eup %3130 }
 0xa90   :  { %1361 = vrot.lane.b32.xlu0 %v3131_v26, %s3270_s21 }
 0xab7   :  { %v1241_v14 = vpop.permute.xlu0 %1240 }
 0xab8   :  { %v1246_v19 = vmul.f32 %v1241_v14, %v1236_v4 }
 0xaba   :  { %v3942_v52 = vadd.f32 %v1248_v24, %v1246_v19 }
 0xabc   :  { %1406 = vrot.lane.b32.xlu1 %v3942_v52, %s3270_s21 }
 0xacb   :  { %v1243_v21 = vpop.permute.xlu1 %1242 }
 0xacc   :  { %v1247_v36 = vmul.f32 %v1243_v21, %v1237_v5 }
 0xace   :  { %v3949_v11 = vadd.f32 %v1249_v1, %v1247_v36 }
 0xad0   :  { %1408 = vrot.lane.b32.xlu2 %v3949_v11, %s3270_s21 }
 0xae2   :  { %v1360_v47 = vpop.permute.xlu2 %1359 }
 0xae3   :  { %v1365_v59 = vmul.f32 %v1360_v47, %v1355_v33 }
 0xae5   :  { %v3954_v39 = vadd.f32 %v1367_v51, %v1365_v59 }
 0xae7   :  { %1373 = vrot.lane.b32.xlu0 %v3954_v39, %s3270_s21 }
 0xb02   :  { %v1362_v35 = vpop.permute.xlu0 %1361 }
 0xb03   :  { %v1366_v31 = vmul.f32 %v1362_v35, %v1356_v6 }
 0xb05   :  { %v3959_v38 = vadd.f32 %v1368_v3, %v1366_v31 }
 0xb07   :  { %1375 = vrot.lane.b32.xlu1 %v3959_v38, %s3270_s21 }
 0xb2a   :  { %v1409_v50 = vpop.permute.xlu2 %1408 }
 0xb2e   :  { %v1407_v30 = vpop.permute.xlu1 %1406 }
 0xb2f   :  { %2956 = vmatmul.msk.f32.vlgmr.msrb.gmra.mxu3 %vm205_vm9, %v1407_v30 }
 0xb30   :  { %1956 = vmatpush.msrb.mxu3 %v3840_v62 }
 0xb32   :  { %1957 = vmatpush.msrb.mxu3 %v3846_v58 }
 0xb34   :  { %1958 = vmatpush.msrb.mxu3 %v3852_v61 }
 0xb36   :  { %1959 = vmatpush.msrb.mxu3 %v3858_v43 }
 0xb37   :  { %2957 = vmatmul.msk.f32.gmra.mxu3 %vm205_vm9, %v1409_v50  ;;  %v4003_v50 = vadd.f32 %v3786_v23, %v3582_v53 }
 0xb59   :  { %v1374_v45 = vpop.permute.xlu0 %1373 }
 0xb5a   :  { %2954 = vmatmul.msk.f32.vlgmr.msrb.gmra.mxu2 %vm205_vm9, %v1374_v45  ;;  %2960 = vmatmul.msk.f32.vlgmr.msra.gmra.mxu1 %vm205_vm9, %v1374_v45 }
 0xb5b   :  { %1923 = vmatpush.msrb.mxu2 %v3867_v18  ;;  %2075 = vmatpush.msra.mxu1 %v3741_v7 }
 0xb5d   :  { %1924 = vmatpush.msrb.mxu2 %v3874_v25  ;;  %2076 = vmatpush.msra.mxu1 %v3748_v8 }
 0xb5f   :  { %1925 = vmatpush.msrb.mxu2 %v3881_v27  ;;  %2077 = vmatpush.msra.mxu1 %v3755_v9 }
 0xb61   :  { %1926 = vmatpush.msrb.mxu2 %v3888_v32  ;;  %2078 = vmatpush.msra.mxu1 %v3762_v34 }
 0xb79   :  { %v1376_v15 = vpop.permute.xlu1 %1375 }
 0xb7a   :  { %2955 = vmatmul.msk.f32.gmra.mxu2 %vm205_vm9, %v1376_v15  ;;  %2961 = vmatmul.msk.f32.gmra.mxu1 %vm205_vm9, %v1376_v15 }
 0xbb2   :  { %v1431_v12 = vpop.f32.mrf.mxu3 }
 0xbb3   :  { %v1477_v7 = vadd.f32 %v1431_v12, %v3572_v46 }
 0xbb5   :  { %1481 = vrot.lane.b32.xlu2 %v1477_v7, %s3268_s16 }
 0xbba   :  { %v1434_v20 = vpop.f32.mrf.mxu3 }
 0xbbb   :  { %v1478_v8 = vadd.f32 %v1434_v20, %v3572_v46 }
 0xbbd   :  { %1483 = vrot.lane.b32.xlu0 %v1478_v8, %s3268_s16 }
 0xbd7   :  { %v1550_v9 = vpop.f32.mrf.mxu1 }
 0xbd8   :  { %v1596_v10 = vadd.f32 %v1550_v9, %v3421_v17  ;;  %v1556_v45 = vadd.f32 %v1550_v9, %v4003_v50 }
 0xbda   :  { %1600 = vrot.lane.b32.xlu1 %v1596_v10, %s3268_s16 }
 0xbdd   :  { %v1398_v34 = vpop.f32.mrf.mxu2 }
 0xbde   :  { %v3988_v55 = vadd.f32 %v3903_v2, %v1398_v34 }
 0xbe0   :  { %v1437_v28 = vadd.f32 %v1431_v12, %v3988_v55  ;;  %v2962_v12 = vmul.f32 -1.442695, %v1556_v45 }
 0xbe2   :  { %v2958_v16 = vmul.f32 -1.442695, %v1437_v28 }
 0xbe4   :  { %3132 = vpow2.f32 %v2958_v16 }
 0xbea   :  { %v3133_v37 = vpop.eup %3132 }
 0xbeb   :  { %v1445_v29 = vadd.f32 1.0, %v3133_v37 }
 0xbed   :  { %3134 = vrcp.f32 %v1445_v29  ;;  %v1458_v36 = vand.u32 2147483648, %v1445_v29  ;;  %vm1452_vm15 = vweird.f32 %v1445_v29  ;;  %v1456_v33 = vand.u32 2147483647, %v1445_v29 }
 0xbef   :  { %v1459_v59 = vor.u32 1.1754944e-38, %v1458_v36  ;;  %vm1457_vm1 = vcmp.eq.f32.partialorder %v1456_v33, 8.507059e+37 }
 0xbf3   :  { %v3135_v22 = vpop.eup %3134 }
 0xbf4   :  { %v1448_v26 = vmul.f32 %v3135_v22, %v1445_v29  ;;  %vm1453_vm14 = vweird.f32 %v3135_v22 }
 0xbf5   :  { %vm1454_vm0 = vmor %vm1452_vm15, %vm1453_vm14 }
 0xbf6   :  { %v1449_v19 = vsub.f32 1.0, %v1448_v26 }
 0xbf7   :  { %v1553_v57 = vpop.f32.mrf.mxu1 }
 0xbf8   :  { %v1597_v0 = vadd.f32 %v1553_v57, %v3421_v17  ;;  %v1450_v21 = vmul.f32 %v3135_v22, %v1449_v19 }
 0xbfa   :  { %1602 = vrot.lane.b32.xlu2 %v1597_v0, %s3268_s16  ;;  %v1451_v1 = vadd.f32 %v3135_v22, %v1450_v21 }
 0xbfc   :  { %v1455_v51 = vsel %vm1454_vm0, %v3135_v22, %v1451_v1 }
 0xbfd   :  { %v1401_v4 = vpop.f32.mrf.mxu2  ;;  %v3997_v35 = vsel %vm1457_vm1, %v1459_v59, %v1455_v51 }
 0xbfe   :  { %v3994_v14 = vadd.f32 %v3903_v2, %v1401_v4 }
 0xc00   :  { %v1438_v24 = vadd.f32 %v1434_v20, %v3994_v14  ;;  %v4008_v20 = vadd.f32 %v3786_v23, %v3584_v54 }
 0xc02   :  { %v2959_v5 = vmul.f32 -1.442695, %v1438_v24  ;;  %v1557_v8 = vadd.f32 %v1553_v57, %v4008_v20 }
 0xc04   :  { %3136 = vpow2.f32 %v2959_v5  ;;  %v2963_v34 = vmul.f32 -1.442695, %v1557_v8 }
 0xc0a   :  { %v3137_v47 = vpop.eup %3136 }
 0xc0b   :  { %v1446_v6 = vadd.f32 1.0, %v3137_v47 }
 0xc0d   :  { %3138 = vrcp.f32 %v1446_v6  ;;  %v1473_v37 = vand.u32 2147483648, %v1446_v6  ;;  %vm1467_vm3 = vweird.f32 %v1446_v6  ;;  %v1471_v53 = vand.u32 2147483647, %v1446_v6 }
 0xc0e   :  { %3140 = vpow2.f32 %v2962_v12 }
 0xc0f   :  { %v1482_v3 = vpop.permute.xlu2 %1481  ;;  %3142 = vpow2.f32 %v2963_v34  ;;  %v1474_v0 = vor.u32 1.1754944e-38, %v1473_v37  ;;  %vm1472_vm5 = vcmp.eq.f32.partialorder %v1471_v53, 8.507059e+37 }
 0xc10   :  { %v1487_v31 = vmul.f32 %v1482_v3, %v3997_v35 }
 0xc12   :  { %1491 = vrot.lane.b32.xlu0 %v1487_v31, %s3268_s16 }
 0xc13   :  { %v3139_v30 = vpop.eup %3138 }
 0xc14   :  { %v1463_v15 = vmul.f32 %v3139_v30, %v1446_v6  ;;  %vm1468_vm2 = vweird.f32 %v3139_v30  ;;  %v3141_v16 = vpop.eup %3140 }
 0xc15   :  { %vm1469_vm4 = vmor %vm1467_vm3, %vm1468_vm2  ;;  %v1564_v9 = vadd.f32 1.0, %v3141_v16  ;;  %v3143_v26 = vpop.eup %3142 }
 0xc16   :  { %v1464_v7 = vsub.f32 1.0, %v1463_v15  ;;  %v1565_v4 = vadd.f32 1.0, %v3143_v26 }
 0xc17   :  { %3144 = vrcp.f32 %v1564_v9  ;;  %v1577_v51 = vand.u32 2147483648, %v1564_v9  ;;  %vm1571_vm7 = vweird.f32 %v1564_v9  ;;  %v1575_v59 = vand.u32 2147483647, %v1564_v9 }
 0xc18   :  { %v1465_v10 = vmul.f32 %v3139_v30, %v1464_v7  ;;  %3146 = vrcp.f32 %v1565_v4  ;;  %v1592_v7 = vand.u32 2147483648, %v1565_v4  ;;  %vm1586_vm12 = vweird.f32 %v1565_v4 }
 0xc19   :  { %v1578_v31 = vor.u32 1.1754944e-38, %v1577_v51  ;;  %vm1576_vm10 = vcmp.eq.f32.partialorder %v1575_v59, 8.507059e+37  ;;  %v1590_v8 = vand.u32 2147483647, %v1565_v4 }
 0xc1a   :  { %v1466_v28 = vadd.f32 %v3139_v30, %v1465_v10  ;;  %v1593_v34 = vor.u32 1.1754944e-38, %v1592_v7 }
 0xc1b   :  { %vm1591_vm14 = vcmp.eq.f32.partialorder %v1590_v8, 8.507059e+37 }
 0xc1c   :  { %v1470_v29 = vsel %vm1469_vm4, %v3139_v30, %v1466_v28 }
 0xc1d   :  { %v4011_v54 = vsel %vm1472_vm5, %v1474_v0, %v1470_v29  ;;  %v3145_v24 = vpop.eup %3144 }
 0xc1e   :  { %v1567_v19 = vmul.f32 %v3145_v24, %v1564_v9  ;;  %v3147_v21 = vpop.eup %3146  ;;  %vm1572_vm6 = vweird.f32 %v3145_v24 }
 0xc1f   :  { %v1582_v36 = vmul.f32 %v3147_v21, %v1565_v4  ;;  %vm1573_vm8 = vmor %vm1571_vm7, %vm1572_vm6  ;;  %vm1587_vm11 = vweird.f32 %v3147_v21 }
 0xc20   :  { %v1568_v5 = vsub.f32 1.0, %v1567_v19  ;;  %vm1588_vm13 = vmor %vm1586_vm12, %vm1587_vm11 }
 0xc21   :  { %v1583_v47 = vsub.f32 1.0, %v1582_v36 }
 0xc22   :  { %v1569_v1 = vmul.f32 %v3145_v24, %v1568_v5 }
 0xc23   :  { %v1584_v3 = vmul.f32 %v3147_v21, %v1583_v47 }
 0xc24   :  { %v1570_v33 = vadd.f32 %v3145_v24, %v1569_v1 }
 0xc25   :  { %v1585_v12 = vadd.f32 %v3147_v21, %v1584_v3 }
 0xc26   :  { %v1574_v6 = vsel %vm1573_vm8, %v3145_v24, %v1570_v33  ;;  %v1502_v33 = vsub.f32 1.0, %v4011_v54 }
 0xc27   :  { %v1579_v45 = vsel %vm1576_vm10, %v1578_v31, %v1574_v6  ;;  %v1589_v10 = vsel %vm1588_vm13, %v3147_v21, %v1585_v12 }
 0xc28   :  { %v1594_v28 = vsel %vm1591_vm14, %v1593_v34, %v1589_v10  ;;  %v1620_v6 = vsub.f32 1.0, %v1579_v45  ;;  %v1632_v3 = vmul.f32 %v1579_v45, %v3954_v39 }
 0xc2f   :  { %v1484_v22 = vpop.permute.xlu0 %1483 }
 0xc30   :  { %v1488_v57 = vmul.f32 %v1484_v22, %v4011_v54 }
 0xc32   :  { %1493 = vrot.lane.b32.xlu1 %v1488_v57, %s3268_s16 }
 0xc4c   :  { %v1601_v30 = vpop.permute.xlu1 %1600 }
 0xc4d   :  { %v1606_v15 = vmul.f32 %v1601_v30, %v1579_v45 }
 0xc4f   :  { %1610 = vrot.lane.b32.xlu2 %v1606_v15, %s3268_s16  ;;  %v1621_v15 = vsub.f32 1.0, %v1594_v28 }
 0xc54   :  { %v1603_v16 = vpop.permute.xlu2 %1602 }
 0xc55   :  { %v1607_v37 = vmul.f32 %v1603_v16, %v1594_v28 }
 0xc57   :  { %1612 = vrot.lane.b32.xlu0 %v1607_v37, %s3268_s16 }
 0xc84   :  { %v1492_v53 = vpop.permute.xlu0 %1491 }
 0xc85   :  { %v1497_v9 = vadd.f32 %v1492_v53, %v3988_v55 }
 0xc87   :  { %3148 = vtanh.f32 %v1497_v9 }
 0xc8d   :  { %v3149_v29 = vpop.eup %3148 }
 0xc8e   :  { %1505 = vrot.lane.b32.xlu1 %v3149_v29, %s3270_s21 }
 0xca4   :  { %v1494_v0 = vpop.permute.xlu1 %1493 }
 0xca5   :  { %v1498_v22 = vadd.f32 %v1494_v0, %v3994_v14  ;;  %v1501_v14 = vsub.f32 1.0, %v3997_v35 }
 0xca7   :  { %3150 = vtanh.f32 %v1498_v22 }
 0xca9   :  { %v1611_v57 = vpop.permute.xlu2 %1610 }
 0xcaa   :  { %v1616_v26 = vadd.f32 %v1611_v57, %v4003_v50  ;;  %v1513_v50 = vmul.f32 %v3997_v35, %v3942_v52  ;;  %v4080_v57 = vadd.f32 %v3786_v23, %v3552_v40 }
 0xcac   :  { %3152 = vtanh.f32 %v1616_v26 }
 0xcad   :  { %v3151_v4 = vpop.eup %3150 }
 0xcae   :  { %1507 = vrot.lane.b32.xlu2 %v3151_v4, %s3270_s21 }
 0xcb2   :  { %v3153_v24 = vpop.eup %3152 }
 0xcb3   :  { %1624 = vrot.lane.b32.xlu0 %v3153_v24, %s3270_s21 }
 0xcc9   :  { %v1613_v19 = vpop.permute.xlu0 %1612 }
 0xcca   :  { %v1617_v55 = vadd.f32 %v1613_v19, %v4008_v20  ;;  %v1514_v20 = vmul.f32 %v4011_v54, %v3949_v11  ;;  %v1633_v54 = vmul.f32 %v1594_v28, %v3959_v38 }
 0xccc   :  { %3154 = vtanh.f32 %v1617_v55 }
 0xcd2   :  { %v3155_v5 = vpop.eup %3154 }
 0xcd3   :  { %1626 = vrot.lane.b32.xlu1 %v3155_v5, %s3270_s21 }
 0xd00   :  { %v1506_v21 = vpop.permute.xlu1 %1505 }
 0xd01   :  { %v1511_v1 = vmul.f32 %v1506_v21, %v1501_v14 }
 0xd03   :  { %v4028_v36 = vadd.f32 %v1513_v50, %v1511_v1 }
 0xd05   :  { %1671 = vrot.lane.b32.xlu2 %v4028_v36, %s3270_s21 }
 0xd08   :  { %v1508_v47 = vpop.permute.xlu2 %1507 }
 0xd09   :  { %v1512_v51 = vmul.f32 %v1508_v47, %v1502_v33 }
 0xd0b   :  { %v4035_v59 = vadd.f32 %v1514_v20, %v1512_v51 }
 0xd0d   :  { %1673 = vrot.lane.b32.xlu0 %v4035_v59, %s3270_s21 }
 0xd25   :  { %v1625_v35 = vpop.permute.xlu0 %1624 }
 0xd26   :  { %v1630_v31 = vmul.f32 %v1625_v35, %v1620_v6 }
 0xd28   :  { %v4040_v30 = vadd.f32 %v1632_v3, %v1630_v31 }
 0xd2a   :  { %1638 = vrot.lane.b32.xlu1 %v4040_v30, %s3270_s21 }
 0xd45   :  { %v1627_v12 = vpop.permute.xlu1 %1626 }
 0xd46   :  { %v1631_v7 = vmul.f32 %v1627_v12, %v1621_v15  ;;  %v4091_v15 = vld [vmem:[%s4612_s4] ss:$0 sm:$0xff] }
 0xd47   :  { %v4095_v12 = vadd.f32 %v4091_v15, %v3554_v41 }
 0xd48   :  { %v4045_v8 = vadd.f32 %v1633_v54, %v1631_v7 }
 0xd4a   :  { %1640 = vrot.lane.b32.xlu2 %v4045_v8, %s3270_s21 }
 0xd5f   :  { %v1672_v10 = vpop.permute.xlu2 %1671 }
 0xd60   :  { %2966 = vmatmul.msk.f32.vlgmr.msra.gmra.mxu3 %vm205_vm9, %v1672_v10 }
 0xd61   :  { %2221 = vmatpush.msra.mxu3 %v3840_v62 }
 0xd63   :  { %2222 = vmatpush.msra.mxu3 %v3846_v58 }
 0xd65   :  { %2223 = vmatpush.msra.mxu3 %v3852_v61 }
 0xd67   :  { %2224 = vmatpush.msra.mxu3 %v3858_v43 }
 0xd7f   :  { %v1674_v39 = vpop.permute.xlu0 %1673 }
 0xd80   :  { %2967 = vmatmul.msk.f32.gmra.mxu3 %vm205_vm9, %v1674_v39 }
 0xd9c   :  { %v1639_v38 = vpop.permute.xlu1 %1638 }
 0xd9d   :  { %2964 = vmatmul.msk.f32.vlgmr.msra.gmra.mxu2 %vm205_vm9, %v1639_v38  ;;  %2970 = vmatmul.msk.f32.vlgmr.msrb.gmra.mxu1 %vm205_vm9, %v1639_v38 }
 0xd9e   :  { %2188 = vmatpush.msra.mxu2 %v3867_v18 }
 0xda0   :  { %2189 = vmatpush.msra.mxu2 %v3874_v25 }
 0xda2   :  { %2190 = vmatpush.msra.mxu2 %v3881_v27 }
 0xda4   :  { %v1641_v62 = vpop.permute.xlu2 %1640  ;;  %2191 = vmatpush.msra.mxu2 %v3888_v32 }
 0xda5   :  { %2965 = vmatmul.msk.f32.gmra.mxu2 %vm205_vm9, %v1641_v62  ;;  %2971 = vmatmul.msk.f32.gmra.mxu1 %vm205_vm9, %v1641_v62 }
 0xde3   :  { %v1696_v58 = vpop.f32.mrf.mxu3 }
 0xde4   :  { %v1742_v61 = vadd.f32 %v1696_v58, %v3572_v46 }
 0xde6   :  { %1746 = vrot.lane.b32.xlu0 %v1742_v61, %s3268_s16 }
 0xe03   :  { %v1699_v43 = vpop.f32.mrf.mxu3 }
 0xe04   :  { %v1743_v45 = vadd.f32 %v1699_v43, %v3572_v46 }
 0xe06   :  { %1748 = vrot.lane.b32.xlu1 %v1743_v45, %s3268_s16 }
 0xe1a   :  { %v1815_v18 = vpop.f32.mrf.mxu1 }
 0xe1b   :  { %v1861_v25 = vadd.f32 %v1815_v18, %v3421_v17  ;;  %v1821_v4 = vadd.f32 %v1815_v18, %v4080_v57 }
 0xe1d   :  { %1865 = vrot.lane.b32.xlu2 %v1861_v25, %s3268_s16  ;;  %v2972_v55 = vmul.f32 -1.442695, %v1821_v4 }
 0xe20   :  { %v1663_v27 = vpop.f32.mrf.mxu2 }
 0xe21   :  { %v4070_v34 = vadd.f32 %v3903_v2, %v1663_v27 }
 0xe22   :  { %v1818_v32 = vpop.f32.mrf.mxu1 }
 0xe23   :  { %v1862_v28 = vadd.f32 %v1818_v32, %v3421_v17  ;;  %v1702_v16 = vadd.f32 %v1696_v58, %v4070_v34  ;;  %v1822_v10 = vadd.f32 %v1818_v32, %v4095_v12 }
 0xe25   :  { %1867 = vrot.lane.b32.xlu0 %v1862_v28, %s3268_s16  ;;  %v2968_v37 = vmul.f32 -1.442695, %v1702_v16  ;;  %v2973_v62 = vmul.f32 -1.442695, %v1822_v10 }
 0xe27   :  { %3156 = vpow2.f32 %v2968_v37 }
 0xe28   :  { %v1666_v29 = vpop.f32.mrf.mxu2 }
 0xe29   :  { %v4076_v22 = vadd.f32 %v3903_v2, %v1666_v29 }
 0xe2b   :  { %v1703_v24 = vadd.f32 %v1699_v43, %v4076_v22 }
 0xe2d   :  { %v3157_v53 = vpop.eup %3156  ;;  %v2969_v5 = vmul.f32 -1.442695, %v1703_v24 }
 0xe2e   :  { %v1710_v9 = vadd.f32 1.0, %v3157_v53 }
 0xe30   :  { %3158 = vrcp.f32 %v1710_v9  ;;  %v1723_v50 = vand.u32 2147483648, %v1710_v9  ;;  %vm1717_vm0 = vweird.f32 %v1710_v9  ;;  %v1721_v2 = vand.u32 2147483647, %v1710_v9 }
 0xe31   :  { %3160 = vpow2.f32 %v2972_v55 }
 0xe32   :  { %3162 = vpow2.f32 %v2969_v5  ;;  %v1724_v33 = vor.u32 1.1754944e-38, %v1723_v50  ;;  %vm1722_vm2 = vcmp.eq.f32.partialorder %v1721_v2, 8.507059e+37 }
 0xe36   :  { %v3159_v0 = vpop.eup %3158 }
 0xe37   :  { %v1713_v26 = vmul.f32 %v3159_v0, %v1710_v9  ;;  %vm1718_vm15 = vweird.f32 %v3159_v0  ;;  %v3161_v1 = vpop.eup %3160 }
 0xe38   :  { %vm1719_vm1 = vmor %vm1717_vm0, %vm1718_vm15  ;;  %v3163_v40 = vpop.eup %3162  ;;  %v1829_v47 = vadd.f32 1.0, %v3161_v1 }
 0xe39   :  { %v1714_v19 = vsub.f32 1.0, %v1713_v26  ;;  %v1711_v20 = vadd.f32 1.0, %v3163_v40 }
 0xe3a   :  { %3164 = vrcp.f32 %v1829_v47  ;;  %v1842_v45 = vand.u32 2147483648, %v1829_v47  ;;  %vm1836_vm5 = vweird.f32 %v1829_v47  ;;  %v1840_v25 = vand.u32 2147483647, %v1829_v47 }
 0xe3b   :  { %v1715_v14 = vmul.f32 %v3159_v0, %v1714_v19  ;;  %3166 = vrcp.f32 %v1711_v20  ;;  %v1738_v27 = vand.u32 2147483648, %v1711_v20  ;;  %vm1732_vm7 = vweird.f32 %v1711_v20 }
 0xe3c   :  { %3168 = vpow2.f32 %v2973_v62  ;;  %v1736_v41 = vand.u32 2147483647, %v1711_v20  ;;  %v1843_v32 = vor.u32 1.1754944e-38, %v1842_v45  ;;  %vm1841_vm10 = vcmp.eq.f32.partialorder %v1840_v25, 8.507059e+37 }
 0xe3d   :  { %v1716_v21 = vadd.f32 %v3159_v0, %v1715_v14  ;;  %v1739_v53 = vor.u32 1.1754944e-38, %v1738_v27 }
 0xe3e   :  { %vm1737_vm11 = vcmp.eq.f32.partialorder %v1736_v41, 8.507059e+37 }
 0xe3f   :  { %v1720_v23 = vsel %vm1719_vm1, %v3159_v0, %v1716_v21 }
 0xe40   :  { %v4084_v6 = vsel %vm1722_vm2, %v1724_v33, %v1720_v23  ;;  %v3165_v3 = vpop.eup %3164 }
 0xe41   :  { %v3167_v31 = vpop.eup %3166  ;;  %v1832_v54 = vmul.f32 %v3165_v3, %v1829_v47  ;;  %vm1837_vm3 = vweird.f32 %v3165_v3 }
 0xe42   :  { %v1728_v7 = vmul.f32 %v3167_v31, %v1711_v20  ;;  %vm1733_vm4 = vweird.f32 %v3167_v31  ;;  %vm1838_vm6 = vmor %vm1836_vm5, %vm1837_vm3  ;;  %v3169_v28 = vpop.eup %3168 }
 0xe43   :  { %v1833_v39 = vsub.f32 1.0, %v1832_v54  ;;  %vm1734_vm8 = vmor %vm1732_vm7, %vm1733_vm4  ;;  %v1830_v9 = vadd.f32 1.0, %v3169_v28 }
 0xe44   :  { %v1729_v38 = vsub.f32 1.0, %v1728_v7 }
 0xe45   :  { %v1834_v58 = vmul.f32 %v3165_v3, %v1833_v39  ;;  %3170 = vrcp.f32 %v1830_v9  ;;  %v1857_v2 = vand.u32 2147483648, %v1830_v9  ;;  %vm1851_vm13 = vweird.f32 %v1830_v9 }
 0xe46   :  { %v1730_v61 = vmul.f32 %v3167_v31, %v1729_v38  ;;  %v1855_v1 = vand.u32 2147483647, %v1830_v9 }
 0xe47   :  { %v1835_v43 = vadd.f32 %v3165_v3, %v1834_v58  ;;  %v1858_v23 = vor.u32 1.1754944e-38, %v1857_v2 }
 0xe48   :  { %v1731_v18 = vadd.f32 %v3167_v31, %v1730_v61  ;;  %vm1856_vm15 = vcmp.eq.f32.partialorder %v1855_v1, 8.507059e+37 }
 0xe49   :  { %v1839_v16 = vsel %vm1838_vm6, %v3165_v3, %v1835_v43  ;;  %v1778_v43 = vmul.f32 %v4084_v6, %v4028_v36 }
 0xe4a   :  { %v1735_v37 = vsel %vm1734_vm8, %v3167_v31, %v1731_v18  ;;  %v4098_v29 = vsel %vm1841_vm10, %v1843_v32, %v1839_v16 }
 0xe4b   :  { %v1740_v24 = vsel %vm1737_vm11, %v1739_v53, %v1735_v37  ;;  %v3171_v55 = vpop.eup %3170  ;;  %v1885_v28 = vsub.f32 1.0, %v4098_v29 }
 0xe4c   :  { %v1847_v5 = vmul.f32 %v3171_v55, %v1830_v9  ;;  %vm1852_vm12 = vweird.f32 %v3171_v55 }
 0xe4d   :  { %vm1853_vm14 = vmor %vm1851_vm13, %vm1852_vm12 }
 0xe4e   :  { %v1848_v14 = vsub.f32 1.0, %v1847_v5 }
 0xe50   :  { %v1849_v21 = vmul.f32 %v3171_v55, %v1848_v14 }
 0xe52   :  { %v1850_v50 = vadd.f32 %v3171_v55, %v1849_v21 }
 0xe54   :  { %v1854_v40 = vsel %vm1853_vm14, %v3171_v55, %v1850_v50 }
 0xe55   :  { %v1859_v47 = vsel %vm1856_vm15, %v1858_v23, %v1854_v40  ;;  %v4153_v23 = vld [vmem:[%s4616_s8] ss:$0 sm:$0xff] }
 0xe56   :  { %v1886_v53 = vsub.f32 1.0, %v1859_v47 }
 0xe58   :  { %v1747_v51 = vpop.permute.xlu0 %1746 }
 0xe59   :  { %v1752_v35 = vmul.f32 %v1747_v51, %v4084_v6 }
 0xe5b   :  { %1756 = vrot.lane.b32.xlu1 %v1752_v35, %s3268_s16 }
 0xe77   :  { %v1866_v0 = vpop.permute.xlu2 %1865 }
 0xe78   :  { %v1871_v26 = vmul.f32 %v1866_v0, %v4098_v29  ;;  %v1749_v4 = vpop.permute.xlu1 %1748  ;;  %v1898_v0 = vmul.f32 %v1859_v47, %v4045_v8 }
 0xe79   :  { %v1753_v19 = vmul.f32 %v1749_v4, %v1740_v24 }
 0xe7a   :  { %1875 = vrot.lane.b32.xlu0 %v1871_v26, %s3268_s16 }
 0xe7b   :  { %1758 = vrot.lane.b32.xlu2 %v1753_v19, %s3268_s16 }
 0xe97   :  { %v1868_v33 = vpop.permute.xlu0 %1867 }
 0xe98   :  { %v1872_v20 = vmul.f32 %v1868_v33, %v1859_v47 }
 0xe9a   :  { %1877 = vrot.lane.b32.xlu1 %v1872_v20, %s3268_s16 }
 0xecd   :  { %v1757_v51 = vpop.permute.xlu1 %1756 }
 0xece   :  { %v1762_v35 = vadd.f32 %v1757_v51, %v4070_v34 }
 0xed0   :  { %3172 = vtanh.f32 %v1762_v35 }
 0xed5   :  { %v1759_v3 = vpop.permute.xlu2 %1758 }
 0xed6   :  { %v3173_v31 = vpop.eup %3172  ;;  %v1763_v54 = vadd.f32 %v1759_v3, %v4076_v22  ;;  %v1766_v22 = vsub.f32 1.0, %v4084_v6  ;;  %v1897_v6 = vmul.f32 %v4098_v29, %v4040_v30 }
 0xed7   :  { %1770 = vrot.lane.b32.xlu2 %v3173_v31, %s3270_s21 }
 0xed8   :  { %3174 = vtanh.f32 %v1763_v54 }
 0xede   :  { %v3175_v7 = vpop.eup %3174 }
 0xedf   :  { %1772 = vrot.lane.b32.xlu0 %v3175_v7, %s3270_s21 }
 0xeec   :  { %v1876_v10 = vpop.permute.xlu0 %1875 }
 0xeed   :  { %v1881_v39 = vadd.f32 %v1876_v10, %v4080_v57  ;;  %v1767_v57 = vsub.f32 1.0, %v1740_v24  ;;  %v4165_v10 = vadd.f32 %v4091_v15, %v3556_v42 }
 0xeef   :  { %3176 = vtanh.f32 %v1881_v39 }
 0xef5   :  { %v3177_v38 = vpop.eup %3176 }
 0xef6   :  { %1889 = vrot.lane.b32.xlu1 %v3177_v38, %s3270_s21 }
 0xf0c   :  { %v1878_v62 = vpop.permute.xlu1 %1877 }
 0xf0d   :  { %v1882_v34 = vadd.f32 %v1878_v62, %v4095_v12  ;;  %v1779_v12 = vmul.f32 %v1740_v24, %v4035_v59 }
 0xf0f   :  { %3178 = vtanh.f32 %v1882_v34 }
 0xf15   :  { %v3179_v58 = vpop.eup %3178 }
 0xf16   :  { %1891 = vrot.lane.b32.xlu2 %v3179_v58, %s3270_s21 }
 0xf31   :  { %v1771_v61 = vpop.permute.xlu2 %1770 }
 0xf32   :  { %v1776_v45 = vmul.f32 %v1771_v61, %v1766_v22 }
 0xf34   :  { %v4115_v18 = vadd.f32 %v1778_v43, %v1776_v45 }
 0xf36   :  { %1936 = vrot.lane.b32.xlu0 %v4115_v18, %s3270_s21 }
 0xf51   :  { %v1773_v25 = vpop.permute.xlu0 %1772 }
 0xf52   :  { %v1777_v27 = vmul.f32 %v1773_v25, %v1767_v57 }
 0xf54   :  { %v4120_v41 = vadd.f32 %v1779_v12, %v1777_v27 }
 0xf56   :  { %1938 = vrot.lane.b32.xlu1 %v4120_v41, %s3270_s21 }
 0xf68   :  { %v1890_v16 = vpop.permute.xlu1 %1889 }
 0xf69   :  { %v1895_v32 = vmul.f32 %v1890_v16, %v1885_v28 }
 0xf6b   :  { %v4127_v37 = vadd.f32 %v1897_v6, %v1895_v32 }
 0xf6d   :  { %1903 = vrot.lane.b32.xlu2 %v4127_v37, %s3270_s21 }
 0xf70   :  { %v1892_v9 = vpop.permute.xlu2 %1891 }
 0xf71   :  { %v1896_v26 = vmul.f32 %v1892_v9, %v1886_v53 }
 0xf73   :  { %v4132_v4 = vadd.f32 %v1898_v0, %v1896_v26 }
 0xf75   :  { %1905 = vrot.lane.b32.xlu0 %v4132_v4, %s3270_s21 }
 0xfa8   :  { %v1937_v24 = vpop.permute.xlu0 %1936 }
 0xfa9   :  { %2976 = vmatmul.msk.f32.vlgmr.msrb.gmra.mxu3 %vm205_vm9, %v1937_v24 }
 0xfc7   :  { %v1904_v30 = vpop.permute.xlu2 %1903 }
 0xfc8   :  { %v1939_v29 = vpop.permute.xlu1 %1938  ;;  %2974 = vmatmul.msk.f32.vlgmr.msrb.gmra.mxu2 %vm205_vm9, %v1904_v30  ;;  %2980 = vmatmul.msk.f32.vlgmr.msra.gmra.mxu1 %vm205_vm9, %v1904_v30 }
 0xfc9   :  { %2977 = vmatmul.msk.f32.gmra.mxu3 %vm205_vm9, %v1939_v29 }
 0xfe7   :  { %v1906_v19 = vpop.permute.xlu0 %1905 }
 0xfe8   :  { %2975 = vmatmul.msk.f32.gmra.mxu2 %vm205_vm9, %v1906_v19  ;;  %2981 = vmatmul.msk.f32.gmra.mxu1 %vm205_vm9, %v1906_v19 }
0x102c   :  { %v1961_v8 = vpop.f32.mrf.mxu3 }
0x102d   :  { %v2007_v55 = vadd.f32 %v1961_v8, %v3572_v46 }
0x102f   :  { %2011 = vrot.lane.b32.xlu1 %v2007_v55, %s3268_s16 }
0x1045   :  { %v2080_v5 = vpop.f32.mrf.mxu1 }
0x1046   :  { %v2126_v14 = vadd.f32 %v2080_v5, %v3421_v17  ;;  %v2086_v39 = vadd.f32 %v2080_v5, %v4165_v10 }
0x1048   :  { %2130 = vrot.lane.b32.xlu0 %v2126_v14, %s3268_s16  ;;  %v2982_v34 = vmul.f32 -1.442695, %v2086_v39 }
0x104b   :  { %v1928_v40 = vpop.f32.mrf.mxu2 }
0x104c   :  { %v1964_v21 = vpop.f32.mrf.mxu3  ;;  %v4156_v33 = vadd.f32 %v4153_v23, %v1928_v40 }
0x104d   :  { %v2008_v50 = vadd.f32 %v1964_v21, %v3572_v46 }
0x104e   :  { %v1967_v47 = vadd.f32 %v1961_v8, %v4156_v33  ;;  %v203_v8 = vadd.f32 %v4091_v15, %v3566_v44 }
0x104f   :  { %2013 = vrot.lane.b32.xlu2 %v2008_v50, %s3268_s16 }
0x1050   :  { %v2978_v51 = vmul.f32 -1.442695, %v1967_v47 }
0x1052   :  { %3180 = vpow2.f32 %v2978_v51 }
0x1058   :  { %v3181_v31 = vpop.eup %3180 }
0x1059   :  { %v1975_v54 = vadd.f32 1.0, %v3181_v31 }
0x105b   :  { %v1988_v28 = vand.u32 2147483648, %v1975_v54  ;;  %vm1982_vm1 = vweird.f32 %v1975_v54  ;;  %v1986_v42 = vand.u32 2147483647, %v1975_v54 }
0x105d   :  { %v1989_v32 = vor.u32 1.1754944e-38, %v1988_v28  ;;  %vm1987_vm3 = vcmp.eq.f32.partialorder %v1986_v42, 8.507059e+37 }
0x1065   :  { %v2083_v2 = vpop.f32.mrf.mxu1 }
0x1066   :  { %v2127_v1 = vadd.f32 %v2083_v2, %v3421_v17  ;;  %v2087_v14 = vadd.f32 %v2083_v2, %v203_v8 }
0x1068   :  { %2132 = vrot.lane.b32.xlu1 %v2127_v1, %s3268_s16  ;;  %v2983_v47 = vmul.f32 -1.442695, %v2087_v14 }
0x106b   :  { %v1931_v20 = vpop.f32.mrf.mxu2 }
0x106c   :  { %v4160_v35 = vadd.f32 %v4153_v23, %v1931_v20 }
0x106e   :  { %v1968_v17 = vadd.f32 %v1964_v21, %v4160_v35 }
0x1070   :  { %v2979_v3 = vmul.f32 -1.442695, %v1968_v17 }
0x1072   :  { %3182 = vpow2.f32 %v2979_v3 }
0x1073   :  { %3184 = vrcp.f32 %v1975_v54 }
0x1078   :  { %v3183_v7 = vpop.eup %3182 }
0x1079   :  { %v1976_v38 = vadd.f32 1.0, %v3183_v7  ;;  %v3185_v62 = vpop.eup %3184 }
0x107a   :  { %v1978_v58 = vmul.f32 %v3185_v62, %v1975_v54  ;;  %vm1983_vm0 = vweird.f32 %v3185_v62 }
0x107b   :  { %3186 = vrcp.f32 %v1976_v38  ;;  %vm1984_vm2 = vmor %vm1982_vm1, %vm1983_vm0  ;;  %v2003_v24 = vand.u32 2147483648, %v1976_v38  ;;  %vm1997_vm5 = vweird.f32 %v1976_v38  ;;  %v2001_v29 = vand.u32 2147483647, %v1976_v38 }
0x107c   :  { %3188 = vpow2.f32 %v2982_v34  ;;  %v1979_v22 = vsub.f32 1.0, %v1978_v58 }
0x107d   :  { %v2004_v55 = vor.u32 1.1754944e-38, %v2003_v24  ;;  %vm2002_vm7 = vcmp.eq.f32.partialorder %v2001_v29, 8.507059e+37 }
0x107e   :  { %v1980_v43 = vmul.f32 %v3185_v62, %v1979_v22 }
0x1080   :  { %v1981_v12 = vadd.f32 %v3185_v62, %v1980_v43 }
0x1081   :  { %v3187_v61 = vpop.eup %3186 }
0x1082   :  { %v1993_v45 = vmul.f32 %v3187_v61, %v1976_v38  ;;  %v3189_v57 = vpop.eup %3188  ;;  %v1985_v16 = vsel %vm1984_vm2, %v3185_v62, %v1981_v12  ;;  %vm1998_vm4 = vweird.f32 %v3187_v61 }
0x1083   :  { %v2094_v25 = vadd.f32 1.0, %v3189_v57  ;;  %v4168_v9 = vsel %vm1987_vm3, %v1989_v32, %v1985_v16  ;;  %vm1999_vm6 = vmor %vm1997_vm5, %vm1998_vm4 }
0x1084   :  { %v1994_v27 = vsub.f32 1.0, %v1993_v45 }
0x1085   :  { %3190 = vrcp.f32 %v2094_v25  ;;  %v2107_v17 = vand.u32 2147483648, %v2094_v25  ;;  %vm2101_vm10 = vweird.f32 %v2094_v25  ;;  %v2105_v44 = vand.u32 2147483647, %v2094_v25 }
0x1086   :  { %v1995_v6 = vmul.f32 %v3187_v61, %v1994_v27  ;;  %3192 = vpow2.f32 %v2983_v47 }
0x1087   :  { %v2108_v2 = vor.u32 1.1754944e-38, %v2107_v17  ;;  %vm2106_vm12 = vcmp.eq.f32.partialorder %v2105_v44, 8.507059e+37 }
0x1088   :  { %v1996_v26 = vadd.f32 %v3187_v61, %v1995_v6 }
0x108a   :  { %v2000_v19 = vsel %vm1999_vm6, %v3187_v61, %v1996_v26 }
0x108b   :  { %v3191_v30 = vpop.eup %3190  ;;  %v4174_v21 = vsel %vm2002_vm7, %v2004_v55, %v2000_v19  ;;  %v2031_v19 = vsub.f32 1.0, %v4168_v9  ;;  %v2043_v55 = vmul.f32 %v4168_v9, %v4115_v18 }
0x108c   :  { %v2097_v5 = vmul.f32 %v3191_v30, %v2094_v25  ;;  %vm2102_vm8 = vweird.f32 %v3191_v30  ;;  %v3193_v15 = vpop.eup %3192  ;;  %v2032_v47 = vsub.f32 1.0, %v4174_v21 }
0x108d   :  { %vm2103_vm11 = vmor %vm2101_vm10, %vm2102_vm8  ;;  %v2095_v31 = vadd.f32 1.0, %v3193_v15 }
0x108e   :  { %v2098_v40 = vsub.f32 1.0, %v2097_v5 }
0x108f   :  { %3194 = vrcp.f32 %v2095_v31  ;;  %v2122_v61 = vand.u32 2147483648, %v2095_v31  ;;  %vm2116_vm14 = vweird.f32 %v2095_v31  ;;  %v2120_v43 = vand.u32 2147483647, %v2095_v31 }
0x1090   :  { %v2099_v20 = vmul.f32 %v3191_v30, %v2098_v40 }
0x1091   :  { %v2123_v57 = vor.u32 1.1754944e-38, %v2122_v61  ;;  %vm2121_vm0 = vcmp.eq.f32.partialorder %v2120_v43, 8.507059e+37 }
0x1092   :  { %v2100_v51 = vadd.f32 %v3191_v30, %v2099_v20  ;;  %v3271_v20 = vmov 0  }
0x1093   :  { %3015 = vset.pattern.permute.xlu1 %v3271_v20  ;;  %3016 = vset.pattern.permute.xlu2 %v3271_v20 }
0x1094   :  { %v2104_v3 = vsel %vm2103_vm11, %v3191_v30, %v2100_v51  ;;  %3014 = vset.pattern.permute.xlu0 %v3271_v20  ;;  %v2044_v51 = vmul.f32 %v4174_v21, %v4120_v41 }
0x1095   :  { %v2109_v7 = vsel %vm2106_vm12, %v2108_v2, %v2104_v3  ;;  %v3195_v38 = vpop.eup %3194 }
0x1096   :  { %v2112_v62 = vmul.f32 %v3195_v38, %v2095_v31  ;;  %vm2117_vm13 = vweird.f32 %v3195_v38 }
0x1097   :  { %vm2118_vm15 = vmor %vm2116_vm14, %vm2117_vm13 }
0x1098   :  { %v2113_v34 = vsub.f32 1.0, %v2112_v62 }
0x109a   :  { %v2114_v58 = vmul.f32 %v3195_v38, %v2113_v34  ;;  %v1783_v34 = vld [vmem:[%s4618_s1 + $0x58] sm:$0xff] }
0x109b   :  { %vm1785_vm4 = vcmp.gt.f32.partialorder %v1783_v34, 0.0 }
0x109c   :  { %v2115_v22 = vadd.f32 %v3195_v38, %v2114_v58  ;;  %v1787_v58 = vsel %vm1785_vm4, 1, %v3271_v20 }
0x109e   :  { %v2119_v45 = vsel %vm2118_vm15, %v3195_v38, %v2115_v22  ;;  %v1253_v38 = vld [vmem:[%s4618_s1 + $0x38] sm:$0xff] }
0x109f   :  { %v2124_v12 = vsel %vm2121_vm0, %v2123_v57, %v2119_v45  ;;  %vm1255_vm3 = vcmp.gt.f32.partialorder %v1253_v38, 0.0  ;;  %v2313_v57 = vld [vmem:[%s4618_s1 + $0x78] sm:$0xff] }
0x10a0   :  { %v2163_v3 = vmul.f32 %v2124_v12, %v4132_v4  ;;  %v458_v4 = vld [vmem:[%s4618_s1 + $0x8] sm:$0xff]  ;;  %v1257_v62 = vsel %vm1255_vm3, 1, %v3271_v20  ;;  %vm2315_vm5 = vcmp.gt.f32.partialorder %v2313_v57, 0.0 }
0x10a1   :  { %v2012_v53 = vpop.permute.xlu1 %2011  ;;  %vm460_vm2 = vcmp.gt.f32.partialorder %v458_v4, 0.0 }
0x10a2   :  { %v2017_v0 = vmul.f32 %v2012_v53, %v4168_v9 }
0x10a4   :  { %2021 = vrot.lane.b32.xlu2 %v2017_v0, %s3268_s16 }
0x10a9   :  { %v2014_v50 = vpop.permute.xlu2 %2013 }
0x10aa   :  { %v2018_v1 = vmul.f32 %v2014_v50, %v4174_v21  ;;  %v2162_v50 = vmul.f32 %v2109_v7, %v4127_v37  ;;  %v2151_v37 = vsub.f32 1.0, %v2124_v12 }
0x10ac   :  { %2023 = vrot.lane.b32.xlu0 %v2018_v1, %s3268_s16 }
0x10ba   :  { %v2131_v54 = vpop.permute.xlu0 %2130 }
0x10bb   :  { %v2136_v39 = vmul.f32 %v2131_v54, %v2109_v7  ;;  %v722_v54 = vld [vmem:[%s4618_s1 + $0x10] sm:$0xff] }
0x10bc   :  { %vm724_vm1 = vcmp.gt.f32.partialorder %v722_v54, 0.0 }
0x10bd   :  { %2140 = vrot.lane.b32.xlu1 %v2136_v39, %s3268_s16  ;;  %v726_v21 = vsel %vm724_vm1, 1, %v3271_v20  ;;  %v462_v39 = vsel %vm460_vm2, 1, %v3271_v20 }
0x10da   :  { %v2133_v25 = vpop.permute.xlu1 %2132 }
0x10db   :  { %v2137_v27 = vmul.f32 %v2133_v25, %v2124_v12  ;;  %v2317_v25 = vsel %vm2315_vm5, 1, %v3271_v20 }
0x10dd   :  { %2142 = vrot.lane.b32.xlu2 %v2137_v27, %s3268_s16 }
0x10fe   :  { %v2022_v28 = vpop.permute.xlu2 %2021 }
0x10ff   :  { %v2027_v42 = vadd.f32 %v2022_v28, %v4156_v33  ;;  %v987_v28 = vld [vmem:[%s4618_s1 + $0x20] sm:$0xff] }
0x1100   :  { %vm989_vm6 = vcmp.gt.f32.partialorder %v987_v28, 0.0 }
0x1101   :  { %3196 = vtanh.f32 %v2027_v42 }
0x1107   :  { %v3197_v16 = vpop.eup %3196 }
0x1108   :  { %2035 = vrot.lane.b32.xlu0 %v3197_v16, %s3270_s21  ;;  %v991_v16 = vsel %vm989_vm6, 1, %v3271_v20 }
0x111e   :  { %v2024_v6 = vpop.permute.xlu0 %2023 }
0x111f   :  { %v2028_v32 = vadd.f32 %v2024_v6, %v4160_v35 }
0x1121   :  { %3198 = vtanh.f32 %v2028_v32  ;;  %v1252_v32 = vld [vmem:[%s4618_s1 + $0x30] sm:$0xff] }
0x1122   :  { %vm1254_vm7 = vcmp.gt.f32.partialorder %v1252_v32, 0.0 }
0x1127   :  { %v3199_v53 = vpop.eup %3198 }
0x1128   :  { %2037 = vrot.lane.b32.xlu1 %v3199_v53, %s3270_s21  ;;  %v457_v53 = vld [vmem:[%s4618_s1] sm:$0xff] }
0x1129   :  { %vm459_vm8 = vcmp.gt.f32.partialorder %v457_v53, 0.0 }
0x112f   :  { %v2141_v0 = vpop.permute.xlu1 %2140 }
0x1130   :  { %v2146_v26 = vadd.f32 %v2141_v0, %v4165_v10  ;;  %v2150_v10 = vsub.f32 1.0, %v2109_v7  ;;  %v3021_v7 = vld [vmem:[%s4617_s10] ss:$0 sm:$0xff]  ;;  %v1256_v0 = vsel %vm1254_vm7, 1, %v3271_v20 }
0x1132   :  { %3200 = vtanh.f32 %v2146_v26  ;;  %v461_v26 = vsel %vm459_vm8, 1, %v3271_v20 }
0x1137   :  { %v2143_v24 = vpop.permute.xlu2 %2142 }
0x1138   :  { %v3201_v30 = vpop.eup %3200  ;;  %v2147_v29 = vadd.f32 %v2143_v24, %v203_v8  ;;  %v1517_v24 = vld [vmem:[%s4618_s1 + $0x40] sm:$0xff] }
0x1139   :  { %2154 = vrot.lane.b32.xlu2 %v3201_v30, %s3270_s21  ;;  %vm1519_vm11 = vcmp.gt.f32.partialorder %v1517_v24, 0.0 }
0x113a   :  { %3202 = vtanh.f32 %v2147_v29  ;;  %v1521_v29 = vsel %vm1519_vm11, 1, %v3271_v20 }
0x1140   :  { %v3203_v33 = vpop.eup %3202 }
0x1141   :  { %2156 = vrot.lane.b32.xlu0 %v3203_v33, %s3270_s21  ;;  %v988_v33 = vld [vmem:[%s4618_s1 + $0x28] sm:$0xff] }
0x1142   :  { %vm990_vm12 = vcmp.gt.f32.partialorder %v988_v33, 0.0 }
0x117a   :  { %v2036_v35 = vpop.permute.xlu0 %2035 }
0x117b   :  { %v2041_v5 = vmul.f32 %v2036_v35, %v2031_v19  ;;  %v1782_v19 = vld [vmem:[%s4618_s1 + $0x50] sm:$0xff]  ;;  %v992_v35 = vsel %vm990_vm12, 1, %v3271_v20 }
0x117c   :  { %vm1784_vm13 = vcmp.gt.f32.partialorder %v1782_v19, 0.0 }
0x117d   :  { %v4190_v14 = vadd.f32 %v2043_v55, %v2041_v5  ;;  %v1786_v55 = vsel %vm1784_vm13, 1, %v3271_v20  ;;  %v2047_v5 = vld [vmem:[%s4618_s1 + $0x60] sm:$0xff] }
0x117e   :  { %vm2049_vm14 = vcmp.gt.f32.partialorder %v2047_v5, 0.0 }
0x117f   :  { %2201 = vrot.lane.b32.xlu1 %v4190_v14, %s3270_s21 }
0x1193   :  { %v2155_v8 = vpop.permute.xlu2 %2154 }
0x1194   :  { %v2160_v1 = vmul.f32 %v2155_v8, %v2150_v10  ;;  %v2051_v10 = vsel %vm2049_vm14, 1, %v3271_v20  ;;  %v1518_v8 = vld [vmem:[%s4618_s1 + $0x48] sm:$0xff] }
0x1195   :  { %vm1520_vm15 = vcmp.gt.f32.partialorder %v1518_v8, 0.0 }
0x1196   :  { %v2164_v40 = vadd.f32 %v2162_v50, %v2160_v1  ;;  %v1522_v50 = vsel %vm1520_vm15, 1, %v3271_v20  ;;  %v2048_v1 = vld [vmem:[%s4618_s1 + $0x68] sm:$0xff] }
0x1197   :  { %vm2050_vm0 = vcmp.gt.f32.partialorder %v2048_v1, 0.0 }
0x1198   :  { %2168 = vrot.lane.b32.xlu0 %v2164_v40, %s3270_s21 }
0x119a   :  { %v2038_v9 = vpop.permute.xlu1 %2037 }
0x119b   :  { %v2042_v17 = vmul.f32 %v2038_v9, %v2032_v47  ;;  %v2052_v47 = vsel %vm2050_vm0, 1, %v3271_v20 }
0x119d   :  { %v4202_v44 = vadd.f32 %v2044_v51, %v2042_v17 }
0x119f   :  { %2203 = vrot.lane.b32.xlu2 %v4202_v44, %s3270_s21 }
0x11b3   :  { %v2157_v15 = vpop.permute.xlu0 %2156 }
0x11b4   :  { %v2161_v2 = vmul.f32 %v2157_v15, %v2151_v37 }
0x11b6   :  { %v2165_v31 = vadd.f32 %v2163_v3, %v2161_v2 }
0x11b8   :  { %2170 = vrot.lane.b32.xlu1 %v2165_v31, %s3270_s21 }
0x11c0   :  { %729 = vperm.xlu1 %3015, %v726_v21  }
0x11c8   :  { %2330 = vrot.lane.b32.xlu1 %v3021_v7, %s3272_s24 }
0x11d0   :  { %467 = vperm.xlu1 %3015, %v462_v39  }
0x11d8   :  { %1262 = vperm.xlu1 %3015, %v1257_v62  }
0x11e0   :  { %1792 = vperm.xlu1 %3015, %v1787_v58  }
0x11e8   :  { %2322 = vperm.xlu1 %3015, %v2317_v25  }
0x11f1   :  { %v2202_v22 = vpop.permute.xlu1 %2201 }
0x11f2   :  { %2986 = vmatmul.msk.f32.vlgmr.msra.gmra.mxu3 %vm205_vm9, %v2202_v22 }
0x11f9   :  { %v2204_v61 = vpop.permute.xlu2 %2203 }
0x11fa   :  { %2987 = vmatmul.msk.f32.gmra.mxu3 %vm205_vm9, %v2204_v61 }
0x120a   :  { %v2169_v43 = vpop.permute.xlu0 %2168 }
0x120b   :  { %2984 = vmatmul.msk.f32.vlgmr.msra.gmra.mxu2 %vm205_vm9, %v2169_v43 }
0x122a   :  { %v2171_v45 = vpop.permute.xlu1 %2170 }
0x122b   :  { %2985 = vmatmul.msk.f32.gmra.mxu2 %vm205_vm9, %v2171_v45 }
0x1232   :  { %v730_v40 = vpop.permute.xlu1 %729 }
0x1233   :  { %vm734_vm1 = vcmp.eq.s32.totalorder %v730_v40, 1 }
0x1234   :  { %v4285_v17 = vsel %vm734_vm1, %v3715_v13, 0.0 }
0x123a   :  { %v4282_v9 = vpop.permute.xlu1 %2330 }
0x123b   :  { %v2354_v37 = vmul.f32 %v4282_v9, %v4285_v17 }
0x1242   :  { %v468_v39 = vpop.permute.xlu1 %467 }
0x1243   :  { %vm470_vm3 = vcmp.eq.s32.totalorder %v468_v39, 1 }
0x1244   :  { %v4301_v22 = vsel %vm470_vm3, %v3633_v56, 0.0 }
0x1245   :  { %v2334_v43 = vmul.f32 %v4282_v9, %v4301_v22 }
0x1275   :  { %v2226_v12 = vpop.f32.mrf.mxu3 }
0x1276   :  { %v2272_v27 = vadd.f32 %v2226_v12, %v3572_v46 }
0x1278   :  { %2276 = vrot.lane.b32.xlu2 %v2272_v27, %s3268_s16 }
0x127d   :  { %v4240_v42 = vpop.f32.mrf.mxu3 }
0x127e   :  { %v2273_v6 = vadd.f32 %v4240_v42, %v3572_v46  ;;  %v723_v46 = vld [vmem:[%s4618_s1 + $0x18] sm:$0xff] }
0x127f   :  { %vm725_vm10 = vcmp.gt.f32.partialorder %v723_v46, 0.0 }
0x1280   :  { %994 = vperm.xlu2 %3016, %v991_v16   ;;  %2278 = vrot.lane.b32.xlu0 %v2273_v6, %s3268_s16  ;;  %v727_v30 = vsel %vm725_vm10, 1, %v3271_v20 }
0x1288   :  { %1259 = vperm.xlu2 %3016, %v1256_v0   ;;  %464 = vperm.xlu0 %3014, %v461_v26  }
0x128e   :  { %v2193_v51 = vpop.f32.mrf.mxu2 }
0x128f   :  { %v4290_v15 = vadd.f32 %v4153_v23, %v2193_v51 }
0x1290   :  { %732 = vperm.xlu2 %3016, %v727_v30   ;;  %1524 = vperm.xlu0 %3014, %v1521_v29  }
0x1291   :  { %v2232_v3 = vadd.f32 %v2226_v12, %v4290_v15 }
0x1293   :  { %v2988_v2 = vmul.f32 -1.442695, %v2232_v3 }
0x1295   :  { %3204 = vpow2.f32 %v2988_v2 }
0x1298   :  { %997 = vperm.xlu2 %3016, %v992_v35   ;;  %1789 = vperm.xlu0 %3014, %v1786_v55  }
0x129b   :  { %v3205_v31 = vpop.eup %3204 }
0x129c   :  { %v2240_v54 = vadd.f32 1.0, %v3205_v31 }
0x129e   :  { %3206 = vrcp.f32 %v2240_v54  ;;  %v2253_v57 = vand.u32 2147483648, %v2240_v54  ;;  %vm2247_vm5 = vweird.f32 %v2240_v54 }
0x12a0   :  { %2054 = vperm.xlu0 %3014, %v2051_v10   ;;  %v2254_v12 = vor.u32 1.1754944e-38, %v2253_v57 }
0x12a4   :  { %v3207_v7 = vpop.eup %3206 }
0x12a5   :  { %v2243_v4 = vmul.f32 %v3207_v7, %v2240_v54  ;;  %vm2248_vm4 = vweird.f32 %v3207_v7 }
0x12a6   :  { %vm2249_vm6 = vmor %vm2247_vm5, %vm2248_vm4 }
0x12a7   :  { %v2244_v62 = vsub.f32 1.0, %v2243_v4 }
0x12a8   :  { %1527 = vperm.xlu0 %3014, %v1522_v50  }
0x12a9   :  { %v2245_v58 = vmul.f32 %v3207_v7, %v2244_v62 }
0x12ab   :  { %v2246_v45 = vadd.f32 %v3207_v7, %v2245_v58 }
0x12ad   :  { %v2250_v25 = vsel %vm2249_vm6, %v3207_v7, %v2246_v45 }
0x12ae   :  { %v2196_v28 = vpop.f32.mrf.mxu2 }
0x12af   :  { %v4310_v6 = vadd.f32 %v4153_v23, %v2196_v28 }
0x12b0   :  { %2057 = vperm.xlu0 %3014, %v2052_v47  }
0x12b1   :  { %v2233_v0 = vadd.f32 %v4240_v42, %v4310_v6 }
0x12b3   :  { %v2989_v24 = vmul.f32 -1.442695, %v2233_v0 }
0x12b5   :  { %3208 = vpow2.f32 %v2989_v24 }
0x12b8   :  { %2358 = vrot.lane.b32.xlu0 %v2354_v37, %s3270_s21 }
0x12d2   :  { %v2277_v21 = vpop.permute.xlu2 %2276 }
0x12da   :  { %v995_v13 = vpop.permute.xlu2 %994 }
0x12db   :  { %vm999_vm2 = vcmp.eq.s32.totalorder %v995_v13, 1 }
0x12dc   :  { %v4295_v38 = vsel %vm999_vm2, %v3815_v60, 0.0  ;;  %v2251_v60 = vand.u32 2147483647, %v2240_v54 }
0x12dd   :  { %v2372_v34 = vmul.f32 %v4282_v9, %v4295_v38 }
0x12de   :  { %vm2252_vm7 = vcmp.eq.f32.partialorder %v2251_v60, 8.507059e+37 }
0x12df   :  { %2376 = vrot.lane.b32.xlu1 %v2372_v34, %s3270_s21  ;;  %v4306_v16 = vsel %vm2252_vm7, %v2254_v12, %v2250_v25 }
0x12e0   :  { %v2282_v56 = vmul.f32 %v2277_v21, %v4306_v16 }
0x12e2   :  { %v1260_v61 = vpop.permute.xlu2 %1259 }
0x12e3   :  { %vm1264_vm11 = vcmp.eq.s32.totalorder %v1260_v61, 1 }
0x12e4   :  { %v4330_v42 = vsel %vm1264_vm11, %v3942_v52, 0.0  ;;  %v1263_v52 = vpop.permute.xlu1 %1262 }
0x12e5   :  { %vm1265_vm15 = vcmp.eq.s32.totalorder %v1263_v52, 1 }
0x12e7   :  { %2339 = vrot.lane.b32.xlu1 %v2334_v43, %s3270_s21 }
0x12ea   :  { %v733_v27 = vpop.permute.xlu2 %732 }
0x12eb   :  { %vm735_vm13 = vcmp.eq.s32.totalorder %v733_v27, 1 }
0x12ec   :  { %v4342_v5 = vsel %vm735_vm13, %v3708_v63, 0.0  ;;  %v4354_v63 = vsel %vm1265_vm15, %v3949_v11, 0.0 }
0x12ed   :  { %v2355_v8 = vmul.f32 %v4282_v9, %v4342_v5  ;;  %v2391_v37 = vmul.f32 %v4282_v9, %v4354_v63 }
0x12ef   :  { %2286 = vrot.lane.b32.xlu1 %v2282_v56, %s3268_s16 }
0x12f2   :  { %v4313_v32 = vpop.permute.xlu0 %2278  ;;  %v998_v53 = vpop.permute.xlu2 %997 }
0x12f3   :  { %vm1000_vm8 = vcmp.eq.s32.totalorder %v998_v53, 1 }
0x12f4   :  { %v4318_v26 = vsel %vm1000_vm8, %v3822_v49, 0.0  ;;  %v3209_v49 = vpop.eup %3208 }
0x12f5   :  { %v2373_v46 = vmul.f32 %v4282_v9, %v4318_v26  ;;  %v2241_v19 = vadd.f32 1.0, %v3209_v49  ;;  %v2312_v49 = vld [vmem:[%s4618_s1 + $0x70] sm:$0xff] }
0x12f6   :  { %vm2314_vm8 = vcmp.gt.f32.partialorder %v2312_v49, 0.0 }
0x12f7   :  { %2378 = vrot.lane.b32.xlu1 %v2373_v46, %s3270_s21  ;;  %3210 = vrcp.f32 %v2241_v19  ;;  %v2268_v39 = vand.u32 2147483648, %v2241_v19  ;;  %vm2262_vm4 = vweird.f32 %v2241_v19  ;;  %v2266_v62 = vand.u32 2147483647, %v2241_v19 }
0x12f9   :  { %v2269_v34 = vor.u32 1.1754944e-38, %v2268_v39  ;;  %vm2267_vm6 = vcmp.eq.f32.partialorder %v2266_v62, 8.507059e+37 }
0x12fa   :  { %v465_v23 = vpop.permute.xlu0 %464 }
0x12fb   :  { %vm469_vm10 = vcmp.eq.s32.totalorder %v465_v23, 1 }
0x12fc   :  { %v4324_v30 = vsel %vm469_vm10, %v3627_v48, 0.0  ;;  %v2390_v48 = vmul.f32 %v4282_v9, %v4330_v42 }
0x12fd   :  { %v2333_v29 = vmul.f32 %v4282_v9, %v4324_v30  ;;  %v3211_v1 = vpop.eup %3210 }
0x12fe   :  { %v2258_v40 = vmul.f32 %v3211_v1, %v2241_v19  ;;  %vm2263_vm3 = vweird.f32 %v3211_v1 }
0x12ff   :  { %2337 = vrot.lane.b32.xlu2 %v2333_v29, %s3270_s21  ;;  %vm2264_vm5 = vmor %vm2262_vm4, %vm2263_vm3  ;;  %vm2877_vm4 = vcmask 31744  }
0x1300   :  { %v2259_v3 = vsub.f32 1.0, %v2258_v40 }
0x1302   :  { %v1525_v33 = vpop.permute.xlu0 %1524  ;;  %v2260_v11 = vmul.f32 %v3211_v1, %v2259_v3 }
0x1303   :  { %vm1529_vm12 = vcmp.eq.s32.totalorder %v1525_v33, 1  ;;  %v2316_v33 = vsel %vm2314_vm8, 1, %v3271_v20 }
0x1304   :  { %v4333_v35 = vsel %vm1529_vm12, %v4028_v36, 0.0  ;;  %v2261_v4 = vadd.f32 %v3211_v1, %v2260_v11 }
0x1305   :  { %v2408_v55 = vmul.f32 %v4282_v9, %v4333_v35 }
0x1307   :  { %2412 = vrot.lane.b32.xlu0 %v2408_v55, %s3270_s21  ;;  %2394 = vrot.lane.b32.xlu2 %v2390_v48, %s3270_s21 }
0x130a   :  { %v1790_v10 = vpop.permute.xlu0 %1789 }
0x130b   :  { %vm1794_vm14 = vcmp.eq.s32.totalorder %v1790_v10, 1 }
0x130c   :  { %v4345_v36 = vsel %vm1794_vm14, %v4115_v18, 0.0  ;;  %v1793_v18 = vpop.permute.xlu1 %1792 }
0x130d   :  { %v2426_v50 = vmul.f32 %v4282_v9, %v4345_v36  ;;  %vm1795_vm1 = vcmp.eq.s32.totalorder %v1793_v18, 1 }
0x130e   :  { %v4366_v31 = vsel %vm1795_vm1, %v4120_v41, 0.0  ;;  %v2265_v41 = vsel %vm2264_vm5, %v3211_v1, %v2261_v4 }
0x130f   :  { %2430 = vrot.lane.b32.xlu0 %v2426_v50, %s3270_s21  ;;  %2360 = vrot.lane.b32.xlu2 %v2355_v8, %s3270_s21  ;;  %v2427_v7 = vmul.f32 %v4282_v9, %v4366_v31  ;;  %v4377_v58 = vsel %vm2267_vm6, %v2269_v34, %v2265_v41 }
0x1310   :  { %v2283_v43 = vmul.f32 %v4313_v32, %v4377_v58 }
0x1312   :  { %v2055_v47 = vpop.permute.xlu0 %2054 }
0x1313   :  { %vm2059_vm0 = vcmp.eq.s32.totalorder %v2055_v47, 1 }
0x1314   :  { %v4357_v51 = vsel %vm2059_vm0, %v4190_v14, 0.0  ;;  %v4388_v57 = vpop.permute.xlu1 %2322 }
0x1315   :  { %v2444_v2 = vmul.f32 %v4282_v9, %v4357_v51  ;;  %vm2325_vm11 = vcmp.eq.s32.totalorder %v4388_v57, 1 }
0x1317   :  { %2396 = vrot.lane.b32.xlu0 %v2391_v37, %s3270_s21  ;;  %2448 = vrot.lane.b32.xlu2 %v2444_v2, %s3270_s21  ;;  %v19_v37 = vstv %s4619_s11 }
0x1318   :  { %20 = vst [vmem:[#allocation2] sm:$0x1] %v19_v37 }
0x131a   :  { %v1528_v54 = vpop.permute.xlu0 %1527 }
0x131b   :  { %vm1530_vm2 = vcmp.eq.s32.totalorder %v1528_v54, 1 }
0x131c   :  { %v4369_v21 = vsel %vm1530_vm2, %v4035_v59, 0.0 }
0x131d   :  { %v2409_v13 = vmul.f32 %v4282_v9, %v4369_v21 }
0x131f   :  { %2432 = vrot.lane.b32.xlu0 %v2427_v7, %s3270_s21  ;;  %2414 = vrot.lane.b32.xlu2 %v2409_v13, %s3270_s21  ;;  %v2296_v7 = vsub.f32 1.0, %v4306_v16  ;;  %v2308_v13 = vmul.f32 %v4306_v16, %v4190_v14 }
0x1322   :  { %v2058_v59 = vpop.permute.xlu0 %2057 }
0x1323   :  { %vm2060_vm7 = vcmp.eq.s32.totalorder %v2058_v59, 1 }
0x1324   :  { %v4380_v61 = vsel %vm2060_vm7, %v4202_v44, 0.0 }
0x1325   :  { %v2445_v45 = vmul.f32 %v4282_v9, %v4380_v61 }
0x1327   :  { %2288 = vrot.lane.b32.xlu2 %v2283_v43, %s3268_s16  ;;  %2450 = vrot.lane.b32.xlu1 %v2445_v45, %s3270_s21  ;;  %v2297_v43 = vsub.f32 1.0, %v4377_v58 }
0x132a   :  { %v2359_v23 = vpop.permute.xlu0 %2358 }
0x132b   :  { %v2364_v18 = vsel %vm205_vm9, %v2359_v23, 0.0 }
0x1351   :  { %v2377_v60 = vpop.permute.xlu1 %2376 }
0x1352   :  { %v2382_v25 = vsel %vm205_vm9, %v2377_v60, 0.0  ;;  %v2309_v60 = vmul.f32 %v4377_v58, %v4202_v44 }
0x1353   :  { %2383 = vadd.xlane.f32.xlu2 %v2382_v25 }
0x1359   :  { %v4391_v12 = vpop.permute.xlu1 %2339  ;;  %v2338_v27 = vpop.permute.xlu2 %2337 }
0x135a   :  { %v2343_v28 = vsel %vm205_vm9, %v2338_v27, 0.0 }
0x135b   :  { %2344 = vadd.xlane.f32.xlu0 %v2343_v28 }
0x1361   :  { %v2287_v56 = vpop.permute.xlu1 %2286  ;;  %v2395_v32 = vpop.permute.xlu2 %2394 }
0x1362   :  { %v2292_v53 = vadd.f32 %v2287_v56, %v4290_v15  ;;  %v2400_v0 = vsel %vm205_vm9, %v2395_v32, 0.0  ;;  %v4433_v56 = vld [vmem:[#allocation2] ss:$0 sm:$0xff] }
0x1363   :  { %2401 = vadd.xlane.f32.xlu2 %v2400_v0 }
0x1364   :  { %3212 = vtanh.f32 %v2292_v53 }
0x1369   :  { %v2361_v46 = vpop.permute.xlu2 %2360  ;;  %v2379_v3 = vpop.permute.xlu1 %2378 }
0x136a   :  { %v3213_v24 = vpop.eup %3212  ;;  %v2385_v23 = vsel %vm205_vm9, %v2379_v3, 0.0 }
0x136b   :  { %2300 = vrot.lane.b32.xlu1 %v3213_v24, %s3270_s21  ;;  %v2346_v24 = vsel %vm205_vm9, %v4391_v12, 0.0 }
0x1371   :  { %v4397_v29 = vpop.permute.xlu2 %2448 }
0x1372   :  { %v2454_v49 = vsel %vm205_vm9, %v4397_v29, 0.0 }
0x1379   :  { %v2413_v19 = vpop.permute.xlu0 %2412  ;;  %v4403_v15 = vpop.permute.xlu2 %2414 }
0x137a   :  { %v2418_v48 = vsel %vm205_vm9, %v2413_v19, 0.0 }
0x137b   :  { %2419 = vadd.xlane.f32.xlu0 %v2418_v48  ;;  %2319 = vperm.xlu2 %3016, %v2316_v33   ;;  %v2421_v33 = vsel %vm205_vm9, %v4403_v15, 0.0 }
0x1381   :  { %v2431_v55 = vpop.permute.xlu0 %2430  ;;  %v2289_v52 = vpop.permute.xlu2 %2288 }
0x1382   :  { %v2436_v10 = vsel %vm205_vm9, %v2431_v55, 0.0  ;;  %v2293_v8 = vadd.f32 %v2289_v52, %v4310_v6  ;;  %v2367_v6 = vsel %vm205_vm9, %v2361_v46, 0.0 }
0x1383   :  { %2437 = vadd.xlane.f32.xlu0 %v2436_v10 }
0x1384   :  { %3214 = vtanh.f32 %v2293_v8 }
0x1389   :  { %v2397_v50 = vpop.permute.xlu0 %2396 }
0x138a   :  { %v3215_v1 = vpop.eup %3214  ;;  %v2403_v40 = vsel %vm205_vm9, %v2397_v50, 0.0 }
0x138b   :  { %2404 = vadd.xlane.f32.xlu0 %v2403_v40  ;;  %2302 = vrot.lane.b32.xlu2 %v3215_v1, %s3270_s21 }
0x1391   :  { %v2433_v20 = vpop.permute.xlu0 %2432 }
0x1392   :  { %v2439_v47 = vsel %vm205_vm9, %v2433_v20, 0.0 }
0x1393   :  { %2440 = vadd.xlane.f32.xlu0 %v2439_v47 }
0x1395   :  { %2365 = vadd.xlane.f32.xlu1 %v2364_v18 }
0x1399   :  { %v2451_v11 = vpop.permute.xlu1 %2450 }
0x139a   :  { %v2457_v10 = vsel %vm205_vm9, %v2451_v11, 0.0 }
0x13b4   :  { %2368 = vadd.xlane.f32.xlu2 %v2367_v6 }
0x13c6   :  { %v2384_v2 = vpop.xlane.xlu2 %2383 }
0x13c7   :  { %v2388_v44 = vadd.f32 %v4433_v56, %v2384_v2 }
0x13ce   :  { %v2345_v28 = vpop.xlane.xlu0 %2344 }
0x13cf   :  { %v2352_v53 = vadd.f32 %v4433_v56, %v2345_v28 }
0x13d6   :  { %v2402_v54 = vpop.xlane.xlu2 %2401 }
0x13d7   :  { %v2406_v57 = vadd.f32 %v4433_v56, %v2402_v54 }
0x13dd   :  { %v2301_v4 = vpop.permute.xlu1 %2300 }
0x13de   :  { %v2306_v39 = vmul.f32 %v2301_v4, %v2296_v7  ;;  %v2320_v62 = vpop.permute.xlu2 %2319 }
0x13df   :  { %vm2324_vm10 = vcmp.eq.s32.totalorder %v2320_v62, 1 }
0x13e0   :  { %v2310_v41 = vadd.f32 %v2308_v13, %v2306_v39 }
0x13e2   :  { %v4419_v34 = vsel %vm2324_vm10, %v2310_v41, 0.0 }
0x13e3   :  { %v2462_v59 = vmul.f32 %v4282_v9, %v4419_v34 }
0x13e5   :  { %2466 = vrot.lane.b32.xlu1 %v2462_v59, %s3270_s21 }
0x13e6   :  { %v2303_v45 = vpop.permute.xlu2 %2302 }
0x13e7   :  { %v2307_v25 = vmul.f32 %v2303_v45, %v2297_v43 }
0x13e9   :  { %v2311_v27 = vadd.f32 %v2309_v60, %v2307_v25 }
0x13eb   :  { %v4428_v14 = vsel %vm2325_vm11, %v2311_v27, 0.0 }
0x13ec   :  { %v2463_v16 = vmul.f32 %v4282_v9, %v4428_v14 }
0x13ee   :  { %2468 = vrot.lane.b32.xlu2 %v2463_v16, %s3270_s21  ;;  %v2420_v8 = vpop.xlane.xlu0 %2419 }
0x13ef   :  { %v2424_v20 = vadd.f32 %v4433_v56, %v2420_v8 }
0x13f6   :  { %v2438_v50 = vpop.xlane.xlu0 %2437 }
0x13f7   :  { %v2442_v2 = vadd.f32 %v4433_v56, %v2438_v50 }
0x13fe   :  { %v2405_v47 = vpop.xlane.xlu0 %2404 }
0x13ff   :  { %v2407_v13 = vadd.f32 %v4433_v56, %v2405_v47 }
0x1406   :  { %v2441_v60 = vpop.xlane.xlu0 %2440 }
0x1408   :  { %v2366_v32 = vpop.xlane.xlu1 %2365 }
0x1409   :  { %v2370_v0 = vadd.f32 %v4433_v56, %v2366_v32 }
0x140b   :  { %v2480_v58 = vmax.f32 %v2352_v53, %v2370_v0 }
0x140d   :  { %v2482_v46 = vmax.f32 %v2480_v58, %v2388_v44  ;;  %v2443_v58 = vadd.f32 %v4433_v56, %v2441_v60 }
0x140f   :  { %v2484_v9 = vmax.f32 %v2482_v46, %v2406_v57  ;;  %2347 = vadd.xlane.f32.xlu1 %v2346_v24 }
0x1411   :  { %v2486_v6 = vmax.f32 %v2484_v9, %v2424_v20 }
0x1413   :  { %v2488_v4 = vmax.f32 %v2486_v6, %v2442_v2 }
0x1417   :  { %2386 = vadd.xlane.f32.xlu1 %v2385_v23  ;;  %2455 = vadd.xlane.f32.xlu2 %v2454_v49 }
0x141f   :  { %2422 = vadd.xlane.f32.xlu2 %v2421_v33 }
0x1427   :  { %v2369_v19 = vpop.xlane.xlu2 %2368 }
0x1428   :  { %v2371_v18 = vadd.f32 %v4433_v56, %v2369_v19 }
0x1448   :  { %v2469_v48 = vpop.permute.xlu2 %2468 }
0x1449   :  { %v2475_v55 = vsel %vm205_vm9, %v2469_v48, 0.0 }
0x144a   :  { %2476 = vadd.xlane.f32.xlu2 %v2475_v55 }
0x1457   :  { %v2467_v52 = vpop.permute.xlu1 %2466 }
0x1458   :  { %v2472_v12 = vsel %vm205_vm9, %v2467_v52, 0.0 }
0x1459   :  { %2473 = vadd.xlane.f32.xlu1 %v2472_v12 }
0x1461   :  { %2458 = vadd.xlane.f32.xlu1 %v2457_v10 }
0x1482   :  { %v2348_v29 = vpop.xlane.xlu1 %2347 }
0x1483   :  { %v2353_v15 = vadd.f32 %v4433_v56, %v2348_v29 }
0x1485   :  { %v2481_v3 = vmax.f32 %v2353_v15, %v2371_v18 }
0x148a   :  { %v2456_v1 = vpop.xlane.xlu2 %2455  ;;  %v2387_v40 = vpop.xlane.xlu1 %2386 }
0x148b   :  { %v2389_v37 = vadd.f32 %v4433_v56, %v2387_v40  ;;  %v2460_v11 = vadd.f32 %v4433_v56, %v2456_v1 }
0x148d   :  { %v2483_v7 = vmax.f32 %v2481_v3, %v2389_v37  ;;  %v2490_v41 = vmax.f32 %v2488_v4, %v2460_v11 }
0x148f   :  { %v2485_v43 = vmax.f32 %v2483_v7, %v2407_v13 }
0x1492   :  { %v2423_v54 = vpop.xlane.xlu2 %2422 }
0x1493   :  { %v4457_v39 = vadd.f32 %v4433_v56, %v2423_v54 }
0x1495   :  { %v2487_v25 = vmax.f32 %v2485_v43, %v4457_v39 }
0x1497   :  { %v2489_v55 = vmax.f32 %v2487_v25, %v2443_v58 }
0x14bd   :  { %v2477_v23 = vpop.xlane.xlu2 %2476 }
0x14cc   :  { %v2474_v62 = vpop.xlane.xlu1 %2473 }
0x14cd   :  { %v2478_v59 = vadd.f32 %v4433_v56, %v2474_v62 }
0x14cf   :  { %v2492_v45 = vmax.f32 %v2490_v41, %v2478_v59 }
0x14d1   :  { %v2494_v27 = vsub.f32 %v2352_v53, %v2492_v45  ;;  %v2500_v16 = vsub.f32 %v2370_v0, %v2492_v45  ;;  %v2506_v28 = vsub.f32 %v2388_v44, %v2492_v45  ;;  %v2512_v32 = vsub.f32 %v2406_v57, %v2492_v45 }
0x14d2   :  { %v2518_v49 = vsub.f32 %v2424_v20, %v2492_v45  ;;  %v2524_v19 = vsub.f32 %v2442_v2, %v2492_v45  ;;  %v2530_v12 = vsub.f32 %v2460_v11, %v2492_v45  ;;  %v2479_v53 = vadd.f32 %v4433_v56, %v2477_v23 }
0x14d3   :  { %v2496_v46 = vmul.f32 1.442695, %v2494_v27  ;;  %v2502_v24 = vmul.f32 1.442695, %v2500_v16  ;;  %v2508_v9 = vmul.f32 1.442695, %v2506_v28  ;;  %v2536_v57 = vsub.f32 %v2478_v59, %v2492_v45 }
0x14d4   :  { %v2459_v33 = vpop.xlane.xlu1 %2458  ;;  %v2514_v52 = vmul.f32 1.442695, %v2512_v32  ;;  %v2520_v44 = vmul.f32 1.442695, %v2518_v49  ;;  %v2526_v10 = vmul.f32 1.442695, %v2524_v19 }
0x14d5   :  { %3216 = vpow2.f32 %v2496_v46  ;;  %v2461_v48 = vadd.f32 %v4433_v56, %v2459_v33  ;;  %v2532_v29 = vmul.f32 1.442695, %v2530_v12  ;;  %v2538_v6 = vmul.f32 1.442695, %v2536_v57 }
0x14d6   :  { %3218 = vpow2.f32 %v2502_v24 }
0x14d7   :  { %3220 = vpow2.f32 %v2508_v9  ;;  %v2491_v0 = vmax.f32 %v2489_v55, %v2461_v48 }
0x14d8   :  { %3222 = vpow2.f32 %v2514_v52 }
0x14d9   :  { %v2493_v8 = vmax.f32 %v2491_v0, %v2479_v53  ;;  %3224 = vpow2.f32 %v2520_v44 }
0x14da   :  { %3226 = vpow2.f32 %v2526_v10 }
0x14db   :  { %v3217_v50 = vpop.eup %3216  ;;  %v2495_v1 = vsub.f32 %v2353_v15, %v2493_v8  ;;  %v2501_v40 = vsub.f32 %v2371_v18, %v2493_v8  ;;  %v2507_v20 = vsub.f32 %v2389_v37, %v2493_v8  ;;  %v2513_v3 = vsub.f32 %v2407_v13, %v2493_v8 }
0x14dc   :  { %v3219_v47 = vpop.eup %3218  ;;  %2544 = vperm.xlu0 %3014, %v3217_v50   ;;  %3228 = vpow2.f32 %v2532_v29  ;;  %v2519_v4 = vsub.f32 %v4457_v39, %v2493_v8  ;;  %v2525_v37 = vsub.f32 %v2443_v58, %v2493_v8  ;;  %v2531_v43 = vsub.f32 %v2461_v48, %v2493_v8 }
0x14dd   :  { %v3221_v2 = vpop.eup %3220  ;;  %v2554_v56 = vadd.f32 %v3219_v47, %v3217_v50  ;;  %v2498_v11 = vmul.f32 1.442695, %v2495_v1  ;;  %v2504_v54 = vmul.f32 1.442695, %v2501_v40  ;;  %2558 = vperm.xlu1 %3015, %v3219_v47   ;;  %v2510_v7 = vmul.f32 1.442695, %v2507_v20 }
0x14de   :  { %2574 = vperm.xlu2 %3016, %v3221_v2   ;;  %v3223_v15 = vpop.eup %3222  ;;  %v2516_v18 = vmul.f32 1.442695, %v2513_v3  ;;  %v2522_v59 = vmul.f32 1.442695, %v2519_v4  ;;  %v2528_v27 = vmul.f32 1.442695, %v2525_v37  ;;  %v2537_v16 = vsub.f32 %v2479_v53, %v2493_v8 }
0x14df   :  { %v2570_v62 = vadd.f32 %v3221_v2, %v2554_v56  ;;  %3230 = vpow2.f32 %v2498_v11  ;;  %v3225_v41 = vpop.eup %3224  ;;  %v2534_v46 = vmul.f32 1.442695, %v2531_v43 }
0x14e0   :  { %3232 = vpow2.f32 %v2504_v54  ;;  %v3227_v45 = vpop.eup %3226  ;;  %v2540_v49 = vmul.f32 1.442695, %v2537_v16 }
0x14e1   :  { %3234 = vpow2.f32 %v2538_v6  ;;  %v2586_v13 = vadd.f32 %v3223_v15, %v2570_v62 }
0x14e2   :  { %3236 = vpow2.f32 %v2510_v7  ;;  %v3229_v25 = vpop.eup %3228 }
0x14e3   :  { %v2602_v60 = vadd.f32 %v3225_v41, %v2586_v13  ;;  %3238 = vpow2.f32 %v2516_v18 }
0x14e4   :  { %2590 = vperm.xlu0 %3014, %v3223_v15   ;;  %3240 = vpow2.f32 %v2522_v59 }
0x14e5   :  { %v3231_v39 = vpop.eup %3230  ;;  %v2618_v28 = vadd.f32 %v3227_v45, %v2602_v60  ;;  %2606 = vperm.xlu1 %3015, %v3225_v41   ;;  %3242 = vpow2.f32 %v2528_v27 }
0x14e6   :  { %v3233_v32 = vpop.eup %3232  ;;  %2638 = vperm.xlu2 %3016, %v3229_v25   ;;  %3244 = vpow2.f32 %v2534_v46 }
0x14e7   :  { %v3235_v58 = vpop.eup %3234  ;;  %v2634_v24 = vadd.f32 %v3229_v25, %v2618_v28  ;;  %v2555_v9 = vadd.f32 %v3233_v32, %v3231_v39 }
0x14e8   :  { %v3237_v23 = vpop.eup %3236 }
0x14e9   :  { %v2650_v33 = vadd.f32 %v3235_v58, %v2634_v24  ;;  %v2571_v19 = vadd.f32 %v3237_v23, %v2555_v9  ;;  %v3239_v48 = vpop.eup %3238 }
0x14ea   :  { %v3241_v52 = vpop.eup %3240 }
0x14eb   :  { %3246 = vrcp.f32 %v2650_v33  ;;  %v2587_v55 = vadd.f32 %v3239_v48, %v2571_v19  ;;  %v3243_v53 = vpop.eup %3242  ;;  %v2677_v3 = vand.u32 2147483648, %v2650_v33  ;;  %vm2671_vm13 = vweird.f32 %v2650_v33 }
0x14ec   :  { %3248 = vpow2.f32 %v2540_v49  ;;  %2654 = vperm.xlu0 %3014, %v3235_v58   ;;  %v3245_v44 = vpop.eup %3244  ;;  %v2675_v2 = vand.u32 2147483647, %v2650_v33 }
0x14ed   :  { %v2603_v12 = vadd.f32 %v3241_v52, %v2587_v55  ;;  %2622 = vperm.xlu1 %3015, %v3227_v45   ;;  %v2678_v7 = vor.u32 1.1754944e-38, %v2677_v3 }
0x14ee   :  { %2563 = vperm.xlu2 %3016, %v3233_v32   ;;  %vm2676_vm15 = vcmp.eq.f32.partialorder %v2675_v2, 8.507059e+37 }
0x14ef   :  { %v2619_v0 = vadd.f32 %v3243_v53, %v2603_v12 }
0x14f1   :  { %v3247_v57 = vpop.eup %3246  ;;  %v2635_v10 = vadd.f32 %v3245_v44, %v2619_v0 }
0x14f2   :  { %v3249_v8 = vpop.eup %3248  ;;  %v2667_v29 = vmul.f32 %v3247_v57, %v2650_v33  ;;  %vm2672_vm12 = vweird.f32 %v3247_v57 }
0x14f3   :  { %v2651_v50 = vadd.f32 %v3249_v8, %v2635_v10  ;;  %vm2673_vm14 = vmor %vm2671_vm13, %vm2672_vm12 }
0x14f4   :  { %2549 = vperm.xlu0 %3014, %v3231_v39   ;;  %v2668_v1 = vsub.f32 1.0, %v2667_v29 }
0x14f5   :  { %3250 = vrcp.f32 %v2651_v50  ;;  %2595 = vperm.xlu1 %3015, %v3239_v48   ;;  %v2692_v15 = vand.u32 2147483648, %v2651_v50  ;;  %vm2686_vm1 = vweird.f32 %v2651_v50  ;;  %v2690_v18 = vand.u32 2147483647, %v2651_v50 }
0x14f6   :  { %2611 = vperm.xlu2 %3016, %v3241_v52   ;;  %v2669_v40 = vmul.f32 %v3247_v57, %v2668_v1 }
0x14f7   :  { %v2693_v13 = vor.u32 1.1754944e-38, %v2692_v15  ;;  %vm2691_vm3 = vcmp.eq.f32.partialorder %v2690_v18, 8.507059e+37 }
0x14f8   :  { %v2670_v47 = vadd.f32 %v3247_v57, %v2669_v40 }
0x14fa   :  { %v2674_v11 = vsel %vm2673_vm14, %v3247_v57, %v2670_v47 }
0x14fb   :  { %v3251_v20 = vpop.eup %3250  ;;  %v2679_v4 = vsel %vm2676_vm15, %v2678_v7, %v2674_v11 }
0x14fc   :  { %2579 = vperm.xlu0 %3014, %v3237_v23   ;;  %v2682_v6 = vmul.f32 %v3251_v20, %v2651_v50  ;;  %vm2687_vm0 = vweird.f32 %v3251_v20 }
0x14fd   :  { %2627 = vperm.xlu1 %3015, %v3243_v53   ;;  %vm2688_vm2 = vmor %vm2686_vm1, %vm2687_vm0 }
0x14fe   :  { %2643 = vperm.xlu2 %3016, %v3245_v44   ;;  %v2683_v56 = vsub.f32 1.0, %v2682_v6 }
0x1500   :  { %v2684_v54 = vmul.f32 %v3251_v20, %v2683_v56 }
0x1502   :  { %v2685_v62 = vadd.f32 %v3251_v20, %v2684_v54 }
0x1504   :  { %2698 = vperm.xlu0 %3014, %v2679_v4   ;;  %v2689_v37 = vsel %vm2688_vm2, %v3251_v20, %v2685_v62 }
0x1505   :  { %2659 = vperm.xlu1 %3015, %v3249_v8   ;;  %v2694_v41 = vsel %vm2691_vm3, %v2693_v13, %v2689_v37 }
0x150c   :  { %2703 = vperm.xlu0 %3014, %v2694_v41  }
0x1538   :  { %v2575_v59 = vpop.permute.xlu2 %2574 }
0x1539   :  { %v2582_v24 = vmul.f32 %v2575_v59, %v4295_v38 }
0x1540   :  { %v2639_v60 = vpop.permute.xlu2 %2638 }
0x1541   :  { %v2646_v10 = vmul.f32 %v2639_v60, %v4357_v51 }
0x1548   :  { %v2564_v46 = vpop.permute.xlu2 %2563 }
0x1549   :  { %v2567_v0 = vmul.f32 %v2564_v46, %v4342_v5 }
0x154e   :  { %v2545_v43 = vpop.permute.xlu0 %2544 }
0x154f   :  { %v2559_v45 = vpop.permute.xlu1 %2558  ;;  %v2552_v39 = vmul.f32 %v2545_v43, %v4324_v30 }
0x1550   :  { %v2566_v16 = vmul.f32 %v2559_v45, %v4285_v17  ;;  %v2612_v52 = vpop.permute.xlu2 %2611 }
0x1551   :  { %v2615_v47 = vmul.f32 %v2612_v52, %v4369_v21 }
0x1552   :  { %v2568_v58 = vadd.f32 %v2566_v16, %v2552_v39  ;;  %v2724_v39 = vld [vmem:[%s4620_s12] sm:$0xff] }
0x1554   :  { %v2584_v23 = vadd.f32 %v2582_v24, %v2568_v58 }
0x1556   :  { %v2591_v25 = vpop.permute.xlu0 %2590 }
0x1557   :  { %v2607_v27 = vpop.permute.xlu1 %2606  ;;  %v2598_v9 = vmul.f32 %v2591_v25, %v4330_v42 }
0x1558   :  { %v2614_v48 = vmul.f32 %v2607_v27, %v4333_v35  ;;  %v2644_v2 = vpop.permute.xlu2 %2643 }
0x1559   :  { %v2600_v33 = vadd.f32 %v2598_v9, %v2584_v23  ;;  %v2647_v4 = vmul.f32 %v2644_v2, %v4380_v61 }
0x155b   :  { %v2616_v12 = vadd.f32 %v2614_v48, %v2600_v33 }
0x155e   :  { %v2655_v28 = vpop.permute.xlu0 %2654 }
0x155f   :  { %v2623_v32 = vpop.permute.xlu1 %2622  ;;  %v2662_v6 = vmul.f32 %v2655_v28, %v4419_v34 }
0x1560   :  { %v2630_v55 = vmul.f32 %v2623_v32, %v4345_v36 }
0x1562   :  { %v2632_v44 = vadd.f32 %v2630_v55, %v2616_v12  ;;  %v3023_v55 = vld [vmem:[%s4621_s13] ss:$0 sm:$0xff] }
0x1564   :  { %v2648_v20 = vadd.f32 %v2646_v10, %v2632_v44 }
0x1566   :  { %v2550_v49 = vpop.permute.xlu0 %2549  ;;  %v2664_v54 = vadd.f32 %v2662_v6, %v2648_v20 }
0x1567   :  { %v2596_v19 = vpop.permute.xlu1 %2595  ;;  %v2553_v53 = vmul.f32 %v2550_v49, %v4301_v22 }
0x1568   :  { %v2599_v1 = vmul.f32 %v2596_v19, %v4354_v63 }
0x1569   :  { %v2569_v8 = vadd.f32 %v2567_v0, %v2553_v53 }
0x156e   :  { %v2580_v57 = vpop.permute.xlu0 %2579 }
0x156f   :  { %v2628_v29 = vpop.permute.xlu1 %2627  ;;  %v2583_v50 = vmul.f32 %v2580_v57, %v4318_v26 }
0x1570   :  { %v2631_v56 = vmul.f32 %v2628_v29, %v4366_v31 }
0x1571   :  { %v2585_v40 = vadd.f32 %v2583_v50, %v2569_v8 }
0x1573   :  { %v2601_v3 = vadd.f32 %v2599_v1, %v2585_v40 }
0x1575   :  { %v2617_v11 = vadd.f32 %v2615_v47, %v2601_v3 }
0x1576   :  { %v2699_v7 = vpop.permute.xlu0 %2698 }
0x1577   :  { %v2706_v62 = vmul.f32 %v2699_v7, %v2664_v54  ;;  %v2633_v15 = vadd.f32 %v2631_v56, %v2617_v11  ;;  %v2660_v18 = vpop.permute.xlu1 %2659 }
0x1578   :  { %v2663_v59 = vmul.f32 %v2660_v18, %v4428_v14 }
0x1579   :  { %v2710_v37 = vadd.f32 %v2706_v62, %v4285_v17  ;;  %v2708_v13 = vadd.f32 %v2706_v62, %v4324_v30  ;;  %v2649_v41 = vadd.f32 %v2647_v4, %v2633_v15  ;;  %v2727_v17 = vld [vmem:[%s4620_s12 + $0x18] sm:$0xff]  ;;  %v2726_v30 = vld [vmem:[%s4620_s12 + $0x10] sm:$0xff]  ;;  %v2712_v28 = vadd.f32 %v2706_v62, %v4295_v38 }
0x157a   :  { %2824 = vmatpush.msrb.mxu0 %v2727_v17  ;;  %v2722_v38 = vadd.f32 %v2706_v62, %v4419_v34  ;;  %v2720_v46 = vadd.f32 %v2706_v62, %v4357_v51  ;;  %v2718_v58 = vadd.f32 %v2706_v62, %v4345_v36 }
0x157b   :  { %2752 = vrot.lane.b32.xlu0 %v2710_v37, %s3270_s21  ;;  %2748 = vrot.lane.b32.xlu2 %v2708_v13, %s3270_s21  ;;  %v2665_v43 = vadd.f32 %v2663_v59, %v2649_v41 }
0x157c   :  { %2825 = vmatpush.msrb.mxu0 %v2726_v30 }
0x157e   :  { %v2704_v45 = vpop.permute.xlu0 %2703 }
0x157f   :  { %v2707_v60 = vmul.f32 %v2704_v45, %v2665_v43 }
0x1581   :  { %v2713_v25 = vadd.f32 %v2707_v60, %v4318_v26  ;;  %v2711_v27 = vadd.f32 %v2707_v60, %v4342_v5  ;;  %v2709_v16 = vadd.f32 %v2707_v60, %v4301_v22  ;;  %v2725_v26 = vld [vmem:[%s4620_s12 + $0x8] sm:$0xff]  ;;  %v2716_v22 = vadd.f32 %v2706_v62, %v4333_v35 }
0x1582   :  { %v2714_v5 = vadd.f32 %v2706_v62, %v4330_v42  ;;  %2826 = vmatpush.msrb.mxu0 %v2725_v26  ;;  %v2719_v32 = vadd.f32 %v2707_v60, %v4366_v31  ;;  %v2717_v35 = vadd.f32 %v2707_v60, %v4369_v21  ;;  %v2715_v42 = vadd.f32 %v2707_v60, %v4354_v63 }
0x1583   :  { %2758 = vrot.lane.b32.xlu0 %v2713_v25, %s3270_s21  ;;  %2754 = vrot.lane.b32.xlu2 %v2711_v27, %s3270_s21  ;;  %v2723_v63 = vadd.f32 %v2707_v60, %v4428_v14  ;;  %v2721_v31 = vadd.f32 %v2707_v60, %v4380_v61 }
0x1584   :  { %2750 = vrot.lane.b32.xlu1 %v2709_v16, %s3270_s21  ;;  %2827 = vmatpush.msrb.mxu0 %v2724_v39 }
0x158b   :  { %2764 = vrot.lane.b32.xlu0 %v2716_v22, %s3270_s21  ;;  %2760 = vrot.lane.b32.xlu2 %v2714_v5, %s3270_s21 }
0x158c   :  { %2756 = vrot.lane.b32.xlu1 %v2712_v28, %s3270_s21 }
0x1593   :  { %2770 = vrot.lane.b32.xlu0 %v2719_v32, %s3270_s21  ;;  %2766 = vrot.lane.b32.xlu2 %v2717_v35, %s3270_s21 }
0x1594   :  { %2762 = vrot.lane.b32.xlu1 %v2715_v42, %s3270_s21 }
0x159b   :  { %2776 = vrot.lane.b32.xlu0 %v2722_v38, %s3270_s21  ;;  %2772 = vrot.lane.b32.xlu2 %v2720_v46, %s3270_s21 }
0x159c   :  { %2768 = vrot.lane.b32.xlu1 %v2718_v58, %s3270_s21 }
0x15a3   :  { %2778 = vrot.lane.b32.xlu2 %v2723_v63, %s3270_s21 }
0x15a4   :  { %2774 = vrot.lane.b32.xlu1 %v2721_v31, %s3270_s21 }
0x15d5   :  { %v2749_v21 = vpop.permute.xlu2 %2748 }
0x15d6   :  { %2990 = vmatmul.msk.f32.vlgmr.msrb.gmra.mxu0 %vm205_vm9, %v2749_v21 }
0x15dd   :  { %v2755_v34 = vpop.permute.xlu2 %2754 }
0x15e5   :  { %v2761_v14 = vpop.permute.xlu2 %2760 }
0x15ed   :  { %v2753_v36 = vpop.permute.xlu0 %2752  ;;  %v2767_v49 = vpop.permute.xlu2 %2766 }
0x15f5   :  { %v2759_v61 = vpop.permute.xlu0 %2758  ;;  %v2773_v48 = vpop.permute.xlu2 %2772 }
0x15f6   :  { %v2751_v51 = vpop.permute.xlu1 %2750 }
0x15f7   :  { %2991 = vmatmul.msk.f32.gmra.mxu0 %vm205_vm9, %v2751_v51 }
0x15fd   :  { %v2765_v23 = vpop.permute.xlu0 %2764  ;;  %v2779_v44 = vpop.permute.xlu2 %2778 }
0x15fe   :  { %v2757_v24 = vpop.permute.xlu1 %2756 }
0x15ff   :  { %2992 = vmatmul.msk.f32.gmra.mxu0 %vm205_vm9, %v2753_v36 }
0x1605   :  { %v2771_v19 = vpop.permute.xlu0 %2770 }
0x1606   :  { %v2763_v9 = vpop.permute.xlu1 %2762 }
0x1607   :  { %2993 = vmatmul.msk.f32.gmra.mxu0 %vm205_vm9, %v2755_v34 }
0x160d   :  { %v2777_v0 = vpop.permute.xlu0 %2776 }
0x160e   :  { %v2769_v33 = vpop.permute.xlu1 %2768 }
0x160f   :  { %2994 = vmatmul.msk.f32.gmra.mxu0 %vm205_vm9, %v2757_v24 }
0x1616   :  { %v2775_v53 = vpop.permute.xlu1 %2774 }
0x1617   :  { %2995 = vmatmul.msk.f32.gmra.mxu0 %vm205_vm9, %v2759_v61 }
0x161f   :  { %2996 = vmatmul.msk.f32.gmra.mxu0 %vm205_vm9, %v2761_v14 }
0x1627   :  { %2997 = vmatmul.msk.f32.gmra.mxu0 %vm205_vm9, %v2763_v9 }
0x162f   :  { %2998 = vmatmul.msk.f32.gmra.mxu0 %vm205_vm9, %v2765_v23 }
0x1637   :  { %2999 = vmatmul.msk.f32.gmra.mxu0 %vm205_vm9, %v2767_v49 }
0x163f   :  { %3000 = vmatmul.msk.f32.gmra.mxu0 %vm205_vm9, %v2769_v33 }
0x1647   :  { %3001 = vmatmul.msk.f32.gmra.mxu0 %vm205_vm9, %v2771_v19 }
0x164f   :  { %3002 = vmatmul.msk.f32.gmra.mxu0 %vm205_vm9, %v2773_v48 }
0x1653   :  { %v2829_v52 = vpop.f32.mrf.mxu0 }
0x1654   :  { %v2830_v12 = vadd.f32 %v3023_v55, %v2829_v52 }
0x1656   :  { %2878 = vst.msk [vmem:[%s4622_s14] sm:$0xff] %vm2877_vm4, %v2830_v12 }
0x1657   :  { %3003 = vmatmul.msk.f32.gmra.mxu0 %vm205_vm9, %v2775_v53 }
0x165f   :  { %3004 = vmatmul.msk.f32.gmra.mxu0 %vm205_vm9, %v2777_v0 }
0x1667   :  { %3005 = vmatmul.msk.f32.gmra.mxu0 %vm205_vm9, %v2779_v44 }
0x1674   :  { %v2832_v57 = vpop.f32.mrf.mxu0 }
0x1675   :  { %v2833_v10 = vadd.f32 %v3023_v55, %v2832_v57 }
0x1677   :  { %2879 = vst.msk [vmem:[%s4622_s14 + $0x8] sm:$0xff] %vm2877_vm4, %v2833_v10 }
0x167c   :  { %v2835_v8 = vpop.f32.mrf.mxu0 }
0x167d   :  { %v2836_v29 = vadd.f32 %v3023_v55, %v2835_v8 }
0x167f   :  { %2880 = vst.msk [vmem:[%s4622_s14 + $0x10] sm:$0xff] %vm2877_vm4, %v2836_v29 }
0x1684   :  { %v2838_v50 = vpop.f32.mrf.mxu0 }
0x1685   :  { %v2839_v1 = vadd.f32 %v3023_v55, %v2838_v50 }
0x1687   :  { %2881 = vst.msk [vmem:[%s4622_s14 + $0x18] sm:$0xff] %vm2877_vm4, %v2839_v1 }
0x168c   :  { %v2841_v40 = vpop.f32.mrf.mxu0 }
0x168d   :  { %v2842_v20 = vadd.f32 %v3023_v55, %v2841_v40 }
0x168f   :  { %2882 = vst.msk [vmem:[%s4622_s14 + $0x20] sm:$0xff] %vm2877_vm4, %v2842_v20 }
0x1694   :  { %v2844_v47 = vpop.f32.mrf.mxu0 }
0x1695   :  { %v2845_v6 = vadd.f32 %v3023_v55, %v2844_v47 }
0x1697   :  { %2883 = vst.msk [vmem:[%s4622_s14 + $0x28] sm:$0xff] %vm2877_vm4, %v2845_v6 }
0x169c   :  { %v2847_v3 = vpop.f32.mrf.mxu0 }
0x169d   :  { %v2848_v2 = vadd.f32 %v3023_v55, %v2847_v3 }
0x169f   :  { %2884 = vst.msk [vmem:[%s4622_s14 + $0x30] sm:$0xff] %vm2877_vm4, %v2848_v2 }
0x16a4   :  { %v2850_v56 = vpop.f32.mrf.mxu0 }
0x16a5   :  { %v2851_v11 = vadd.f32 %v3023_v55, %v2850_v56 }
0x16a7   :  { %2885 = vst.msk [vmem:[%s4622_s14 + $0x38] sm:$0xff] %vm2877_vm4, %v2851_v11 }
0x16ac   :  { %v2853_v54 = vpop.f32.mrf.mxu0 }
0x16ad   :  { %v2854_v7 = vadd.f32 %v3023_v55, %v2853_v54 }
0x16af   :  { %2886 = vst.msk [vmem:[%s4622_s14 + $0x40] sm:$0xff] %vm2877_vm4, %v2854_v7 }
0x16b4   :  { %v2856_v4 = vpop.f32.mrf.mxu0 }
0x16b5   :  { %v2857_v62 = vadd.f32 %v3023_v55, %v2856_v4 }
0x16b7   :  { %2887 = vst.msk [vmem:[%s4622_s14 + $0x48] sm:$0xff] %vm2877_vm4, %v2857_v62 }
0x16bc   :  { %v2859_v15 = vpop.f32.mrf.mxu0 }
0x16bd   :  { %v2860_v18 = vadd.f32 %v3023_v55, %v2859_v15 }
0x16bf   :  { %2888 = vst.msk [vmem:[%s4622_s14 + $0x50] sm:$0xff] %vm2877_vm4, %v2860_v18 }
0x16c4   :  { %v2862_v37 = vpop.f32.mrf.mxu0 }
0x16c5   :  { %v2863_v13 = vadd.f32 %v3023_v55, %v2862_v37 }
0x16c7   :  { %2889 = vst.msk [vmem:[%s4622_s14 + $0x58] sm:$0xff] %vm2877_vm4, %v2863_v13 }
0x16cc   :  { %v2865_v41 = vpop.f32.mrf.mxu0 }
0x16cd   :  { %v2866_v59 = vadd.f32 %v3023_v55, %v2865_v41 }
0x16cf   :  { %2890 = vst.msk [vmem:[%s4622_s14 + $0x60] sm:$0xff] %vm2877_vm4, %v2866_v59 }
0x16d4   :  { %v2868_v43 = vpop.f32.mrf.mxu0 }
0x16d5   :  { %v2869_v45 = vadd.f32 %v3023_v55, %v2868_v43 }
0x16d7   :  { %2891 = vst.msk [vmem:[%s4622_s14 + $0x68] sm:$0xff] %vm2877_vm4, %v2869_v45 }
0x16dc   :  { %v2871_v60 = vpop.f32.mrf.mxu0 }
0x16dd   :  { %v2872_v25 = vadd.f32 %v3023_v55, %v2871_v60 }
0x16df   :  { %2892 = vst.msk [vmem:[%s4622_s14 + $0x70] sm:$0xff] %vm2877_vm4, %v2872_v25 }
0x16e4   :  { %v2874_v27 = vpop.f32.mrf.mxu0 }
0x16e5   :  { %v2875_v16 = vadd.f32 %v3023_v55, %v2874_v27 }
0x16e7   :  { %2893 = vst.msk [vmem:[%s4622_s14 + $0x78] sm:$0xff] %vm2877_vm4, %v2875_v16 }

</bundles_post_ra>
